<compile_context>
chip_gen: v6e
topology: v6e:2x2x1
jax: 0.10.0
libtpu: 0.0.40
codegen_flags: <defaults>
</compile_context>

<pallas_src>
import functools
import math

import jax
import jax.numpy as jnp
from jax.experimental import pallas as pl
from jax.experimental.pallas import tpu as pltpu

LN_EPS = 1e-5


def _layer_norm(h, gamma, beta, eps=LN_EPS):
    mu = jnp.mean(h, axis=-1, keepdims=True)
    var = jnp.mean((h - mu) ** 2, axis=-1, keepdims=True)
    return (h - mu) * jax.lax.rsqrt(var + eps) * gamma + beta


# ---------------------------------------------------------------------------
# Kernel 1: Y_g = (d_g ⊙ X) @ W_g for g in {row, col}.  Row-tiled, parallel.
# ---------------------------------------------------------------------------
def _xw_kernel(x_ref, dr_ref, dc_ref, w_row_ref, w_col_ref, yr_ref, yc_ref):
    x = x_ref[...]
    xr = (x * dr_ref[...]).astype(jnp.bfloat16)
    xc = (x * dc_ref[...]).astype(jnp.bfloat16)
    yr_ref[...] = jnp.dot(xr, w_row_ref[...],
                          preferred_element_type=jnp.float32).astype(yr_ref.dtype)
    yc_ref[...] = jnp.dot(xc, w_col_ref[...],
                          preferred_element_type=jnp.float32).astype(yc_ref.dtype)


# ---------------------------------------------------------------------------
# Kernel 2: fused (A+I)@Y accumulation + d-scale + ReLU + Linear/LN chain.
# Grid = (row tiles [parallel], k tiles [arbitrary/reduction]).
# ---------------------------------------------------------------------------
def _dg_interaction_kernel(
    a_row_ref, a_col_ref,                       # (tm, tk) bf16 adjacency tiles
    yr_k_ref, yc_k_ref,                         # (tk, H) bf16, contraction views
    yr_i_ref, yc_i_ref,                         # (tm, H) bf16, self-loop views
    dr_ref, dc_ref,                             # (tm, 1) f32
    b_row_ref, b_col_ref,                       # (1, H) f32
    w_rs_ref, b_rs_ref, g_rs_ref, be_rs_ref,
    w_cs_ref, b_cs_ref, g_cs_ref, be_cs_ref,
    w_m_row_ref, w_m_col_ref, b_m_ref, g_m_ref, be_m_ref,
    o_ref,                                      # (tm, O) f32
    acc_row_ref, acc_col_ref,                   # scratch (tm, H) f32
):
    k = pl.program_id(1)

    @pl.when(k == 0)
    def _init():
        # self-loop contribution of (A + I) @ Y  ==  Y[tile rows]
        acc_row_ref[...] = yr_i_ref[...].astype(jnp.float32)
        acc_col_ref[...] = yc_i_ref[...].astype(jnp.float32)

    acc_row_ref[...] += jnp.dot(a_row_ref[...], yr_k_ref[...],
                                preferred_element_type=jnp.float32)
    acc_col_ref[...] += jnp.dot(a_col_ref[...], yc_k_ref[...],
                                preferred_element_type=jnp.float32)

    @pl.when(k == pl.num_programs(1) - 1)
    def _finalize():
        # Row branch fully, then col branch, then merge (short live ranges).
        rowg = jnp.maximum(acc_row_ref[...] * dr_ref[...] + b_row_ref[...], 0.0)
        rs = jnp.dot(rowg.astype(jnp.bfloat16), w_rs_ref[...],
                     preferred_element_type=jnp.float32) + b_rs_ref[...]
        rs = _layer_norm(rs, g_rs_ref[...], be_rs_ref[...])
        merged = jnp.dot(rs.astype(jnp.bfloat16), w_m_row_ref[...],
                         preferred_element_type=jnp.float32)

        colg = jnp.maximum(acc_col_ref[...] * dc_ref[...] + b_col_ref[...], 0.0)
        cs = jnp.dot(colg.astype(jnp.bfloat16), w_cs_ref[...],
                     preferred_element_type=jnp.float32) + b_cs_ref[...]
        cs = _layer_norm(cs, g_cs_ref[...], be_cs_ref[...])
        merged = merged + jnp.dot(cs.astype(jnp.bfloat16), w_m_col_ref[...],
                                  preferred_element_type=jnp.float32) + b_m_ref[...]

        o_ref[...] = _layer_norm(merged, g_m_ref[...], be_m_ref[...]).astype(o_ref.dtype)


def _vmem_limit_bytes(tm, tk, d_in, h, o):
    bf, f4 = 2, 4
    tiled = 2 * (2 * tm * tk * bf + 2 * tk * h * bf + 2 * tm * h * bf
                 + 2 * tm * f4 + tm * o * f4)                    # double-buffered tiles
    consts = 2 * (2 * h * f4 + 2 * h * o * bf + 2 * o * o * bf + 9 * o * f4)
    scratch = 2 * tm * h * f4
    est = int(1.5 * (tiled + consts + scratch))
    return int(min(max(est, 32 * 1024 * 1024), 64 * 1024 * 1024))


@functools.partial(jax.jit, static_argnames=("tm", "tk"))
def dg_interaction(table_feat, row_graph, col_graph, params, *, tm=128, tk=128):
    n, d_in = table_feat.shape
    h = params["w_row"].shape[1]
    o = params["w_rs"].shape[1]

    # Pad node count so both grid axes tile evenly (padded nodes are isolated
    # zero rows/cols; their outputs are sliced off and they do not perturb degrees).
    mult = math.lcm(tm, tk)
    n_pad = (-n) % mult
    np_ = n + n_pad

    a_row = row_graph.astype(jnp.float32)
    a_col = col_graph.astype(jnp.float32)
    x = table_feat.astype(jnp.float32)
    if n_pad:
        a_row = jnp.pad(a_row, ((0, n_pad), (0, n_pad)))
        a_col = jnp.pad(a_col, ((0, n_pad), (0, n_pad)))
        x = jnp.pad(x, ((0, n_pad), (0, 0)))

    # d = (deg + 1)^{-1/2}  (self-loop included) -- the only extra pass over A.
    d_row = jax.lax.rsqrt(jnp.sum(a_row, axis=1, keepdims=True) + 1.0)
    d_col = jax.lax.rsqrt(jnp.sum(a_col, axis=1, keepdims=True) + 1.0)

    a_row_bf = a_row.astype(jnp.bfloat16)
    a_col_bf = a_col.astype(jnp.bfloat16)
    w_row_bf = params["w_row"].astype(jnp.bfloat16)
    w_col_bf = params["w_col"].astype(jnp.bfloat16)
    w_rs_bf = params["w_rs"].astype(jnp.bfloat16)
    w_cs_bf = params["w_cs"].astype(jnp.bfloat16)
    w_m_row_bf = params["w_m_row"].astype(jnp.bfloat16)
    w_m_col_bf = params["w_m_col"].astype(jnp.bfloat16)

    # ---- kernel 1: Y = (d ⊙ X) @ W, both graphs, row-tiled ----
    y_row, y_col = pl.pallas_call(
        _xw_kernel,
        out_shape=(jax.ShapeDtypeStruct((np_, h), jnp.bfloat16),
                   jax.ShapeDtypeStruct((np_, h), jnp.bfloat16)),
        grid=(np_ // tm,),
        in_specs=[
            pl.BlockSpec((tm, d_in), lambda i: (i, 0)),
            pl.BlockSpec((tm, 1), lambda i: (i, 0)),
            pl.BlockSpec((tm, 1), lambda i: (i, 0)),
            pl.BlockSpec((d_in, h), lambda i: (0, 0)),
            pl.BlockSpec((d_in, h), lambda i: (0, 0)),
        ],
        out_specs=(
            pl.BlockSpec((tm, h), lambda i: (i, 0)),
            pl.BlockSpec((tm, h), lambda i: (i, 0)),
        ),
        compiler_params=pltpu.CompilerParams(
            dimension_semantics=("parallel",)),
    )(x, d_row, d_col, w_row_bf, w_col_bf)

    # ---- kernel 2: fused aggregation + Linear/LayerNorm chain ----
    args = (
        a_row_bf, a_col_bf,
        y_row, y_col, y_row, y_col,
        d_row, d_col,
        params["b_row"], params["b_col"],
        w_rs_bf, params["b_rs"], params["g_rs"], params["be_rs"],
        w_cs_bf, params["b_cs"], params["g_cs"], params["be_cs"],
        w_m_row_bf, w_m_col_bf, params["b_m"], params["g_m"], params["be_m"],
    )

    def _full(shape):
        return pl.BlockSpec(shape, lambda i, k: (0,) * len(shape))

    in_specs = [
        pl.BlockSpec((tm, tk), lambda i, k: (i, k)),   # a_row tile
        pl.BlockSpec((tm, tk), lambda i, k: (i, k)),   # a_col tile
        pl.BlockSpec((tk, h), lambda i, k: (k, 0)),    # y_row contraction view
        pl.BlockSpec((tk, h), lambda i, k: (k, 0)),    # y_col contraction view
        pl.BlockSpec((tm, h), lambda i, k: (i, 0)),    # y_row self-loop view
        pl.BlockSpec((tm, h), lambda i, k: (i, 0)),    # y_col self-loop view
        pl.BlockSpec((tm, 1), lambda i, k: (i, 0)),    # d_row tile
        pl.BlockSpec((tm, 1), lambda i, k: (i, 0)),    # d_col tile
    ] + [_full(a.shape) for a in args[8:]]

    out = pl.pallas_call(
        _dg_interaction_kernel,
        out_shape=jax.ShapeDtypeStruct((np_, o), jnp.float32),
        grid=(np_ // tm, np_ // tk),
        in_specs=in_specs,
        out_specs=pl.BlockSpec((tm, o), lambda i, k: (i, 0)),
        scratch_shapes=[pltpu.VMEM((tm, h), jnp.float32),
                        pltpu.VMEM((tm, h), jnp.float32)],
        compiler_params=pltpu.CompilerParams(
            dimension_semantics=("parallel", "arbitrary"),
            vmem_limit_bytes=_vmem_limit_bytes(tm, tk, d_in, h, o)),
    )(*args)

    return out[:n]


def init_params(key, input_dim, hidden_dim, output_dim):
    """Deterministic synthetic parameters. Linear weights stored as [in, out]
    (PyTorch weight transposed) so kernels do x @ W + b directly."""
    ks = jax.random.split(key, 8)
    scale = 0.1
    row2 = lambda v: v.reshape(1, -1)   # 1D params kept as [1, dim] tiles
    return {
        "w_row": scale * jax.random.normal(ks[0], (input_dim, hidden_dim), jnp.float32),
        "b_row": row2(jnp.zeros((hidden_dim,), jnp.float32)),
        "w_col": scale * jax.random.normal(ks[1], (input_dim, hidden_dim), jnp.float32),
        "b_col": row2(jnp.zeros((hidden_dim,), jnp.float32)),

        "w_rs": scale * jax.random.normal(ks[2], (hidden_dim, output_dim), jnp.float32),
        "b_rs": row2(scale * jax.random.normal(ks[3], (output_dim,), jnp.float32)),
        "g_rs": row2(jnp.ones((output_dim,), jnp.float32)),
        "be_rs": row2(jnp.zeros((output_dim,), jnp.float32)),

        "w_cs": scale * jax.random.normal(ks[4], (hidden_dim, output_dim), jnp.float32),
        "b_cs": row2(scale * jax.random.normal(ks[5], (output_dim,), jnp.float32)),
        "g_cs": row2(jnp.ones((output_dim,), jnp.float32)),
        "be_cs": row2(jnp.zeros((output_dim,), jnp.float32)),

        # graph_merge Linear weight [2*output_dim, output_dim], split into halves
        "w_m_row": scale * jax.random.normal(ks[6], (output_dim, output_dim), jnp.float32),
        "w_m_col": scale * jax.random.normal(ks[7], (output_dim, output_dim), jnp.float32),
        "b_m": row2(jnp.zeros((output_dim,), jnp.float32)),
        "g_m": row2(jnp.ones((output_dim,), jnp.float32)),
        "be_m": row2(jnp.zeros((output_dim,), jnp.float32)),
    }


if __name__ == "__main__":
    # Small but tile-friendly shapes: N=256 nodes, lane-dense feature dims (128).
    N, DIM = 256, 128
    key = jax.random.PRNGKey(0)
    k_feat, k_rg, k_cg, k_par = jax.random.split(key, 4)

    table_feat = jax.random.normal(k_feat, (N, DIM), jnp.float32)
    row_graph = (jax.random.uniform(k_rg, (N, N)) > 0.5).astype(jnp.float32)
    col_graph = (jax.random.uniform(k_cg, (N, N)) > 0.5).astype(jnp.float32)
    # symmetrize adjacencies (undirected graphs)
    row_graph = jnp.maximum(row_graph, row_graph.T)
    col_graph = jnp.maximum(col_graph, col_graph.T)

    params = init_params(k_par, DIM, DIM, DIM)

    out = dg_interaction(table_feat, row_graph, col_graph, params)
    jax.block_until_ready(out)
    assert out.shape == (N, DIM) and out.dtype == jnp.float32
    assert bool(jnp.all(jnp.isfinite(out)))
    print("KERNEL_OK")
</pallas_src>

<mosaic_0001>
module attributes {stable_mosaic.version = 11 : i64} {
  func.func @_xw_kernel(%arg0: i32, %arg1: memref<128x128xf32, #tpu.memory_space<vmem>>, %arg2: memref<128x1xf32, #tpu.memory_space<vmem>>, %arg3: memref<128x1xf32, #tpu.memory_space<vmem>>, %arg4: memref<128x128xbf16, #tpu.memory_space<vmem>>, %arg5: memref<128x128xbf16, #tpu.memory_space<vmem>>, %arg6: memref<128x128xbf16, #tpu.memory_space<vmem>>, %arg7: memref<128x128xbf16, #tpu.memory_space<vmem>>) attributes {dimension_semantics = [#tpu.dimension_semantics<parallel>], iteration_bounds = array<i64: 2>, scalar_prefetch = 0 : i64, scratch_operands = 0 : i64, tpu.core_type = #tpu.core_type<tc>, window_params = [{transform_indices = @transform_0, window_bounds = array<i64: 128, 128>}, {transform_indices = @transform_1, window_bounds = array<i64: 128, 1>}, {transform_indices = @transform_2, window_bounds = array<i64: 128, 1>}, {pipeline_mode = #tpu.pipeline_mode<synchronous>, transform_indices = @transform_3, window_bounds = array<i64: 128, 128>}, {pipeline_mode = #tpu.pipeline_mode<synchronous>, transform_indices = @transform_4, window_bounds = array<i64: 128, 128>}, {transform_indices = @transform_5, window_bounds = array<i64: 128, 128>}, {transform_indices = @transform_6, window_bounds = array<i64: 128, 128>}]} {
    %c0 = arith.constant 0 : index
    %c0_0 = arith.constant 0 : index
    %0 = vector.load %arg1[%c0, %c0_0] : memref<128x128xf32, #tpu.memory_space<vmem>>, vector<128x128xf32>
    %c0_1 = arith.constant 0 : index
    %c0_2 = arith.constant 0 : index
    %1 = vector.load %arg2[%c0_1, %c0_2] : memref<128x1xf32, #tpu.memory_space<vmem>>, vector<128x1xf32>
    %2 = vector.broadcast %1 : vector<128x1xf32> to vector<128x128xf32>
    %3 = arith.mulf %0, %2 : vector<128x128xf32>
    %4 = arith.truncf %3 : vector<128x128xf32> to vector<128x128xbf16>
    %c0_3 = arith.constant 0 : index
    %c0_4 = arith.constant 0 : index
    %5 = vector.load %arg3[%c0_3, %c0_4] : memref<128x1xf32, #tpu.memory_space<vmem>>, vector<128x1xf32>
    %6 = vector.broadcast %5 : vector<128x1xf32> to vector<128x128xf32>
    %7 = arith.mulf %0, %6 : vector<128x128xf32>
    %8 = arith.truncf %7 : vector<128x128xf32> to vector<128x128xbf16>
    %c0_5 = arith.constant 0 : index
    %c0_6 = arith.constant 0 : index
    %9 = vector.load %arg4[%c0_5, %c0_6] : memref<128x128xbf16, #tpu.memory_space<vmem>>, vector<128x128xbf16>
    %cst = arith.constant dense<0.000000e+00> : vector<128x128xf32>
    %10 = tpu.matmul %4, %9, %cst {dimension_numbers = #tpu.dot_dimension_numbers<[1], [0], [0], [1], [0, 0, 1, 1], [], []>} : vector<128x128xbf16>, vector<128x128xbf16>, vector<128x128xf32> -> vector<128x128xf32>
    %11 = arith.truncf %10 : vector<128x128xf32> to vector<128x128xbf16>
    %c0_7 = arith.constant 0 : index
    %c0_8 = arith.constant 0 : index
    %12 = vector.load %arg6[%c0_7, %c0_8] : memref<128x128xbf16, #tpu.memory_space<vmem>>, vector<128x128xbf16>
    tpu.vector_store %arg6[%c0_7, %c0_8], %11 {strides = array<i32>} : memref<128x128xbf16, #tpu.memory_space<vmem>>, vector<128x128xbf16>,
    %c0_9 = arith.constant 0 : index
    %c0_10 = arith.constant 0 : index
    %13 = vector.load %arg5[%c0_9, %c0_10] : memref<128x128xbf16, #tpu.memory_space<vmem>>, vector<128x128xbf16>
    %cst_11 = arith.constant dense<0.000000e+00> : vector<128x128xf32>
    %14 = tpu.matmul %8, %13, %cst_11 {dimension_numbers = #tpu.dot_dimension_numbers<[1], [0], [0], [1], [0, 0, 1, 1], [], []>} : vector<128x128xbf16>, vector<128x128xbf16>, vector<128x128xf32> -> vector<128x128xf32>
    %15 = arith.truncf %14 : vector<128x128xf32> to vector<128x128xbf16>
    %c0_12 = arith.constant 0 : index
    %c0_13 = arith.constant 0 : index
    %16 = vector.load %arg7[%c0_12, %c0_13] : memref<128x128xbf16, #tpu.memory_space<vmem>>, vector<128x128xbf16>
    tpu.vector_store %arg7[%c0_12, %c0_13], %15 {strides = array<i32>} : memref<128x128xbf16, #tpu.memory_space<vmem>>, vector<128x128xbf16>,
    return
  }
  func.func @transform_0(%arg0: i32) -> (i32, i32) {
    %c0_i32 = arith.constant 0 : i32
    %c0_i32_0 = arith.constant 0 : i32
    return %arg0, %c0_i32 : i32, i32
  }
  func.func @transform_1(%arg0: i32) -> (i32, i32) {
    %c0_i32 = arith.constant 0 : i32
    %c0_i32_0 = arith.constant 0 : i32
    return %arg0, %c0_i32 : i32, i32
  }
  func.func @transform_2(%arg0: i32) -> (i32, i32) {
    %c0_i32 = arith.constant 0 : i32
    %c0_i32_0 = arith.constant 0 : i32
    return %arg0, %c0_i32 : i32, i32
  }
  func.func @transform_3(%arg0: i32) -> (i32, i32) {
    %c0_i32 = arith.constant 0 : i32
    %c0_i32_0 = arith.constant 0 : i32
    %c0_i32_1 = arith.constant 0 : i32
    return %c0_i32, %c0_i32_0 : i32, i32
  }
  func.func @transform_4(%arg0: i32) -> (i32, i32) {
    %c0_i32 = arith.constant 0 : i32
    %c0_i32_0 = arith.constant 0 : i32
    %c0_i32_1 = arith.constant 0 : i32
    return %c0_i32, %c0_i32_0 : i32, i32
  }
  func.func @transform_5(%arg0: i32) -> (i32, i32) {
    %c0_i32 = arith.constant 0 : i32
    %c0_i32_0 = arith.constant 0 : i32
    return %arg0, %c0_i32 : i32, i32
  }
  func.func @transform_6(%arg0: i32) -> (i32, i32) {
    %c0_i32 = arith.constant 0 : i32
    %c0_i32_0 = arith.constant 0 : i32
    return %arg0, %c0_i32 : i32, i32
  }
}

module attributes {stable_mosaic.version = 11 : i64} {
  func.func @_dg_interaction_kernel(%arg0: i32, %arg1: i32, %arg2: memref<128x128xbf16, #tpu.memory_space<vmem>>, %arg3: memref<128x128xbf16, #tpu.memory_space<vmem>>, %arg4: memref<128x128xbf16, #tpu.memory_space<vmem>>, %arg5: memref<128x128xbf16, #tpu.memory_space<vmem>>, %arg6: memref<128x128xbf16, #tpu.memory_space<vmem>>, %arg7: memref<128x128xbf16, #tpu.memory_space<vmem>>, %arg8: memref<128x1xf32, #tpu.memory_space<vmem>>, %arg9: memref<128x1xf32, #tpu.memory_space<vmem>>, %arg10: memref<1x128xf32, #tpu.memory_space<vmem>>, %arg11: memref<1x128xf32, #tpu.memory_space<vmem>>, %arg12: memref<128x128xbf16, #tpu.memory_space<vmem>>, %arg13: memref<1x128xf32, #tpu.memory_space<vmem>>, %arg14: memref<1x128xf32, #tpu.memory_space<vmem>>, %arg15: memref<1x128xf32, #tpu.memory_space<vmem>>, %arg16: memref<128x128xbf16, #tpu.memory_space<vmem>>, %arg17: memref<1x128xf32, #tpu.memory_space<vmem>>, %arg18: memref<1x128xf32, #tpu.memory_space<vmem>>, %arg19: memref<1x128xf32, #tpu.memory_space<vmem>>, %arg20: memref<128x128xbf16, #tpu.memory_space<vmem>>, %arg21: memref<128x128xbf16, #tpu.memory_space<vmem>>, %arg22: memref<1x128xf32, #tpu.memory_space<vmem>>, %arg23: memref<1x128xf32, #tpu.memory_space<vmem>>, %arg24: memref<1x128xf32, #tpu.memory_space<vmem>>, %arg25: memref<128x128xf32, #tpu.memory_space<vmem>>, %arg26: memref<128x128xf32, #tpu.memory_space<vmem>>, %arg27: memref<128x128xf32, #tpu.memory_space<vmem>>) attributes {dimension_semantics = [#tpu.dimension_semantics<parallel>, #tpu.dimension_semantics<arbitrary>], iteration_bounds = array<i64: 2, 2>, scalar_prefetch = 0 : i64, scratch_operands = 2 : i64, tpu.core_type = #tpu.core_type<tc>, window_params = [{transform_indices = @transform_0, window_bounds = array<i64: 128, 128>}, {transform_indices = @transform_1, window_bounds = array<i64: 128, 128>}, {transform_indices = @transform_2, window_bounds = array<i64: 128, 128>}, {transform_indices = @transform_3, window_bounds = array<i64: 128, 128>}, {transform_indices = @transform_4, window_bounds = array<i64: 128, 128>}, {transform_indices = @transform_5, window_bounds = array<i64: 128, 128>}, {transform_indices = @transform_6, window_bounds = array<i64: 128, 1>}, {transform_indices = @transform_7, window_bounds = array<i64: 128, 1>}, {pipeline_mode = #tpu.pipeline_mode<synchronous>, transform_indices = @transform_8, window_bounds = array<i64: 1, 128>}, {pipeline_mode = #tpu.pipeline_mode<synchronous>, transform_indices = @transform_9, window_bounds = array<i64: 1, 128>}, {pipeline_mode = #tpu.pipeline_mode<synchronous>, transform_indices = @transform_10, window_bounds = array<i64: 128, 128>}, {pipeline_mode = #tpu.pipeline_mode<synchronous>, transform_indices = @transform_11, window_bounds = array<i64: 1, 128>}, {pipeline_mode = #tpu.pipeline_mode<synchronous>, transform_indices = @transform_12, window_bounds = array<i64: 1, 128>}, {pipeline_mode = #tpu.pipeline_mode<synchronous>, transform_indices = @transform_13, window_bounds = array<i64: 1, 128>}, {pipeline_mode = #tpu.pipeline_mode<synchronous>, transform_indices = @transform_14, window_bounds = array<i64: 128, 128>}, {pipeline_mode = #tpu.pipeline_mode<synchronous>, transform_indices = @transform_15, window_bounds = array<i64: 1, 128>}, {pipeline_mode = #tpu.pipeline_mode<synchronous>, transform_indices = @transform_16, window_bounds = array<i64: 1, 128>}, {pipeline_mode = #tpu.pipeline_mode<synchronous>, transform_indices = @transform_17, window_bounds = array<i64: 1, 128>}, {pipeline_mode = #tpu.pipeline_mode<synchronous>, transform_indices = @transform_18, window_bounds = array<i64: 128, 128>}, {pipeline_mode = #tpu.pipeline_mode<synchronous>, transform_indices = @transform_19, window_bounds = array<i64: 128, 128>}, {pipeline_mode = #tpu.pipeline_mode<synchronous>, transform_indices = @transform_20, window_bounds = array<i64: 1, 128>}, {pipeline_mode = #tpu.pipeline_mode<synchronous>, transform_indices = @transform_21, window_bounds = array<i64: 1, 128>}, {pipeline_mode = #tpu.pipeline_mode<synchronous>, transform_indices = @transform_22, window_bounds = array<i64: 1, 128>}, {transform_indices = @transform_23, window_bounds = array<i64: 128, 128>}]} {
    %c0_i32 = arith.constant 0 : i32
    %0 = arith.cmpi eq, %arg1, %c0_i32 : i32
    %1 = arith.extui %0 : i1 to i32
    %c0_i32_0 = arith.constant 0 : i32
    %2 = arith.cmpi ne, %1, %c0_i32_0 : i32
    scf.if %2 {
      %c0_18 = arith.constant 0 : index
      %c0_19 = arith.constant 0 : index
      %18 = vector.load %arg6[%c0_18, %c0_19] : memref<128x128xbf16, #tpu.memory_space<vmem>>, vector<128x128xbf16>
      %19 = arith.extf %18 : vector<128x128xbf16> to vector<128x128xf32>
      %c0_20 = arith.constant 0 : index
      %c0_21 = arith.constant 0 : index
      %20 = vector.load %arg26[%c0_20, %c0_21] : memref<128x128xf32, #tpu.memory_space<vmem>>, vector<128x128xf32>
      tpu.vector_store %arg26[%c0_20, %c0_21], %19 {strides = array<i32>} : memref<128x128xf32, #tpu.memory_space<vmem>>, vector<128x128xf32>,
      %c0_22 = arith.constant 0 : index
      %c0_23 = arith.constant 0 : index
      %21 = vector.load %arg7[%c0_22, %c0_23] : memref<128x128xbf16, #tpu.memory_space<vmem>>, vector<128x128xbf16>
      %22 = arith.extf %21 : vector<128x128xbf16> to vector<128x128xf32>
      %c0_24 = arith.constant 0 : index
      %c0_25 = arith.constant 0 : index
      %23 = vector.load %arg27[%c0_24, %c0_25] : memref<128x128xf32, #tpu.memory_space<vmem>>, vector<128x128xf32>
      tpu.vector_store %arg27[%c0_24, %c0_25], %22 {strides = array<i32>} : memref<128x128xf32, #tpu.memory_space<vmem>>, vector<128x128xf32>,
    } else {
    }
    %c0 = arith.constant 0 : index
    %c0_1 = arith.constant 0 : index
    %3 = vector.load %arg26[%c0, %c0_1] : memref<128x128xf32, #tpu.memory_space<vmem>>, vector<128x128xf32>
    %c0_2 = arith.constant 0 : index
    %c0_3 = arith.constant 0 : index
    %4 = vector.load %arg2[%c0_2, %c0_3] : memref<128x128xbf16, #tpu.memory_space<vmem>>, vector<128x128xbf16>
    %c0_4 = arith.constant 0 : index
    %c0_5 = arith.constant 0 : index
    %5 = vector.load %arg4[%c0_4, %c0_5] : memref<128x128xbf16, #tpu.memory_space<vmem>>, vector<128x128xbf16>
    %cst = arith.constant dense<0.000000e+00> : vector<128x128xf32>
    %6 = tpu.matmul %4, %5, %cst {dimension_numbers = #tpu.dot_dimension_numbers<[1], [0], [0], [1], [0, 0, 1, 1], [], []>} : vector<128x128xbf16>, vector<128x128xbf16>, vector<128x128xf32> -> vector<128x128xf32>
    %7 = arith.addf %3, %6 : vector<128x128xf32>
    %c0_6 = arith.constant 0 : index
    %c0_7 = arith.constant 0 : index
    %8 = vector.load %arg26[%c0_6, %c0_7] : memref<128x128xf32, #tpu.memory_space<vmem>>, vector<128x128xf32>
    tpu.vector_store %arg26[%c0_6, %c0_7], %7 {strides = array<i32>} : memref<128x128xf32, #tpu.memory_space<vmem>>, vector<128x128xf32>,
    %c0_8 = arith.constant 0 : index
    %c0_9 = arith.constant 0 : index
    %9 = vector.load %arg27[%c0_8, %c0_9] : memref<128x128xf32, #tpu.memory_space<vmem>>, vector<128x128xf32>
    %c0_10 = arith.constant 0 : index
    %c0_11 = arith.constant 0 : index
    %10 = vector.load %arg3[%c0_10, %c0_11] : memref<128x128xbf16, #tpu.memory_space<vmem>>, vector<128x128xbf16>
    %c0_12 = arith.constant 0 : index
    %c0_13 = arith.constant 0 : index
    %11 = vector.load %arg5[%c0_12, %c0_13] : memref<128x128xbf16, #tpu.memory_space<vmem>>, vector<128x128xbf16>
    %cst_14 = arith.constant dense<0.000000e+00> : vector<128x128xf32>
    %12 = tpu.matmul %10, %11, %cst_14 {dimension_numbers = #tpu.dot_dimension_numbers<[1], [0], [0], [1], [0, 0, 1, 1], [], []>} : vector<128x128xbf16>, vector<128x128xbf16>, vector<128x128xf32> -> vector<128x128xf32>
    %13 = arith.addf %9, %12 : vector<128x128xf32>
    %c0_15 = arith.constant 0 : index
    %c0_16 = arith.constant 0 : index
    %14 = vector.load %arg27[%c0_15, %c0_16] : memref<128x128xf32, #tpu.memory_space<vmem>>, vector<128x128xf32>
    tpu.vector_store %arg27[%c0_15, %c0_16], %13 {strides = array<i32>} : memref<128x128xf32, #tpu.memory_space<vmem>>, vector<128x128xf32>,
    %c1_i32 = arith.constant 1 : i32
    %15 = arith.cmpi eq, %arg1, %c1_i32 : i32
    %16 = arith.extui %15 : i1 to i32
    %c0_i32_17 = arith.constant 0 : i32
    %17 = arith.cmpi ne, %16, %c0_i32_17 : i32
    scf.if %17 {
      %c0_18 = arith.constant 0 : index
      %c0_19 = arith.constant 0 : index
      %18 = vector.load %arg26[%c0_18, %c0_19] : memref<128x128xf32, #tpu.memory_space<vmem>>, vector<128x128xf32>
      %c0_20 = arith.constant 0 : index
      %c0_21 = arith.constant 0 : index
      %19 = vector.load %arg8[%c0_20, %c0_21] : memref<128x1xf32, #tpu.memory_space<vmem>>, vector<128x1xf32>
      %20 = vector.broadcast %19 : vector<128x1xf32> to vector<128x128xf32>
      %21 = arith.mulf %18, %20 : vector<128x128xf32>
      %c0_22 = arith.constant 0 : index
      %c0_23 = arith.constant 0 : index
      %22 = vector.load %arg10[%c0_22, %c0_23] : memref<1x128xf32, #tpu.memory_space<vmem>>, vector<1x128xf32>
      %23 = vector.broadcast %22 : vector<1x128xf32> to vector<128x128xf32>
      %24 = arith.addf %21, %23 : vector<128x128xf32>
      %cst_24 = arith.constant 0.000000e+00 : f32
      %25 = vector.broadcast %cst_24 : f32 to vector<128x128xf32>
      %26 = arith.maximumf %24, %25 : vector<128x128xf32>
      %27 = arith.truncf %26 : vector<128x128xf32> to vector<128x128xbf16>
      %c0_25 = arith.constant 0 : index
      %c0_26 = arith.constant 0 : index
      %28 = vector.load %arg12[%c0_25, %c0_26] : memref<128x128xbf16, #tpu.memory_space<vmem>>, vector<128x128xbf16>
      %cst_27 = arith.constant dense<0.000000e+00> : vector<128x128xf32>
      %29 = tpu.matmul %27, %28, %cst_27 {dimension_numbers = #tpu.dot_dimension_numbers<[1], [0], [0], [1], [0, 0, 1, 1], [], []>} : vector<128x128xbf16>, vector<128x128xbf16>, vector<128x128xf32> -> vector<128x128xf32>
      %c0_28 = arith.constant 0 : index
      %c0_29 = arith.constant 0 : index
      %30 = vector.load %arg13[%c0_28, %c0_29] : memref<1x128xf32, #tpu.memory_space<vmem>>, vector<1x128xf32>
      %31 = vector.broadcast %30 : vector<1x128xf32> to vector<128x128xf32>
      %32 = arith.addf %29, %31 : vector<128x128xf32>
      %c0_30 = arith.constant 0 : index
      %c0_31 = arith.constant 0 : index
      %33 = vector.load %arg14[%c0_30, %c0_31] : memref<1x128xf32, #tpu.memory_space<vmem>>, vector<1x128xf32>
      %c0_32 = arith.constant 0 : index
      %c0_33 = arith.constant 0 : index
      %34 = vector.load %arg15[%c0_32, %c0_33] : memref<1x128xf32, #tpu.memory_space<vmem>>, vector<1x128xf32>
      %cst_34 = arith.constant dense<0.000000e+00> : vector<128xf32>
      %35 = vector.multi_reduction <add>, %32, %cst_34 [1] : vector<128x128xf32> to vector<128xf32>
      %36 = vector.shape_cast %35 : vector<128xf32> to vector<128x1xf32>
      %cst_35 = arith.constant 1.280000e+02 : f32
      %37 = vector.broadcast %cst_35 : f32 to vector<128x1xf32>
      %38 = arith.divf %36, %37 : vector<128x1xf32>
      %39 = vector.broadcast %38 : vector<128x1xf32> to vector<128x128xf32>
      %40 = arith.subf %32, %39 : vector<128x128xf32>
      %41 = arith.mulf %40, %40 : vector<128x128xf32>
      %cst_36 = arith.constant dense<0.000000e+00> : vector<128xf32>
      %42 = vector.multi_reduction <add>, %41, %cst_36 [1] : vector<128x128xf32> to vector<128xf32>
      %43 = vector.shape_cast %42 : vector<128xf32> to vector<128x1xf32>
      %cst_37 = arith.constant 1.280000e+02 : f32
      %44 = vector.broadcast %cst_37 : f32 to vector<128x1xf32>
      %45 = arith.divf %43, %44 : vector<128x1xf32>
      %46 = vector.broadcast %38 : vector<128x1xf32> to vector<128x128xf32>
      %47 = arith.subf %32, %46 : vector<128x128xf32>
      %cst_38 = arith.constant 9.99999974E-6 : f32
      %48 = vector.broadcast %cst_38 : f32 to vector<128x1xf32>
      %49 = arith.addf %45, %48 : vector<128x1xf32>
      %50 = math.rsqrt %49 : vector<128x1xf32>
      %51 = vector.broadcast %50 : vector<128x1xf32> to vector<128x128xf32>
      %52 = arith.mulf %47, %51 : vector<128x128xf32>
      %53 = vector.broadcast %33 : vector<1x128xf32> to vector<128x128xf32>
      %54 = arith.mulf %52, %53 : vector<128x128xf32>
      %55 = vector.broadcast %34 : vector<1x128xf32> to vector<128x128xf32>
      %56 = arith.addf %54, %55 : vector<128x128xf32>
      %57 = arith.truncf %56 : vector<128x128xf32> to vector<128x128xbf16>
      %c0_39 = arith.constant 0 : index
      %c0_40 = arith.constant 0 : index
      %58 = vector.load %arg20[%c0_39, %c0_40] : memref<128x128xbf16, #tpu.memory_space<vmem>>, vector<128x128xbf16>
      %cst_41 = arith.constant dense<0.000000e+00> : vector<128x128xf32>
      %59 = tpu.matmul %57, %58, %cst_41 {dimension_numbers = #tpu.dot_dimension_numbers<[1], [0], [0], [1], [0, 0, 1, 1], [], []>} : vector<128x128xbf16>, vector<128x128xbf16>, vector<128x128xf32> -> vector<128x128xf32>
      %c0_42 = arith.constant 0 : index
      %c0_43 = arith.constant 0 : index
      %60 = vector.load %arg27[%c0_42, %c0_43] : memref<128x128xf32, #tpu.memory_space<vmem>>, vector<128x128xf32>
      %c0_44 = arith.constant 0 : index
      %c0_45 = arith.constant 0 : index
      %61 = vector.load %arg9[%c0_44, %c0_45] : memref<128x1xf32, #tpu.memory_space<vmem>>, vector<128x1xf32>
      %62 = vector.broadcast %61 : vector<128x1xf32> to vector<128x128xf32>
      %63 = arith.mulf %60, %62 : vector<128x128xf32>
      %c0_46 = arith.constant 0 : index
      %c0_47 = arith.constant 0 : index
      %64 = vector.load %arg11[%c0_46, %c0_47] : memref<1x128xf32, #tpu.memory_space<vmem>>, vector<1x128xf32>
      %65 = vector.broadcast %64 : vector<1x128xf32> to vector<128x128xf32>
      %66 = arith.addf %63, %65 : vector<128x128xf32>
      %cst_48 = arith.constant 0.000000e+00 : f32
      %67 = vector.broadcast %cst_48 : f32 to vector<128x128xf32>
      %68 = arith.maximumf %66, %67 : vector<128x128xf32>
      %69 = arith.truncf %68 : vector<128x128xf32> to vector<128x128xbf16>
      %c0_49 = arith.constant 0 : index
      %c0_50 = arith.constant 0 : index
      %70 = vector.load %arg16[%c0_49, %c0_50] : memref<128x128xbf16, #tpu.memory_space<vmem>>, vector<128x128xbf16>
      %cst_51 = arith.constant dense<0.000000e+00> : vector<128x128xf32>
      %71 = tpu.matmul %69, %70, %cst_51 {dimension_numbers = #tpu.dot_dimension_numbers<[1], [0], [0], [1], [0, 0, 1, 1], [], []>} : vector<128x128xbf16>, vector<128x128xbf16>, vector<128x128xf32> -> vector<128x128xf32>
      %c0_52 = arith.constant 0 : index
      %c0_53 = arith.constant 0 : index
      %72 = vector.load %arg17[%c0_52, %c0_53] : memref<1x128xf32, #tpu.memory_space<vmem>>, vector<1x128xf32>
      %73 = vector.broadcast %72 : vector<1x128xf32> to vector<128x128xf32>
      %74 = arith.addf %71, %73 : vector<128x128xf32>
      %c0_54 = arith.constant 0 : index
      %c0_55 = arith.constant 0 : index
      %75 = vector.load %arg18[%c0_54, %c0_55] : memref<1x128xf32, #tpu.memory_space<vmem>>, vector<1x128xf32>
      %c0_56 = arith.constant 0 : index
      %c0_57 = arith.constant 0 : index
      %76 = vector.load %arg19[%c0_56, %c0_57] : memref<1x128xf32, #tpu.memory_space<vmem>>, vector<1x128xf32>
      %cst_58 = arith.constant dense<0.000000e+00> : vector<128xf32>
      %77 = vector.multi_reduction <add>, %74, %cst_58 [1] : vector<128x128xf32> to vector<128xf32>
      %78 = vector.shape_cast %77 : vector<128xf32> to vector<128x1xf32>
      %cst_59 = arith.constant 1.280000e+02 : f32
      %79 = vector.broadcast %cst_59 : f32 to vector<128x1xf32>
      %80 = arith.divf %78, %79 : vector<128x1xf32>
      %81 = vector.broadcast %80 : vector<128x1xf32> to vector<128x128xf32>
      %82 = arith.subf %74, %81 : vector<128x128xf32>
      %83 = arith.mulf %82, %82 : vector<128x128xf32>
      %cst_60 = arith.constant dense<0.000000e+00> : vector<128xf32>
      %84 = vector.multi_reduction <add>, %83, %cst_60 [1] : vector<128x128xf32> to vector<128xf32>
      %85 = vector.shape_cast %84 : vector<128xf32> to vector<128x1xf32>
      %cst_61 = arith.constant 1.280000e+02 : f32
      %86 = vector.broadcast %cst_61 : f32 to vector<128x1xf32>
      %87 = arith.divf %85, %86 : vector<128x1xf32>
      %88 = vector.broadcast %80 : vector<128x1xf32> to vector<128x128xf32>
      %89 = arith.subf %74, %88 : vector<128x128xf32>
      %cst_62 = arith.constant 9.99999974E-6 : f32
      %90 = vector.broadcast %cst_62 : f32 to vector<128x1xf32>
      %91 = arith.addf %87, %90 : vector<128x1xf32>
      %92 = math.rsqrt %91 : vector<128x1xf32>
      %93 = vector.broadcast %92 : vector<128x1xf32> to vector<128x128xf32>
      %94 = arith.mulf %89, %93 : vector<128x128xf32>
      %95 = vector.broadcast %75 : vector<1x128xf32> to vector<128x128xf32>
      %96 = arith.mulf %94, %95 : vector<128x128xf32>
      %97 = vector.broadcast %76 : vector<1x128xf32> to vector<128x128xf32>
      %98 = arith.addf %96, %97 : vector<128x128xf32>
      %99 = arith.truncf %98 : vector<128x128xf32> to vector<128x128xbf16>
      %c0_63 = arith.constant 0 : index
      %c0_64 = arith.constant 0 : index
      %100 = vector.load %arg21[%c0_63, %c0_64] : memref<128x128xbf16, #tpu.memory_space<vmem>>, vector<128x128xbf16>
      %cst_65 = arith.constant dense<0.000000e+00> : vector<128x128xf32>
      %101 = tpu.matmul %99, %100, %cst_65 {dimension_numbers = #tpu.dot_dimension_numbers<[1], [0], [0], [1], [0, 0, 1, 1], [], []>} : vector<128x128xbf16>, vector<128x128xbf16>, vector<128x128xf32> -> vector<128x128xf32>
      %102 = arith.addf %59, %101 : vector<128x128xf32>
      %c0_66 = arith.constant 0 : index
      %c0_67 = arith.constant 0 : index
      %103 = vector.load %arg22[%c0_66, %c0_67] : memref<1x128xf32, #tpu.memory_space<vmem>>, vector<1x128xf32>
      %104 = vector.broadcast %103 : vector<1x128xf32> to vector<128x128xf32>
      %105 = arith.addf %102, %104 : vector<128x128xf32>
      %c0_68 = arith.constant 0 : index
      %c0_69 = arith.constant 0 : index
      %106 = vector.load %arg23[%c0_68, %c0_69] : memref<1x128xf32, #tpu.memory_space<vmem>>, vector<1x128xf32>
      %c0_70 = arith.constant 0 : index
      %c0_71 = arith.constant 0 : index
      %107 = vector.load %arg24[%c0_70, %c0_71] : memref<1x128xf32, #tpu.memory_space<vmem>>, vector<1x128xf32>
      %cst_72 = arith.constant dense<0.000000e+00> : vector<128xf32>
      %108 = vector.multi_reduction <add>, %105, %cst_72 [1] : vector<128x128xf32> to vector<128xf32>
      %109 = vector.shape_cast %108 : vector<128xf32> to vector<128x1xf32>
      %cst_73 = arith.constant 1.280000e+02 : f32
      %110 = vector.broadcast %cst_73 : f32 to vector<128x1xf32>
      %111 = arith.divf %109, %110 : vector<128x1xf32>
      %112 = vector.broadcast %111 : vector<128x1xf32> to vector<128x128xf32>
      %113 = arith.subf %105, %112 : vector<128x128xf32>
      %114 = arith.mulf %113, %113 : vector<128x128xf32>
      %cst_74 = arith.constant dense<0.000000e+00> : vector<128xf32>
      %115 = vector.multi_reduction <add>, %114, %cst_74 [1] : vector<128x128xf32> to vector<128xf32>
      %116 = vector.shape_cast %115 : vector<128xf32> to vector<128x1xf32>
      %cst_75 = arith.constant 1.280000e+02 : f32
      %117 = vector.broadcast %cst_75 : f32 to vector<128x1xf32>
      %118 = arith.divf %116, %117 : vector<128x1xf32>
      %119 = vector.broadcast %111 : vector<128x1xf32> to vector<128x128xf32>
      %120 = arith.subf %105, %119 : vector<128x128xf32>
      %cst_76 = arith.constant 9.99999974E-6 : f32
      %121 = vector.broadcast %cst_76 : f32 to vector<128x1xf32>
      %122 = arith.addf %118, %121 : vector<128x1xf32>
      %123 = math.rsqrt %122 : vector<128x1xf32>
      %124 = vector.broadcast %123 : vector<128x1xf32> to vector<128x128xf32>
      %125 = arith.mulf %120, %124 : vector<128x128xf32>
      %126 = vector.broadcast %106 : vector<1x128xf32> to vector<128x128xf32>
      %127 = arith.mulf %125, %126 : vector<128x128xf32>
      %128 = vector.broadcast %107 : vector<1x128xf32> to vector<128x128xf32>
      %129 = arith.addf %127, %128 : vector<128x128xf32>
      %c0_77 = arith.constant 0 : index
      %c0_78 = arith.constant 0 : index
      %130 = vector.load %arg25[%c0_77, %c0_78] : memref<128x128xf32, #tpu.memory_space<vmem>>, vector<128x128xf32>
      tpu.vector_store %arg25[%c0_77, %c0_78], %129 {strides = array<i32>} : memref<128x128xf32, #tpu.memory_space<vmem>>, vector<128x128xf32>,
    } else {
    }
    return
  }
  func.func @transform_0(%arg0: i32, %arg1: i32) -> (i32, i32) {
    %c0_i32 = arith.constant 0 : i32
    return %arg0, %arg1 : i32, i32
  }
  func.func @transform_1(%arg0: i32, %arg1: i32) -> (i32, i32) {
    %c0_i32 = arith.constant 0 : i32
    return %arg0, %arg1 : i32, i32
  }
  func.func @transform_2(%arg0: i32, %arg1: i32) -> (i32, i32) {
    %c0_i32 = arith.constant 0 : i32
    %c0_i32_0 = arith.constant 0 : i32
    return %arg1, %c0_i32 : i32, i32
  }
  func.func @transform_3(%arg0: i32, %arg1: i32) -> (i32, i32) {
    %c0_i32 = arith.constant 0 : i32
    %c0_i32_0 = arith.constant 0 : i32
    return %arg1, %c0_i32 : i32, i32
  }
  func.func @transform_4(%arg0: i32, %arg1: i32) -> (i32, i32) {
    %c0_i32 = arith.constant 0 : i32
    %c0_i32_0 = arith.constant 0 : i32
    return %arg0, %c0_i32 : i32, i32
  }
  func.func @transform_5(%arg0: i32, %arg1: i32) -> (i32, i32) {
    %c0_i32 = arith.constant 0 : i32
    %c0_i32_0 = arith.constant 0 : i32
    return %arg0, %c0_i32 : i32, i32
  }
  func.func @transform_6(%arg0: i32, %arg1: i32) -> (i32, i32) {
    %c0_i32 = arith.constant 0 : i32
    %c0_i32_0 = arith.constant 0 : i32
    return %arg0, %c0_i32 : i32, i32
  }
  func.func @transform_7(%arg0: i32, %arg1: i32) -> (i32, i32) {
    %c0_i32 = arith.constant 0 : i32
    %c0_i32_0 = arith.constant 0 : i32
    return %arg0, %c0_i32 : i32, i32
  }
  func.func @transform_8(%arg0: i32, %arg1: i32) -> (i32, i32) {
    %c0_i32 = arith.constant 0 : i32
    %c0_i32_0 = arith.constant 0 : i32
    %c0_i32_1 = arith.constant 0 : i32
    return %c0_i32, %c0_i32_0 : i32, i32
  }
  func.func @transform_9(%arg0: i32, %arg1: i32) -> (i32, i32) {
    %c0_i32 = arith.constant 0 : i32
    %c0_i32_0 = arith.constant 0 : i32
    %c0_i32_1 = arith.constant 0 : i32
    return %c0_i32, %c0_i32_0 : i32, i32
  }
  func.func @transform_10(%arg0: i32, %arg1: i32) -> (i32, i32) {
    %c0_i32 = arith.constant 0 : i32
    %c0_i32_0 = arith.constant 0 : i32
    %c0_i32_1 = arith.constant 0 : i32
    return %c0_i32, %c0_i32_0 : i32, i32
  }
  func.func @transform_11(%arg0: i32, %arg1: i32) -> (i32, i32) {
    %c0_i32 = arith.constant 0 : i32
    %c0_i32_0 = arith.constant 0 : i32
    %c0_i32_1 = arith.constant 0 : i32
    return %c0_i32, %c0_i32_0 : i32, i32
  }
  func.func @transform_12(%arg0: i32, %arg1: i32) -> (i32, i32) {
    %c0_i32 = arith.constant 0 : i32
    %c0_i32_0 = arith.constant 0 : i32
    %c0_i32_1 = arith.constant 0 : i32
    return %c0_i32, %c0_i32_0 : i32, i32
  }
  func.func @transform_13(%arg0: i32, %arg1: i32) -> (i32, i32) {
    %c0_i32 = arith.constant 0 : i32
    %c0_i32_0 = arith.constant 0 : i32
    %c0_i32_1 = arith.constant 0 : i32
    return %c0_i32, %c0_i32_0 : i32, i32
  }
  func.func @transform_14(%arg0: i32, %arg1: i32) -> (i32, i32) {
    %c0_i32 = arith.constant 0 : i32
    %c0_i32_0 = arith.constant 0 : i32
    %c0_i32_1 = arith.constant 0 : i32
    return %c0_i32, %c0_i32_0 : i32, i32
  }
  func.func @transform_15(%arg0: i32, %arg1: i32) -> (i32, i32) {
    %c0_i32 = arith.constant 0 : i32
    %c0_i32_0 = arith.constant 0 : i32
    %c0_i32_1 = arith.constant 0 : i32
    return %c0_i32, %c0_i32_0 : i32, i32
  }
  func.func @transform_16(%arg0: i32, %arg1: i32) -> (i32, i32) {
    %c0_i32 = arith.constant 0 : i32
    %c0_i32_0 = arith.constant 0 : i32
    %c0_i32_1 = arith.constant 0 : i32
    return %c0_i32, %c0_i32_0 : i32, i32
  }
  func.func @transform_17(%arg0: i32, %arg1: i32) -> (i32, i32) {
    %c0_i32 = arith.constant 0 : i32
    %c0_i32_0 = arith.constant 0 : i32
    %c0_i32_1 = arith.constant 0 : i32
    return %c0_i32, %c0_i32_0 : i32, i32
  }
  func.func @transform_18(%arg0: i32, %arg1: i32) -> (i32, i32) {
    %c0_i32 = arith.constant 0 : i32
    %c0_i32_0 = arith.constant 0 : i32
    %c0_i32_1 = arith.constant 0 : i32
    return %c0_i32, %c0_i32_0 : i32, i32
  }
  func.func @transform_19(%arg0: i32, %arg1: i32) -> (i32, i32) {
    %c0_i32 = arith.constant 0 : i32
    %c0_i32_0 = arith.constant 0 : i32
    %c0_i32_1 = arith.constant 0 : i32
    return %c0_i32, %c0_i32_0 : i32, i32
  }
  func.func @transform_20(%arg0: i32, %arg1: i32) -> (i32, i32) {
    %c0_i32 = arith.constant 0 : i32
    %c0_i32_0 = arith.constant 0 : i32
    %c0_i32_1 = arith.constant 0 : i32
    return %c0_i32, %c0_i32_0 : i32, i32
  }
  func.func @transform_21(%arg0: i32, %arg1: i32) -> (i32, i32) {
    %c0_i32 = arith.constant 0 : i32
    %c0_i32_0 = arith.constant 0 : i32
    %c0_i32_1 = arith.constant 0 : i32
    return %c0_i32, %c0_i32_0 : i32, i32
  }
  func.func @transform_22(%arg0: i32, %arg1: i32) -> (i32, i32) {
    %c0_i32 = arith.constant 0 : i32
    %c0_i32_0 = arith.constant 0 : i32
    %c0_i32_1 = arith.constant 0 : i32
    return %c0_i32, %c0_i32_0 : i32, i32
  }
  func.func @transform_23(%arg0: i32, %arg1: i32) -> (i32, i32) {
    %c0_i32 = arith.constant 0 : i32
    %c0_i32_0 = arith.constant 0 : i32
    return %arg0, %c0_i32 : i32, i32
  }
}

</mosaic_0001>

<bundles_post_ra>
// kernel: dg_interaction.2
= control target key start
LH: loop header
LB: loop body
LE: loop exit
PB: predicated region body
PF: predicated region fallthrough
CT: control target
= control target key end

     0   :  { %s1524_s21 = smov 0   ;;  %s1681_s0 = inlined_call_operand.vmem [shape: f32[256,128], index: 0, kind: input, shape index: {}]   ;;  %s1682_s1 = inlined_call_operand.vmem [shape: f32[256,1], index: 1, kind: input, shape index: {}]   ;;  %s1683_s2 = inlined_call_operand.vmem [shape: f32[256,1], index: 2, kind: input, shape index: {}]   ;;  %s1684_s3 = inlined_call_operand.vmem [shape: bf16[128,128], index: 3, kind: input, shape index: {}]   ;;  %s1685_s4 = inlined_call_operand.vmem [shape: bf16[128,128], index: 4, kind: input, shape index: {}]   ;;  %s1686_s5 = inlined_call_operand.vmem [shape: bf16[256,128], index: 5, kind: output, shape index: {0}]   ;;  %s1687_s6 = inlined_call_operand.vmem [shape: bf16[256,128], index: 6, kind: output, shape index: {1}]  }
   0x1 LB: > { %s1166_s22 = sadd.s32 4294967295, %s1486_s21   ;;  %p1170_p0 = scmp.ge.s32.totalorder %s1486_s21, 1  ;;  %s1486_s21 = sphi %s1524_s21, %s17_s21  }
   0x2   : > { %p238_p1 = scmp.lt.s32.totalorder %s1486_s21, 3 }
   0x4   : > { %p239_p2 = pnand %p1170_p0, %p238_p1 }
   0x5   : > { %s1171_s23 = sshll.u32 (!%p239_p2), %s1166_s22, 4 }
   0x6   : > { %242 = sbr.rel (%p239_p2) target bundleno = 406 (0x196), region = 40  ;;  %p284_p3 = scmp.lt.s32.totalorder (!%p239_p2), %s1171_s23, 31 }
   0xb   : > { %v1488_v0 = vmov 0   ;;  %v1464_v1 = vld [vmem:[%s1684_s3 + $0x38] sm:$0xff]   ;;  %v1465_v2 = vld [vmem:[%s1684_s3 + $0x30] sm:$0xff]   ;;  %s1689_s23 = smov (!%p284_p3, %s1171_s23), 31  ;;  %v1467_v5 = vld [vmem:[%s1684_s3 + $0x28] sm:$0xff]  }
   0xc   : > { %1463 = vset.pattern.permute.xlu1 %v1488_v0  ;;  %1462 = vset.pattern.permute.xlu0 %v1488_v0  ;;  %v1466_v3 = vld [vmem:[%s1685_s4 + $0x38] sm:$0xff]   ;;  %s1544_s30 = sshll.u32 %s1689_s23, 3  ;;  %v1468_v4 = vld [vmem:[%s1685_s4 + $0x30] sm:$0xff]   ;;  %v1469_v10 = vld [vmem:[%s1684_s3 + $0x20] sm:$0xff]  }
   0xd   : > { %1389 = vmatprep.subr.bf16.mxu0 %v1464_v1  ;;  %1421 = vmatprep.subr.bf16.mxu1 %v1466_v3  ;;  %s1553_s11 = scalar_lea.vmem %s1683_s2, %s1544_s30  ;;  %s1559_s14 = scalar_lea.vmem %s1682_s1, %s1544_s30  ;;  %v1470_v15 = vld [vmem:[%s1685_s4 + $0x28] sm:$0xff]   ;;  %v1471_v16 = vld [vmem:[%s1684_s3 + $0x18] sm:$0xff]   ;;  %v1472_v18 = vld [vmem:[%s1685_s4 + $0x20] sm:$0xff]  }
   0xe   : > { %1390 = vmatpush3.bf16.msra.mxu0 %v1464_v1  ;;  %1422 = vmatpush3.bf16.msra.mxu1 %v1466_v3  ;;  %v450_v6 = vld [vmem:[%s1553_s11] sm:$0xff]  ;;  %v451_v8 = vld [vmem:[%s1553_s11 + $0x8] sm:$0xff]  ;;  %v333_v11 = vld [vmem:[%s1559_s14 + $0x18] sm:$0xff]  ;;  %s1633_s24 = scalar_lea.vmem %s1681_s0, %s1544_s30  ;;  %s1178_s30 = sshll.u32 %s1689_s23, 2 }
   0xf   : > { %1391 = vmatprep.subr.bf16.mxu0 %v1465_v2  ;;  %v330_v7 = vld [vmem:[%s1559_s14] sm:$0xff]  ;;  %1423 = vmatprep.subr.bf16.mxu1 %v1468_v4  ;;  %v331_v9 = vld [vmem:[%s1559_s14 + $0x8] sm:$0xff]  ;;  %v332_v12 = vld [vmem:[%s1559_s14 + $0x10] sm:$0xff]  ;;  %s1655_s25 = scalar_lea.vmem %s1686_s5, %s1178_s30  ;;  %s1661_s23 = scalar_lea.vmem %s1687_s6, %s1178_s30 }
  0x10   : > { %468 = vperm.xlu1 %1463, %v450_v6   ;;  %348 = vperm.xlu0 %1462, %v330_v7   ;;  %v453_v13 = vld [vmem:[%s1553_s11 + $0x18] sm:$0xff]  ;;  %v452_v14 = vld [vmem:[%s1553_s11 + $0x10] sm:$0xff]  ;;  %v335_v17 = vld [vmem:[%s1559_s14 + $0x28] sm:$0xff] }
  0x11   : > { %v334_v19 = vld [vmem:[%s1559_s14 + $0x20] sm:$0xff]  ;;  %v1473_v20 = vld [vmem:[%s1684_s3 + $0x10] sm:$0xff]   ;;  %v1474_v21 = vld [vmem:[%s1685_s4 + $0x18] sm:$0xff]  }
  0x12   : > { %1392 = vmatpush3.bf16.msra.mxu0 %v1465_v2  ;;  %1424 = vmatpush3.bf16.msra.mxu1 %v1468_v4  ;;  %v1475_v22 = vld [vmem:[%s1684_s3 + $0x8] sm:$0xff]   ;;  %v454_v24 = vld [vmem:[%s1553_s11 + $0x20] sm:$0xff]  ;;  %v1476_v25 = vld [vmem:[%s1685_s4 + $0x10] sm:$0xff]  }
  0x13   : > { %1393 = vmatprep.subr.bf16.mxu0 %v1467_v5  ;;  %1425 = vmatprep.subr.bf16.mxu1 %v1470_v15  ;;  %v455_v23 = vld [vmem:[%s1553_s11 + $0x28] sm:$0xff]  ;;  %v1477_v26 = vld [vmem:[%s1684_s3] sm:$0xff]   ;;  %v337_v27 = vld [vmem:[%s1559_s14 + $0x38] sm:$0xff] }
  0x14   : > { %473 = vperm.xlu1 %1463, %v451_v8   ;;  %353 = vperm.xlu0 %1462, %v331_v9   ;;  %v336_v28 = vld [vmem:[%s1559_s14 + $0x30] sm:$0xff]  ;;  %v1478_v29 = vld [vmem:[%s1685_s4 + $0x8] sm:$0xff]   ;;  %v457_v30 = vld [vmem:[%s1553_s11 + $0x38] sm:$0xff] }
  0x15   : > { %v456_v31 = vld [vmem:[%s1553_s11 + $0x30] sm:$0xff]  ;;  %v1479_v32 = vld [vmem:[%s1685_s4] sm:$0xff]   ;;  %v339_v33 = vld [vmem:[%s1559_s14 + $0x48] sm:$0xff] }
  0x16   : > { %1394 = vmatpush3.bf16.msra.mxu0 %v1467_v5  ;;  %1426 = vmatpush3.bf16.msra.mxu1 %v1470_v15  ;;  %v338_v34 = vld [vmem:[%s1559_s14 + $0x40] sm:$0xff]  ;;  %v459_v35 = vld [vmem:[%s1553_s11 + $0x48] sm:$0xff]  ;;  %v341_v37 = vld [vmem:[%s1559_s14 + $0x58] sm:$0xff] }
  0x17   : > { %1395 = vmatprep.subr.bf16.mxu0 %v1469_v10  ;;  %1427 = vmatprep.subr.bf16.mxu1 %v1472_v18  ;;  %v458_v36 = vld [vmem:[%s1553_s11 + $0x40] sm:$0xff]  ;;  %v340_v38 = vld [vmem:[%s1559_s14 + $0x50] sm:$0xff]  ;;  %v461_v39 = vld [vmem:[%s1553_s11 + $0x58] sm:$0xff] }
  0x18   : > { %363 = vperm.xlu1 %1463, %v333_v11   ;;  %358 = vperm.xlu0 %1462, %v332_v12   ;;  %v460_v40 = vld [vmem:[%s1553_s11 + $0x50] sm:$0xff]  ;;  %v343_v41 = vld [vmem:[%s1559_s14 + $0x68] sm:$0xff]  ;;  %v342_v42 = vld [vmem:[%s1559_s14 + $0x60] sm:$0xff] }
  0x19   : > { %v463_v43 = vld [vmem:[%s1553_s11 + $0x68] sm:$0xff]  ;;  %v462_v44 = vld [vmem:[%s1553_s11 + $0x60] sm:$0xff]  ;;  %v345_v45 = vld [vmem:[%s1559_s14 + $0x78] sm:$0xff] }
  0x1a   : > { %1396 = vmatpush3.bf16.msra.mxu0 %v1469_v10  ;;  %1428 = vmatpush3.bf16.msra.mxu1 %v1472_v18  ;;  %v344_v46 = vld [vmem:[%s1559_s14 + $0x70] sm:$0xff]  ;;  %v465_v47 = vld [vmem:[%s1553_s11 + $0x78] sm:$0xff]  ;;  %v314_v51 = vld [vmem:[%s1633_s24] sm:$0xff] }
  0x1b   : > { %1397 = vmatprep.subr.bf16.mxu0 %v1471_v16  ;;  %1429 = vmatprep.subr.bf16.mxu1 %v1474_v21  ;;  %v464_v48 = vld [vmem:[%s1553_s11 + $0x70] sm:$0xff]  ;;  %v315_v52 = vld [vmem:[%s1633_s24 + $0x8] sm:$0xff]  ;;  %v317_v59 = vld [vmem:[%s1633_s24 + $0x18] sm:$0xff] }
  0x1c   : > { %483 = vperm.xlu1 %1463, %v453_v13   ;;  %478 = vperm.xlu0 %1462, %v452_v14   ;;  %v316_v60 = vld [vmem:[%s1633_s24 + $0x10] sm:$0xff]  ;;  %v319_v8 = vld [vmem:[%s1633_s24 + $0x28] sm:$0xff]  ;;  %v318_v9 = vld [vmem:[%s1633_s24 + $0x20] sm:$0xff] }
  0x1e   : > { %1398 = vmatpush3.bf16.msra.mxu0 %v1471_v16  ;;  %1430 = vmatpush3.bf16.msra.mxu1 %v1474_v21  ;;  %v320_v21 = vld [vmem:[%s1633_s24 + $0x30] sm:$0xff] }
  0x1f   : > { %1399 = vmatprep.subr.bf16.mxu0 %v1473_v20  ;;  %1431 = vmatprep.subr.bf16.mxu1 %v1476_v25 }
  0x20   : > { %373 = vperm.xlu1 %1463, %v335_v17   ;;  %368 = vperm.xlu0 %1462, %v334_v19  }
  0x22   : > { %1400 = vmatpush3.bf16.msra.mxu0 %v1473_v20  ;;  %1432 = vmatpush3.bf16.msra.mxu1 %v1476_v25  ;;  %v321_v20 = vld [vmem:[%s1633_s24 + $0x38] sm:$0xff] }
  0x23   : > { %1401 = vmatprep.subr.bf16.mxu0 %v1475_v22  ;;  %1433 = vmatprep.subr.bf16.mxu1 %v1478_v29 }
  0x24   : > { %493 = vperm.xlu1 %1463, %v455_v23   ;;  %488 = vperm.xlu0 %1462, %v454_v24  }
  0x26   : > { %1402 = vmatpush3.bf16.msra.mxu0 %v1475_v22  ;;  %1434 = vmatpush3.bf16.msra.mxu1 %v1478_v29 }
  0x27   : > { %1403 = vmatprep.subr.bf16.mxu0 %v1477_v26  ;;  %1435 = vmatprep.subr.bf16.mxu1 %v1479_v32 }
  0x28   : > { %383 = vperm.xlu1 %1463, %v337_v27   ;;  %378 = vperm.xlu0 %1462, %v336_v28  }
  0x2a   : > { %1404 = vmatpush3.bf16.msra.mxu0 %v1477_v26  ;;  %1436 = vmatpush3.bf16.msra.mxu1 %v1479_v32  ;;  %v323_v32 = vld [vmem:[%s1633_s24 + $0x48] sm:$0xff] }
  0x2c   : > { %503 = vperm.xlu1 %1463, %v457_v30   ;;  %498 = vperm.xlu0 %1462, %v456_v31  }
  0x30   : > { %393 = vperm.xlu1 %1463, %v339_v33   ;;  %388 = vperm.xlu0 %1462, %v338_v34   ;;  %v322_v33 = vld [vmem:[%s1633_s24 + $0x40] sm:$0xff] }
  0x34   : > { %513 = vperm.xlu1 %1463, %v459_v35   ;;  %508 = vperm.xlu0 %1462, %v458_v36  }
  0x38   : > { %403 = vperm.xlu1 %1463, %v341_v37   ;;  %398 = vperm.xlu0 %1462, %v340_v38  }
  0x3c   : > { %523 = vperm.xlu1 %1463, %v461_v39   ;;  %518 = vperm.xlu0 %1462, %v460_v40  }
  0x40   : > { %413 = vperm.xlu1 %1463, %v343_v41   ;;  %408 = vperm.xlu0 %1462, %v342_v42  }
  0x44   : > { %533 = vperm.xlu1 %1463, %v463_v43   ;;  %528 = vperm.xlu0 %1462, %v462_v44   ;;  %v325_v44 = vld [vmem:[%s1633_s24 + $0x58] sm:$0xff] }
  0x48   : > { %423 = vperm.xlu1 %1463, %v345_v45   ;;  %418 = vperm.xlu0 %1462, %v344_v46   ;;  %v324_v45 = vld [vmem:[%s1633_s24 + $0x50] sm:$0xff] }
  0x4c   : > { %543 = vperm.xlu1 %1463, %v465_v47   ;;  %538 = vperm.xlu0 %1462, %v464_v48  }
  0x8b   : > { %v469_v49 = vpop.permute.xlu1 %468  ;;  %v349_v50 = vpop.permute.xlu0 %348 }
  0x8c   : > { %v546_v55 = vmul.f32 %v469_v49, %v314_v51  ;;  %v426_v56 = vmul.f32 %v349_v50, %v314_v51 }
  0x8f   : > { %v474_v53 = vpop.permute.xlu1 %473  ;;  %v354_v54 = vpop.permute.xlu0 %353 }
  0x90   : > { %v547_v57 = vmul.f32 %v474_v53, %v315_v52  ;;  %v427_v58 = vmul.f32 %v354_v54, %v315_v52 }
  0x92   : > { %v442_v61 = vpack.c.bf16 %v427_v58, %v426_v56  ;;  %v562_v62 = vpack.c.bf16 %v547_v57, %v546_v55  ;;  %v327_v56 = vld [vmem:[%s1633_s24 + $0x68] sm:$0xff]  ;;  %v326_v57 = vld [vmem:[%s1633_s24 + $0x60] sm:$0xff] }
  0x93   : > { %v364_v63 = vpop.permute.xlu1 %363  ;;  %v359_v0 = vpop.permute.xlu0 %358 }
  0x94   : > { %v429_v1 = vmul.f32 %v364_v63, %v317_v59  ;;  %v428_v2 = vmul.f32 %v359_v0, %v316_v60  ;;  %1405 = vmatprep.mubr.bf16.mxu0 %v442_v61  ;;  %1437 = vmatprep.mubr.bf16.mxu1 %v562_v62 }
  0x96   : > { %v443_v3 = vpack.c.bf16 %v429_v1, %v428_v2 }
  0x97   : > { %v484_v4 = vpop.permute.xlu1 %483  ;;  %v479_v5 = vpop.permute.xlu0 %478 }
  0x98   : > { %v549_v6 = vmul.f32 %v484_v4, %v317_v59  ;;  %v548_v7 = vmul.f32 %v479_v5, %v316_v60  ;;  %1406 = vmatmul.mubr.bf16.vlgmr.msra.gmra.mxu0 %v443_v3  ;;  %v329_v4 = vld [vmem:[%s1633_s24 + $0x78] sm:$0xff]  ;;  %v328_v5 = vld [vmem:[%s1633_s24 + $0x70] sm:$0xff] }
  0x9a   : > { %v563_v10 = vpack.c.bf16 %v549_v6, %v548_v7 }
  0x9b   : > { %v374_v11 = vpop.permute.xlu1 %373  ;;  %v369_v12 = vpop.permute.xlu0 %368 }
  0x9c   : > { %v431_v13 = vmul.f32 %v374_v11, %v319_v8  ;;  %v430_v14 = vmul.f32 %v369_v12, %v318_v9  ;;  %1438 = vmatmul.mubr.bf16.vlgmr.msra.gmra.mxu1 %v563_v10 }
  0x9e   : > { %v444_v15 = vpack.c.bf16 %v431_v13, %v430_v14 }
  0x9f   : > { %v494_v16 = vpop.permute.xlu1 %493  ;;  %v489_v17 = vpop.permute.xlu0 %488 }
  0xa0   : > { %v551_v18 = vmul.f32 %v494_v16, %v319_v8  ;;  %v550_v19 = vmul.f32 %v489_v17, %v318_v9  ;;  %1409 = vmatprep.mubr.bf16.mxu0 %v444_v15 }
  0xa2   : > { %v564_v22 = vpack.c.bf16 %v551_v18, %v550_v19 }
  0xa3   : > { %v384_v23 = vpop.permute.xlu1 %383  ;;  %v379_v24 = vpop.permute.xlu0 %378 }
  0xa4   : > { %v433_v25 = vmul.f32 %v384_v23, %v321_v20  ;;  %v432_v26 = vmul.f32 %v379_v24, %v320_v21  ;;  %1441 = vmatprep.mubr.bf16.mxu1 %v564_v22 }
  0xa6   : > { %v445_v27 = vpack.c.bf16 %v433_v25, %v432_v26 }
  0xa7   : > { %v504_v28 = vpop.permute.xlu1 %503  ;;  %v499_v29 = vpop.permute.xlu0 %498 }
  0xa8   : > { %v553_v30 = vmul.f32 %v504_v28, %v321_v20  ;;  %v552_v31 = vmul.f32 %v499_v29, %v320_v21  ;;  %1410 = vmatmul.mubr.bf16.gmra.mxu0 %v445_v27 }
  0xaa   : > { %v565_v34 = vpack.c.bf16 %v553_v30, %v552_v31 }
  0xab   : > { %v394_v35 = vpop.permute.xlu1 %393  ;;  %v389_v36 = vpop.permute.xlu0 %388 }
  0xac   : > { %v435_v37 = vmul.f32 %v394_v35, %v323_v32  ;;  %v434_v38 = vmul.f32 %v389_v36, %v322_v33  ;;  %1442 = vmatmul.mubr.bf16.gmra.mxu1 %v565_v34 }
  0xae   : > { %v446_v39 = vpack.c.bf16 %v435_v37, %v434_v38 }
  0xaf   : > { %v514_v40 = vpop.permute.xlu1 %513  ;;  %v509_v41 = vpop.permute.xlu0 %508 }
  0xb0   : > { %v555_v42 = vmul.f32 %v514_v40, %v323_v32  ;;  %v554_v43 = vmul.f32 %v509_v41, %v322_v33  ;;  %1413 = vmatprep.mubr.bf16.mxu0 %v446_v39 }
  0xb2   : > { %v566_v46 = vpack.c.bf16 %v555_v42, %v554_v43 }
  0xb3   : > { %v404_v47 = vpop.permute.xlu1 %403  ;;  %v399_v48 = vpop.permute.xlu0 %398 }
  0xb4   : > { %v437_v49 = vmul.f32 %v404_v47, %v325_v44  ;;  %v436_v50 = vmul.f32 %v399_v48, %v324_v45  ;;  %1445 = vmatprep.mubr.bf16.mxu1 %v566_v46 }
  0xb6   : > { %v447_v51 = vpack.c.bf16 %v437_v49, %v436_v50 }
  0xb7   : > { %v524_v52 = vpop.permute.xlu1 %523  ;;  %v519_v53 = vpop.permute.xlu0 %518 }
  0xb8   : > { %v557_v54 = vmul.f32 %v524_v52, %v325_v44  ;;  %v556_v55 = vmul.f32 %v519_v53, %v324_v45  ;;  %1414 = vmatmul.mubr.bf16.gmra.mxu0 %v447_v51 }
  0xba   : > { %v567_v58 = vpack.c.bf16 %v557_v54, %v556_v55 }
  0xbb   : > { %v414_v59 = vpop.permute.xlu1 %413  ;;  %v409_v60 = vpop.permute.xlu0 %408 }
  0xbc   : > { %v439_v61 = vmul.f32 %v414_v59, %v327_v56  ;;  %v438_v62 = vmul.f32 %v409_v60, %v326_v57  ;;  %1446 = vmatmul.mubr.bf16.gmra.mxu1 %v567_v58 }
  0xbe   : > { %v448_v63 = vpack.c.bf16 %v439_v61, %v438_v62 }
  0xbf   : > { %v534_v0 = vpop.permute.xlu1 %533  ;;  %v529_v1 = vpop.permute.xlu0 %528 }
  0xc0   : > { %v559_v2 = vmul.f32 %v534_v0, %v327_v56  ;;  %v558_v3 = vmul.f32 %v529_v1, %v326_v57  ;;  %1417 = vmatprep.mubr.bf16.mxu0 %v448_v63 }
  0xc2   : > { %v568_v6 = vpack.c.bf16 %v559_v2, %v558_v3 }
  0xc3   : > { %v424_v7 = vpop.permute.xlu1 %423  ;;  %v419_v8 = vpop.permute.xlu0 %418 }
  0xc4   : > { %v441_v9 = vmul.f32 %v424_v7, %v329_v4  ;;  %v440_v10 = vmul.f32 %v419_v8, %v328_v5  ;;  %1449 = vmatprep.mubr.bf16.mxu1 %v568_v6 }
  0xc6   : > { %v449_v11 = vpack.c.bf16 %v441_v9, %v440_v10 }
  0xc7   : > { %v544_v12 = vpop.permute.xlu1 %543  ;;  %v539_v13 = vpop.permute.xlu0 %538 }
  0xc8   : > { %v561_v14 = vmul.f32 %v544_v12, %v329_v4  ;;  %v560_v15 = vmul.f32 %v539_v13, %v328_v5  ;;  %1418 = vmatmul.mubr.bf16.gmra.mxu0 %v449_v11 }
  0xca   : > { %v569_v16 = vpack.c.bf16 %v561_v14, %v560_v15 }
  0xcc   : > { %1450 = vmatmul.mubr.bf16.gmra.mxu1 %v569_v16 }
 0x158   : > { %v1407_v17 = vpop.f32.mrf.mxu0 }
 0x15a   : > { %v668_v18 = vpop.f32.mrf.mxu0 }
 0x15c   : > { %v1408_v19 = vpop.f32.mrf.mxu0  ;;  %v1439_v20 = vpop.f32.mrf.mxu1 }
 0x15d   : > { %v1271_v21 = vpack.c.bf16 %v1408_v19, %v1407_v17 }
 0x15e   : > { %v671_v22 = vpop.f32.mrf.mxu0  ;;  %v909_v23 = vpop.f32.mrf.mxu1 }
 0x15f   : > { %1343 = vst [vmem:[%s1655_s25 + $0x8] sm:$0xff] %v1271_v21   ;;  %v1266_v24 = vpack.c.bf16 %v671_v22, %v668_v18 }
 0x160   : > { %v1440_v25 = vpop.f32.mrf.mxu1 }
 0x161   : > { %1267 = vst [vmem:[%s1655_s25] sm:$0xff] %v1266_v24   ;;  %v1311_v26 = vpack.c.bf16 %v1440_v25, %v1439_v20 }
 0x162   : > { %v912_v27 = vpop.f32.mrf.mxu1 }
 0x163   : > { %1350 = vst [vmem:[%s1661_s23 + $0x8] sm:$0xff] %v1311_v26   ;;  %v1306_v28 = vpack.c.bf16 %v912_v27, %v909_v23 }
 0x165   : > { %1307 = vst [vmem:[%s1661_s23] sm:$0xff] %v1306_v28  }
 0x168   : > { %v1411_v29 = vpop.f32.mrf.mxu0 }
 0x16a   : > { %v684_v30 = vpop.f32.mrf.mxu0 }
 0x16c   : > { %v1412_v31 = vpop.f32.mrf.mxu0  ;;  %v1443_v32 = vpop.f32.mrf.mxu1 }
 0x16d   : > { %v1281_v33 = vpack.c.bf16 %v1412_v31, %v1411_v29 }
 0x16e   : > { %v687_v34 = vpop.f32.mrf.mxu0  ;;  %v925_v35 = vpop.f32.mrf.mxu1 }
 0x16f   : > { %1345 = vst [vmem:[%s1655_s25 + $0x18] sm:$0xff] %v1281_v33   ;;  %v1276_v36 = vpack.c.bf16 %v687_v34, %v684_v30 }
 0x170   : > { %v1444_v37 = vpop.f32.mrf.mxu1 }
 0x171   : > { %1344 = vst [vmem:[%s1655_s25 + $0x10] sm:$0xff] %v1276_v36   ;;  %v1321_v38 = vpack.c.bf16 %v1444_v37, %v1443_v32 }
 0x172   : > { %v928_v39 = vpop.f32.mrf.mxu1 }
 0x173   : > { %1352 = vst [vmem:[%s1661_s23 + $0x18] sm:$0xff] %v1321_v38   ;;  %v1316_v40 = vpack.c.bf16 %v928_v39, %v925_v35 }
 0x175   : > { %1351 = vst [vmem:[%s1661_s23 + $0x10] sm:$0xff] %v1316_v40  }
 0x178   : > { %v1415_v41 = vpop.f32.mrf.mxu0 }
 0x17a   : > { %v700_v42 = vpop.f32.mrf.mxu0 }
 0x17c   : > { %v1416_v43 = vpop.f32.mrf.mxu0  ;;  %v1447_v44 = vpop.f32.mrf.mxu1 }
 0x17d   : > { %v1291_v45 = vpack.c.bf16 %v1416_v43, %v1415_v41 }
 0x17e   : > { %v703_v46 = vpop.f32.mrf.mxu0  ;;  %v941_v47 = vpop.f32.mrf.mxu1 }
 0x17f   : > { %1347 = vst [vmem:[%s1655_s25 + $0x28] sm:$0xff] %v1291_v45   ;;  %v1286_v48 = vpack.c.bf16 %v703_v46, %v700_v42 }
 0x180   : > { %v1448_v49 = vpop.f32.mrf.mxu1 }
 0x181   : > { %1346 = vst [vmem:[%s1655_s25 + $0x20] sm:$0xff] %v1286_v48   ;;  %v1331_v50 = vpack.c.bf16 %v1448_v49, %v1447_v44 }
 0x182   : > { %v944_v51 = vpop.f32.mrf.mxu1 }
 0x183   : > { %1354 = vst [vmem:[%s1661_s23 + $0x28] sm:$0xff] %v1331_v50   ;;  %v1326_v52 = vpack.c.bf16 %v944_v51, %v941_v47 }
 0x185   : > { %1353 = vst [vmem:[%s1661_s23 + $0x20] sm:$0xff] %v1326_v52  }
 0x188   : > { %v1419_v53 = vpop.f32.mrf.mxu0 }
 0x18a   : > { %v716_v54 = vpop.f32.mrf.mxu0 }
 0x18c   : > { %v1420_v55 = vpop.f32.mrf.mxu0  ;;  %v1451_v56 = vpop.f32.mrf.mxu1 }
 0x18d   : > { %v1301_v57 = vpack.c.bf16 %v1420_v55, %v1419_v53 }
 0x18e   : > { %v719_v58 = vpop.f32.mrf.mxu0  ;;  %v957_v59 = vpop.f32.mrf.mxu1 }
 0x18f   : > { %1349 = vst [vmem:[%s1655_s25 + $0x38] sm:$0xff] %v1301_v57   ;;  %v1296_v60 = vpack.c.bf16 %v719_v58, %v716_v54 }
 0x190   : > { %v1452_v61 = vpop.f32.mrf.mxu1 }
 0x191   : > { %1348 = vst [vmem:[%s1655_s25 + $0x30] sm:$0xff] %v1296_v60   ;;  %v1341_v62 = vpack.c.bf16 %v1452_v61, %v1451_v56 }
 0x192   : > { %v960_v63 = vpop.f32.mrf.mxu1 }
 0x193   : > { %1356 = vst [vmem:[%s1661_s23 + $0x38] sm:$0xff] %v1341_v62   ;;  %v1336_v0 = vpack.c.bf16 %v960_v63, %v957_v59 }
 0x195   : > { %1355 = vst [vmem:[%s1661_s23 + $0x30] sm:$0xff] %v1336_v0  }
 0x196 PF: > { %s17_s21 = sadd.s32 1, %s1486_s21  }
 0x197   : > { %p14_p4 = scmp.ge.s32.totalorder %s17_s21, 4  }
 0x199   :  { %16 = sbr.rel (!%p14_p4) target bundleno = 1 (0x1), region = 88 }

// kernel: dg_interaction.3
= control target key start
LH: loop header
LB: loop body
LE: loop exit
PB: predicated region body
PF: predicated region fallthrough
CT: control target
= control target key end

     0   :  { %s5727_s0 = inlined_call_operand.vmem [shape: bf16[256,256], index: 0, kind: input, shape index: {}]   ;;  %s5728_s1 = inlined_call_operand.vmem [shape: bf16[256,256], index: 1, kind: input, shape index: {}]   ;;  %s5729_s2 = inlined_call_operand.vmem [shape: bf16[256,128], index: 2, kind: input, shape index: {}, may-alias: {2,4}]   ;;  %s5730_s3 = inlined_call_operand.vmem [shape: bf16[256,128], index: 3, kind: input, shape index: {}, may-alias: {3,5}]   ;;  %s5731_s4 = inlined_call_operand.vmem [shape: bf16[256,128], index: 4, kind: input, shape index: {}, may-alias: {2,4}]   ;;  %s5732_s5 = inlined_call_operand.vmem [shape: bf16[256,128], index: 5, kind: input, shape index: {}, may-alias: {3,5}]   ;;  %s5733_s6 = inlined_call_operand.vmem [shape: f32[256,1], index: 6, kind: input, shape index: {}]   ;;  %s5734_s7 = inlined_call_operand.vmem [shape: f32[256,1], index: 7, kind: input, shape index: {}]   ;;  %s5735_s8 = inlined_call_operand.vmem [shape: f32[1,128], index: 8, kind: input, shape index: {}]   ;;  %s5736_s9 = inlined_call_operand.vmem [shape: f32[1,128], index: 9, kind: input, shape index: {}]   ;;  %s5737_s10 = inlined_call_operand.vmem [shape: bf16[128,128], index: 10, kind: input, shape index: {}]   ;;  %s5738_s11 = inlined_call_operand.vmem [shape: f32[1,128], index: 11, kind: input, shape index: {}]   ;;  %s5739_s12 = inlined_call_operand.vmem [shape: f32[1,128], index: 12, kind: input, shape index: {}]   ;;  %s5740_s13 = inlined_call_operand.vmem [shape: f32[1,128], index: 13, kind: input, shape index: {}]   ;;  %s5741_s14 = inlined_call_operand.vmem [shape: bf16[128,128], index: 14, kind: input, shape index: {}]   ;;  %s5742_s15 = inlined_call_operand.vmem [shape: f32[1,128], index: 15, kind: input, shape index: {}]   ;;  %s5743_s16 = inlined_call_operand.vmem [shape: f32[1,128], index: 16, kind: input, shape index: {}]   ;;  %s5744_s17 = inlined_call_operand.vmem [shape: f32[1,128], index: 17, kind: input, shape index: {}]   ;;  %s5745_s18 = inlined_call_operand.vmem [shape: bf16[128,128], index: 18, kind: input, shape index: {}]   ;;  %s5746_s19 = inlined_call_operand.vmem [shape: bf16[128,128], index: 19, kind: input, shape index: {}]   ;;  %s5747_s20 = inlined_call_operand.vmem [shape: f32[1,128], index: 20, kind: input, shape index: {}]   ;;  %s5748_s21 = inlined_call_operand.vmem [shape: f32[1,128], index: 21, kind: input, shape index: {}]   ;;  %s5749_s22 = inlined_call_operand.vmem [shape: f32[1,128], index: 22, kind: input, shape index: {}]   ;;  %s5750_s23 = inlined_call_operand.hbm [shape: f32[256,128], index: 23, kind: output, shape index: {}]  }
   0x1   :  { %5769 = sst [smem:[#allocation23_spill]] %s5727_s0 }
   0x2   :  { %5770 = sst [smem:[#allocation24_spill]] %s5728_s1 }
   0x3   :  { %5771 = sst [smem:[#allocation25_spill]] %s5729_s2 }
   0x4   :  { %5772 = sst [smem:[#allocation26_spill]] %s5730_s3 }
   0x5   :  { %5773 = sst [smem:[#allocation27_spill]] %s5731_s4 }
   0x6   :  { %5774 = sst [smem:[#allocation28_spill]] %s5732_s5 }
   0x7   :  { %5775 = sst [smem:[#allocation29_spill]] %s5733_s6 }
   0x8   :  { %5776 = sst [smem:[#allocation30_spill]] %s5734_s7 }
   0x9   :  { %5777 = sst [smem:[#allocation31_spill]] %s5739_s12 }
   0xa   :  { %5778 = sst [smem:[#allocation32_spill]] %s5740_s13 }
   0xb   :  { %5779 = sst [smem:[#allocation33_spill]] %s5743_s16 }
   0xc   :  { %5780 = sst [smem:[#allocation34_spill]] %s5744_s17 }
   0xd   :  { %5781 = sst [smem:[#allocation35_spill]] %s5745_s18 }
   0xe   :  { %5782 = sst [smem:[#allocation36_spill]] %s5746_s19 }
   0xf   :  { %5783 = sst [smem:[#allocation37_spill]] %s5747_s20 }
  0x10   :  { %5784 = sst [smem:[#allocation38_spill]] %s5748_s21 }
  0x11   :  { %5785 = sst [smem:[#allocation39_spill]] %s5749_s22 }
  0x12   :  { %5786 = sst [smem:[#allocation40_spill]] %s5750_s23 }
  0x13   :  { %28 = vsyncpa [#allocation7], 0 }
  0x14   :  { %30 = vsyncpa [#allocation7 + $0x1], 0  ;;  %s4625_s4 = smov 0   ;;  %s4627_s30 = smov 0  }
  0x15   :  { %s4629_s24 = smov 0   ;;  %s4631_s25 = smov 0  }
  0x16   :  { %s4633_s5 = smov 0   ;;  %s4635_s1 = smov 0  }
  0x17   :  { %s4637_s26 = smov 0   ;;  %s4639_s2 = smov 0  }
  0x18   :  { %s4641_s6 = smov 0   ;;  %s4643_s27 = smov 0  }
  0x19 LB: > { %5787 = sst [smem:[#allocation9_spill]] %s4463_s4  ;;  %s3660_s7 = sadd.s32 4294967295, %s4499_s27   ;;  %s4499_s27 = sphi %s4643_s27, %s36_s27   ;;  %s4495_s6 = sphi %s4641_s6, %s5838_s6   ;;  %s4491_s2 = sphi %s4639_s2, %s5837_s2   ;;  %s4487_s26 = sphi %s4637_s26, %s5836_s26   ;;  %s4483_s1 = sphi %s4635_s1, %s5835_s1   ;;  %s4479_s5 = sphi %s4633_s5, %s5834_s5   ;;  %s4475_s25 = sphi %s4631_s25, %s5833_s25   ;;  %s4471_s24 = sphi %s4629_s24, %s5832_s24   ;;  %s4467_s30 = sphi %s4627_s30, %s5831_s30   ;;  %s4463_s4 = sphi %s4625_s4, %s5830_s4  }
  0x1a   : > { %5788 = sst [smem:[#allocation10_spill]] %s4467_s30  ;;  %s3661_s28 = sadd.s32 4294967294, %s4499_s27  }
  0x1b   : > { %5789 = sst [smem:[#allocation11_spill]] %s4471_s24  ;;  %s45_s29 = sadd.s32 1, %s4491_s2 }
  0x1c   : > { %5790 = sst [smem:[#allocation12_spill]] %s4479_s5  ;;  %s48_s3 = sadd.s32 1, %s4495_s6 }
  0x1d   : > { %5791 = sst [smem:[#allocation13_spill]] %s4487_s26  ;;  %p46_p0 = scmp.ge.s32.totalorder %s45_s29, 2 }
  0x1e   : > { %5792 = sst [smem:[#allocation14_spill]] %s4491_s2  ;;  %s57_s0 = sadd.s32 1, %s4479_s5 }
  0x1f   : > { %5793 = sst [smem:[#allocation15_spill]] %s4495_s6  ;;  %p64_p1 = scmp.ne.s32.totalorder %s4479_s5, %s4475_s25 }
  0x20   : > { %5794 = sst [smem:[#allocation16_spill]] %s4499_s27  ;;  %p65_p2 = scmp.eq.s32.totalorder %s4499_s27, 0 }
  0x21   : > { %s5840_s29 = smov (%p46_p0, %s45_s29), 0  ;;  %s5842_s3 = smov (!%p46_p0, %s48_s3), %s4495_s6 }
  0x22   : > { %5795 = sst [smem:[#allocation17_spill]] %s5840_s29  ;;  %s53_s23 = ssub.s32 %s4491_s2, %s5840_s29 }
  0x23   : > { %p4688_p3 = por %p65_p2, %p64_p1  ;;  %p50_p4 = scmp.ge.s32.totalorder %s5842_s3, 2 }
  0x24   : > { %s582_s21 = sadd.s32 1, %s4471_s24  ;;  %p592_p5 = scmp.ne.s32.totalorder %s4471_s24, %s4467_s30 }
  0x25   : > { %p593_p6 = scmp.eq.s32.totalorder %s3660_s7, 3  ;;  %s5844_s3 = smov (%p50_p4, %s5842_s3), 0 }
  0x26   : > { %5797 = sst [smem:[#allocation18_spill]] %s5844_s3  ;;  %p598_p8 = scmp.ne.s32.totalorder %s4467_s30, %s4463_s4 }
  0x27   : > { %p4697_p7 = por %p593_p6, %p592_p5  ;;  %s52_s17 = ssub.s32 %s4495_s6, %s5844_s3 }
  0x28   : > { %p599_p9 = scmp.eq.s32.totalorder %s3661_s28, 3  ;;  %s54_s29 = sor.u32 %s53_s23, %s52_s17 }
  0x29   : > { %s5798_s20 = scalar_select %p4697_p7, 1, 0 }
  0x2a   : > { %p580_p10 = scmp.eq.s32.totalorder %s52_s17, 0  ;;  %p55_p11 = scmp.eq.s32.totalorder %s54_s29, 0 }
  0x2b   : > { %5799 = sst [smem:[#allocation19_spill]] %s5798_s20  ;;  %p4705_p12 = por %p599_p9, %p598_p8 }
  0x2c   : > { %s4710_s13 = scalar_select %p580_p10, %s4471_s24, %s582_s21  }
  0x2d   : > { %s5800_s16 = scalar_select %p4705_p12, 1, 0 }
  0x2e   : > { %5802 = sst [smem:[#allocation21_spill]] %s4710_s13  ;;  %p3663_p13 = scmp.ge.s32.totalorder %s4499_s27, 4 }
  0x2f   : > { %5801 = sst [smem:[#allocation20_spill]] %s5800_s16 }
  0x30   : > { %s4713_s7 = scalar_select %p55_p11, %s4479_s5, %s57_s0  }
  0x31   : > { %660 = sbr.rel (%p3663_p13) target bundleno = 94 (0x5e), region = 76 }
  0x32   : > { %5803 = sst [smem:[#allocation22_spill]] %s4713_s7 }
  0x36   : > { %663 = sbr.rel (!%p4688_p3) target bundleno = 74 (0x4a), region = 80  ;;  %s665_s23 = sand.u32 (%p4688_p3), 1, %s4479_s5  }
  0x37   : > { %s3770_s17 = sshll.u32 (%p4688_p3), %s4495_s6, 5  ;;  %s3664_s28 = sshll.u32 (%p4688_p3), %s665_s23, 6 }
  0x38   : > { %s670_s29 = sadd.s32 (%p4688_p3), %s4491_s2, %s3770_s17  ;;  %s5804_s21 = sld [smem:[#allocation23_spill]] (%p4688_p3) }
  0x39   : > { %s3667_s3 = sshll.u32 (%p4688_p3), %s670_s29, 2  ;;  %s667_s0 = scalar_lea.vmem (%p4688_p3), [#allocation4], %s3664_s28 }
  0x3e   : > { %s4724_s13 = scalar_lea.vmem %s5804_s21, %s3667_s3 }
  0x3f   : > { %v689_v0 = vld [vmem:[%s4724_s13] sm:$0xf]  ;;  %v691_v1 = vld [vmem:[%s4724_s13 + $0x8] sm:$0xf]  ;;  %v693_v2 = vld [vmem:[%s4724_s13 + $0x10] sm:$0xf] }
  0x40   : > { %690 = vst [vmem:[%s667_s0] sm:$0xf] %v689_v0  ;;  %692 = vst [vmem:[%s667_s0 + $0x4] sm:$0xf] %v691_v1  ;;  %v695_v3 = vld [vmem:[%s4724_s13 + $0x18] sm:$0xf] }
  0x41   : > { %694 = vst [vmem:[%s667_s0 + $0x8] sm:$0xf] %v693_v2  ;;  %v697_v4 = vld [vmem:[%s4724_s13 + $0x20] sm:$0xf]  ;;  %v699_v5 = vld [vmem:[%s4724_s13 + $0x28] sm:$0xf] }
  0x42   : > { %696 = vst [vmem:[%s667_s0 + $0xc] sm:$0xf] %v695_v3  ;;  %698 = vst [vmem:[%s667_s0 + $0x10] sm:$0xf] %v697_v4  ;;  %v701_v6 = vld [vmem:[%s4724_s13 + $0x30] sm:$0xf] }
  0x43   : > { %700 = vst [vmem:[%s667_s0 + $0x14] sm:$0xf] %v699_v5  ;;  %v703_v7 = vld [vmem:[%s4724_s13 + $0x38] sm:$0xf]  ;;  %v705_v8 = vld [vmem:[%s4724_s13 + $0x40] sm:$0xf] }
  0x44   : > { %702 = vst [vmem:[%s667_s0 + $0x18] sm:$0xf] %v701_v6  ;;  %704 = vst [vmem:[%s667_s0 + $0x1c] sm:$0xf] %v703_v7  ;;  %v707_v9 = vld [vmem:[%s4724_s13 + $0x48] sm:$0xf] }
  0x45   : > { %706 = vst [vmem:[%s667_s0 + $0x20] sm:$0xf] %v705_v8  ;;  %v709_v10 = vld [vmem:[%s4724_s13 + $0x50] sm:$0xf]  ;;  %v711_v11 = vld [vmem:[%s4724_s13 + $0x58] sm:$0xf] }
  0x46   : > { %708 = vst [vmem:[%s667_s0 + $0x24] sm:$0xf] %v707_v9  ;;  %710 = vst [vmem:[%s667_s0 + $0x28] sm:$0xf] %v709_v10  ;;  %v713_v12 = vld [vmem:[%s4724_s13 + $0x60] sm:$0xf] }
  0x47   : > { %712 = vst [vmem:[%s667_s0 + $0x2c] sm:$0xf] %v711_v11  ;;  %v715_v13 = vld [vmem:[%s4724_s13 + $0x68] sm:$0xf]  ;;  %v717_v14 = vld [vmem:[%s4724_s13 + $0x70] sm:$0xf] }
  0x48   : > { %714 = vst [vmem:[%s667_s0 + $0x30] sm:$0xf] %v713_v12  ;;  %716 = vst [vmem:[%s667_s0 + $0x34] sm:$0xf] %v715_v13  ;;  %v719_v15 = vld [vmem:[%s4724_s13 + $0x78] sm:$0xf] }
  0x49   : > { %718 = vst [vmem:[%s667_s0 + $0x38] sm:$0xf] %v717_v14  ;;  %720 = vst [vmem:[%s667_s0 + $0x3c] sm:$0xf] %v719_v15 }
  0x4a PF: > { %776 = sbr.rel (!%p4688_p3) target bundleno = 94 (0x5e), region = 121  ;;  %s778_s16 = sand.u32 (%p4688_p3), 1, %s4479_s5  }
  0x4b   : > { %s3771_s4 = sshll.u32 (%p4688_p3), %s4495_s6, 5  ;;  %s3668_s3 = sshll.u32 (%p4688_p3), %s778_s16, 6 }
  0x4c   : > { %s783_s23 = sadd.s32 (%p4688_p3), %s4491_s2, %s3771_s4  ;;  %s5805_s21 = sld [smem:[#allocation24_spill]] (%p4688_p3) }
  0x4d   : > { %s3671_s17 = sshll.u32 (%p4688_p3), %s783_s23, 2  ;;  %s780_s13 = scalar_lea.vmem (%p4688_p3), [#allocation5], %s3668_s3 }
  0x52   : > { %s4750_s7 = scalar_lea.vmem %s5805_s21, %s3671_s17 }
  0x53   : > { %v802_v16 = vld [vmem:[%s4750_s7] sm:$0xf]  ;;  %v804_v17 = vld [vmem:[%s4750_s7 + $0x8] sm:$0xf]  ;;  %v806_v18 = vld [vmem:[%s4750_s7 + $0x10] sm:$0xf] }
  0x54   : > { %803 = vst [vmem:[%s780_s13] sm:$0xf] %v802_v16  ;;  %805 = vst [vmem:[%s780_s13 + $0x4] sm:$0xf] %v804_v17  ;;  %v808_v19 = vld [vmem:[%s4750_s7 + $0x18] sm:$0xf] }
  0x55   : > { %807 = vst [vmem:[%s780_s13 + $0x8] sm:$0xf] %v806_v18  ;;  %v810_v20 = vld [vmem:[%s4750_s7 + $0x20] sm:$0xf]  ;;  %v812_v21 = vld [vmem:[%s4750_s7 + $0x28] sm:$0xf] }
  0x56   : > { %809 = vst [vmem:[%s780_s13 + $0xc] sm:$0xf] %v808_v19  ;;  %811 = vst [vmem:[%s780_s13 + $0x10] sm:$0xf] %v810_v20  ;;  %v814_v22 = vld [vmem:[%s4750_s7 + $0x30] sm:$0xf] }
  0x57   : > { %813 = vst [vmem:[%s780_s13 + $0x14] sm:$0xf] %v812_v21  ;;  %v816_v23 = vld [vmem:[%s4750_s7 + $0x38] sm:$0xf]  ;;  %v818_v24 = vld [vmem:[%s4750_s7 + $0x40] sm:$0xf] }
  0x58   : > { %815 = vst [vmem:[%s780_s13 + $0x18] sm:$0xf] %v814_v22  ;;  %817 = vst [vmem:[%s780_s13 + $0x1c] sm:$0xf] %v816_v23  ;;  %v820_v25 = vld [vmem:[%s4750_s7 + $0x48] sm:$0xf] }
  0x59   : > { %819 = vst [vmem:[%s780_s13 + $0x20] sm:$0xf] %v818_v24  ;;  %v822_v26 = vld [vmem:[%s4750_s7 + $0x50] sm:$0xf]  ;;  %v824_v27 = vld [vmem:[%s4750_s7 + $0x58] sm:$0xf] }
  0x5a   : > { %821 = vst [vmem:[%s780_s13 + $0x24] sm:$0xf] %v820_v25  ;;  %823 = vst [vmem:[%s780_s13 + $0x28] sm:$0xf] %v822_v26  ;;  %v826_v28 = vld [vmem:[%s4750_s7 + $0x60] sm:$0xf] }
  0x5b   : > { %825 = vst [vmem:[%s780_s13 + $0x2c] sm:$0xf] %v824_v27  ;;  %v828_v29 = vld [vmem:[%s4750_s7 + $0x68] sm:$0xf]  ;;  %v830_v30 = vld [vmem:[%s4750_s7 + $0x70] sm:$0xf] }
  0x5c   : > { %827 = vst [vmem:[%s780_s13 + $0x30] sm:$0xf] %v826_v28  ;;  %829 = vst [vmem:[%s780_s13 + $0x34] sm:$0xf] %v828_v29  ;;  %v832_v31 = vld [vmem:[%s4750_s7 + $0x78] sm:$0xf] }
  0x5d   : > { %831 = vst [vmem:[%s780_s13 + $0x38] sm:$0xf] %v830_v30  ;;  %833 = vst [vmem:[%s780_s13 + $0x3c] sm:$0xf] %v832_v31 }
  0x5e PF: > { %p3672_p0 = scmp.ge.s32.totalorder %s4499_s27, 1  ;;  %p942_p1 = scmp.lt.s32.totalorder %s4499_s27, 5 }
  0x60   : > { %p943_p2 = pnand %p3672_p0, %p942_p1 }
  0x61   : > { %s949_s22 = sand.u32 (!%p943_p2), 1, %s4475_s25   ;;  %s5759_s0 = sand.u32 (!%p943_p2), 1, %s4467_s30  }
  0x62   : > { %946 = sbr.rel (%p943_p2) target bundleno = 1650 (0x672), region = 186  ;;  %s3673_s16 = sshll.u32 (!%p943_p2), %s949_s22, 6 }
  0x63   : > { %s3675_s4 = sshll.u32 (!%p943_p2), %s5759_s0, 7  ;;  %s3676_s7 = sshll.u32 (!%p943_p2), %s4483_s1, 4 }
  0x64   : > { %p1056_p3 = scmp.lt.s32.totalorder (!%p943_p2), %s3676_s7, 31  ;;  %s3680_s3 = sshll.u32 (!%p943_p2), %s4487_s26, 4 }
  0x65   : > { %p1068_p4 = scmp.lt.s32.totalorder (!%p943_p2), %s3680_s3, 31  ;;  %s5806_s29 = sld [smem:[#allocation25_spill]] (!%p943_p2) }
  0x66   : > { %s5807_s2 = sld [smem:[#allocation26_spill]] (!%p943_p2)  ;;  %s4806_s13 = scalar_lea.vmem (!%p943_p2), [#allocation5], %s3673_s16 }
  0x67   : > { %s5846_s7 = smov (!%p1056_p3, %s3676_s7), 31  ;;  %s5848_s3 = smov (!%p1068_p4, %s3680_s3), 31 }
  0x68   : > { %s3677_s23 = sshll.u32 %s5846_s7, 2  ;;  %s3681_s22 = sshll.u32 %s5848_s3, 2 }
  0x69   : > { %s3685_s5 = sshll.u32 %s5848_s3, 3  ;;  %s5808_s27 = sld [smem:[#allocation27_spill]] }
  0x6a   : > { %s5809_s12 = sld [smem:[#allocation28_spill]]  ;;  %s4804_s3 = scalar_lea.vmem [#allocation4], %s3673_s16 }
  0x6b   : > { %s4779_s21 = scalar_lea.vmem %s5806_s29, %s3677_s23  ;;  %s5810_s28 = sld [smem:[#allocation29_spill]] }
  0x6c   : > { %s4784_s25 = scalar_lea.vmem %s5807_s2, %s3677_s23  ;;  %s5811_s2 = sld [smem:[#allocation30_spill]] }
  0x6d   : > { %s4808_s24 = scalar_lea.vmem [#allocation6], %s3675_s4  ;;  %p3688_p5 = scmp.ne.s32.totalorder %s4483_s1, 0 }
  0x6f   : > { %s1071_s20 = scalar_lea.vmem %s5808_s27, %s3681_s22  ;;  %1096 = sbr.rel (%p3688_p5) target bundleno = 135 (0x87), region = 198 }
  0x70   : > { %s4792_s7 = scalar_lea.vmem %s5809_s12, %s3681_s22 }
  0x71   : > { %s4797_s29 = scalar_lea.vmem %s5810_s28, %s3685_s5 }
  0x72   : > { %s4802_s23 = scalar_lea.vmem %s5811_s2, %s3685_s5 }
  0x74   : > { %v3774_v32 = vld [vmem:[%s1071_s20] sm:$0xff]   ;;  %v3837_v33 = vld [vmem:[%s1071_s20 + $0x8] sm:$0xff]   ;;  %v3838_v34 = vld [vmem:[%s1071_s20 + $0x10] sm:$0xff]  }
  0x75   : > { %v3775_v35 = vunpack.c.l.bf16 %v3774_v32  ;;  %v3776_v36 = vunpack.c.h.bf16 %v3774_v32  ;;  %v3779_v37 = vunpack.c.l.bf16 %v3837_v33  ;;  %v3780_v38 = vunpack.c.h.bf16 %v3837_v33  ;;  %v3839_v39 = vld [vmem:[%s1071_s20 + $0x18] sm:$0xff]   ;;  %v3840_v40 = vld [vmem:[%s1071_s20 + $0x20] sm:$0xff]   ;;  %v3841_v41 = vld [vmem:[%s1071_s20 + $0x28] sm:$0xff]  }
  0x76   : > { %v3783_v42 = vunpack.c.l.bf16 %v3838_v34  ;;  %v3784_v43 = vunpack.c.h.bf16 %v3838_v34  ;;  %v3787_v44 = vunpack.c.l.bf16 %v3839_v39  ;;  %v3788_v45 = vunpack.c.h.bf16 %v3839_v39  ;;  %v3842_v46 = vld [vmem:[%s1071_s20 + $0x30] sm:$0xff]   ;;  %v3843_v47 = vld [vmem:[%s1071_s20 + $0x38] sm:$0xff]   ;;  %v3806_v48 = vld [vmem:[%s4792_s7] sm:$0xff]  }
  0x77   : > { %1129 = vst [vmem:[#allocation2 + $0x30] sm:$0xff] %v3775_v35  ;;  %1130 = vst [vmem:[#allocation2] sm:$0xff] %v3776_v36  ;;  %v3791_v49 = vunpack.c.l.bf16 %v3840_v40  ;;  %v3792_v50 = vunpack.c.h.bf16 %v3840_v40  ;;  %v3795_v51 = vunpack.c.l.bf16 %v3841_v41  ;;  %v3796_v52 = vunpack.c.h.bf16 %v3841_v41  ;;  %v3844_v53 = vld [vmem:[%s4792_s7 + $0x8] sm:$0xff]   ;;  %v3845_v54 = vld [vmem:[%s4792_s7 + $0x10] sm:$0xff]  }
  0x78   : > { %1131 = vst [vmem:[#allocation2 + $0x58] sm:$0xff] %v3779_v37  ;;  %1132 = vst [vmem:[#allocation2 + $0x18] sm:$0xff] %v3780_v38  ;;  %v3846_v55 = vld [vmem:[%s4792_s7 + $0x18] sm:$0xff]   ;;  %v3799_v56 = vunpack.c.l.bf16 %v3842_v46  ;;  %v3800_v57 = vunpack.c.h.bf16 %v3842_v46  ;;  %v3803_v58 = vunpack.c.l.bf16 %v3843_v47  ;;  %v3804_v59 = vunpack.c.h.bf16 %v3843_v47  ;;  %v3847_v60 = vld [vmem:[%s4792_s7 + $0x20] sm:$0xff]  }
  0x79   : > { %1133 = vst [vmem:[#allocation2 + $0x50] sm:$0xff] %v3783_v42  ;;  %1134 = vst [vmem:[#allocation2 + $0x68] sm:$0xff] %v3784_v43  ;;  %v3848_v61 = vld [vmem:[%s4792_s7 + $0x28] sm:$0xff]   ;;  %v3807_v62 = vunpack.c.l.bf16 %v3806_v48  ;;  %v3808_v63 = vunpack.c.h.bf16 %v3806_v48  ;;  %v3811_v0 = vunpack.c.l.bf16 %v3844_v53  ;;  %v3812_v1 = vunpack.c.h.bf16 %v3844_v53  ;;  %v3849_v2 = vld [vmem:[%s4792_s7 + $0x30] sm:$0xff]  }
  0x7a   : > { %1135 = vst [vmem:[#allocation2 + $0x8] sm:$0xff] %v3787_v44  ;;  %1136 = vst [vmem:[#allocation2 + $0x48] sm:$0xff] %v3788_v45  ;;  %v3850_v3 = vld [vmem:[%s4792_s7 + $0x38] sm:$0xff]   ;;  %v3815_v4 = vunpack.c.l.bf16 %v3845_v54  ;;  %v3816_v5 = vunpack.c.h.bf16 %v3845_v54  ;;  %v3819_v6 = vunpack.c.l.bf16 %v3846_v55  ;;  %v3820_v7 = vunpack.c.h.bf16 %v3846_v55 }
  0x7b   : > { %1137 = vst [vmem:[#allocation2 + $0x40] sm:$0xff] %v3791_v49  ;;  %1138 = vst [vmem:[#allocation2 + $0x20] sm:$0xff] %v3792_v50  ;;  %v3823_v8 = vunpack.c.l.bf16 %v3847_v60  ;;  %v3824_v9 = vunpack.c.h.bf16 %v3847_v60  ;;  %v3827_v10 = vunpack.c.l.bf16 %v3848_v61  ;;  %v3828_v11 = vunpack.c.h.bf16 %v3848_v61 }
  0x7c   : > { %1139 = vst [vmem:[#allocation2 + $0x10] sm:$0xff] %v3795_v51  ;;  %1140 = vst [vmem:[#allocation2 + $0x38] sm:$0xff] %v3796_v52  ;;  %v3831_v12 = vunpack.c.l.bf16 %v3849_v2  ;;  %v3832_v13 = vunpack.c.h.bf16 %v3849_v2  ;;  %v3835_v14 = vunpack.c.l.bf16 %v3850_v3  ;;  %v3836_v15 = vunpack.c.h.bf16 %v3850_v3 }
  0x7d   : > { %1141 = vst [vmem:[#allocation2 + $0x60] sm:$0xff] %v3799_v56  ;;  %1142 = vst [vmem:[#allocation2 + $0x70] sm:$0xff] %v3800_v57 }
  0x7e   : > { %1143 = vst [vmem:[#allocation2 + $0x78] sm:$0xff] %v3803_v58  ;;  %1144 = vst [vmem:[#allocation2 + $0x28] sm:$0xff] %v3804_v59 }
  0x7f   : > { %1177 = vst [vmem:[#allocation3 + $0x28] sm:$0xff] %v3807_v62  ;;  %1178 = vst [vmem:[#allocation3 + $0x68] sm:$0xff] %v3808_v63 }
  0x80   : > { %1179 = vst [vmem:[#allocation3 + $0x10] sm:$0xff] %v3811_v0  ;;  %1180 = vst [vmem:[#allocation3 + $0x40] sm:$0xff] %v3812_v1 }
  0x81   : > { %1181 = vst [vmem:[#allocation3 + $0x48] sm:$0xff] %v3815_v4  ;;  %1182 = vst [vmem:[#allocation3 + $0x30] sm:$0xff] %v3816_v5 }
  0x82   : > { %1183 = vst [vmem:[#allocation3 + $0x70] sm:$0xff] %v3819_v6  ;;  %1184 = vst [vmem:[#allocation3 + $0x38] sm:$0xff] %v3820_v7 }
  0x83   : > { %1185 = vst [vmem:[#allocation3 + $0x20] sm:$0xff] %v3823_v8  ;;  %1186 = vst [vmem:[#allocation3 + $0x78] sm:$0xff] %v3824_v9 }
  0x84   : > { %1187 = vst [vmem:[#allocation3 + $0x18] sm:$0xff] %v3827_v10  ;;  %1188 = vst [vmem:[#allocation3 + $0x58] sm:$0xff] %v3828_v11 }
  0x85   : > { %1189 = vst [vmem:[#allocation3] sm:$0xff] %v3831_v12  ;;  %1190 = vst [vmem:[#allocation3 + $0x8] sm:$0xff] %v3832_v13 }
  0x86   : > { %1191 = vst [vmem:[#allocation3 + $0x60] sm:$0xff] %v3835_v14  ;;  %1192 = vst [vmem:[#allocation3 + $0x50] sm:$0xff] %v3836_v15 }
  0x87 PF: > { %v4229_v16 = vld [vmem:[%s4779_s21 + $0x38] sm:$0xff]   ;;  %v4231_v18 = vld [vmem:[%s4779_s21 + $0x30] sm:$0xff]   ;;  %v4233_v20 = vld [vmem:[%s4779_s21 + $0x28] sm:$0xff]   ;;  %p3721_p6 = scmp.ne.s32.totalorder %s4483_s1, 1 }
  0x88   : > { %v4230_v17 = vld [vmem:[%s4784_s25 + $0x38] sm:$0xff]   ;;  %3947 = vmatprep.subr.bf16.mxu0 %v4229_v16  ;;  %v4232_v19 = vld [vmem:[%s4784_s25 + $0x30] sm:$0xff]   ;;  %v4234_v21 = vld [vmem:[%s4784_s25 + $0x28] sm:$0xff]   ;;  %s5812_s6 = sld [smem:[#allocation35_spill]] (!%p3721_p6) }
  0x89   : > { %3979 = vmatprep.subr.bf16.mxu1 %v4230_v17  ;;  %3948 = vmatpush3.bf16.msra.mxu0 %v4229_v16  ;;  %v4235_v22 = vld [vmem:[%s4779_s21 + $0x20] sm:$0xff]   ;;  %v4237_v24 = vld [vmem:[%s4779_s21 + $0x18] sm:$0xff]   ;;  %v4239_v26 = vld [vmem:[%s4779_s21 + $0x10] sm:$0xff]   ;;  %s5814_s12 = sld [smem:[#allocation36_spill]] (!%p3721_p6) }
  0x8a   : > { %3980 = vmatpush3.bf16.msra.mxu1 %v4230_v17  ;;  %3949 = vmatprep.subr.bf16.mxu0 %v4231_v18  ;;  %v4236_v23 = vld [vmem:[%s4784_s25 + $0x20] sm:$0xff]   ;;  %v4238_v25 = vld [vmem:[%s4784_s25 + $0x18] sm:$0xff]   ;;  %v4240_v27 = vld [vmem:[%s4784_s25 + $0x10] sm:$0xff]   ;;  %s5815_s0 = sld [smem:[#allocation31_spill]] (!%p3721_p6) }
  0x8b   : > { %3981 = vmatprep.subr.bf16.mxu1 %v4232_v19  ;;  %v4245_v28 = vld [vmem:[%s4804_s3] sm:$0xff]   ;;  %v4241_v30 = vld [vmem:[%s4779_s21 + $0x8] sm:$0xff]   ;;  %v4249_v36 = vld [vmem:[%s4804_s3 + $0x10] sm:$0xff]   ;;  %s5818_s17 = sld [smem:[#allocation34_spill]] (!%p3721_p6) }
  0x8c   : > { %v4246_v29 = vld [vmem:[%s4806_s13] sm:$0xff]   ;;  %3963 = vmatprep.mubr.bf16.mxu0 %v4245_v28  ;;  %v4242_v31 = vld [vmem:[%s4784_s25 + $0x8] sm:$0xff]   ;;  %v4250_v37 = vld [vmem:[%s4806_s13 + $0x10] sm:$0xff]   ;;  %s5819_s2 = sld [smem:[#allocation37_spill]] (!%p3721_p6) }
  0x8d   : > { %3950 = vmatpush3.bf16.msra.mxu0 %v4231_v18  ;;  %3995 = vmatprep.mubr.bf16.mxu1 %v4246_v29  ;;  %v4243_v32 = vld [vmem:[%s4779_s21] sm:$0xff]   ;;  %v4247_v34 = vld [vmem:[%s4804_s3 + $0x8] sm:$0xff]   ;;  %v4251_v38 = vld [vmem:[%s4804_s3 + $0x18] sm:$0xff]   ;;  %s5816_s21 = sld [smem:[#allocation32_spill]] (!%p3721_p6) }
  0x8e   : > { %3982 = vmatpush3.bf16.msra.mxu1 %v4232_v19  ;;  %3951 = vmatprep.subr.bf16.mxu0 %v4233_v20  ;;  %v4244_v33 = vld [vmem:[%s4784_s25] sm:$0xff]   ;;  %v4248_v35 = vld [vmem:[%s4806_s13 + $0x8] sm:$0xff]   ;;  %v4252_v39 = vld [vmem:[%s4806_s13 + $0x18] sm:$0xff]   ;;  %s5820_s19 = sld [smem:[#allocation38_spill]] (!%p3721_p6) }
  0x8f   : > { %3983 = vmatprep.subr.bf16.mxu1 %v4234_v21  ;;  %v4253_v40 = vld [vmem:[%s4804_s3 + $0x20] sm:$0xff]   ;;  %v4255_v42 = vld [vmem:[%s4804_s3 + $0x28] sm:$0xff]   ;;  %v4257_v44 = vld [vmem:[%s4804_s3 + $0x30] sm:$0xff]   ;;  %s5821_s5 = sld [smem:[#allocation39_spill]] (!%p3721_p6) }
  0x90   : > { %v4254_v41 = vld [vmem:[%s4806_s13 + $0x20] sm:$0xff]   ;;  %v4256_v43 = vld [vmem:[%s4806_s13 + $0x28] sm:$0xff]   ;;  %v4258_v45 = vld [vmem:[%s4806_s13 + $0x30] sm:$0xff]  }
  0x91   : > { %3952 = vmatpush3.bf16.msra.mxu0 %v4233_v20  ;;  %v4259_v46 = vld [vmem:[%s4804_s3 + $0x38] sm:$0xff]   ;;  %v1468_v49 = vld [vmem:[#allocation3 + $0x10] sm:$0xff]  ;;  %v1466_v54 = vld [vmem:[#allocation3 + $0x28] sm:$0xff]  ;;  %s5813_s3 = smov (!%p3721_p6), %s5812_s6 }
  0x92   : > { %3984 = vmatpush3.bf16.msra.mxu1 %v4234_v21  ;;  %3953 = vmatprep.subr.bf16.mxu0 %v4235_v22  ;;  %v4260_v47 = vld [vmem:[%s4806_s13 + $0x38] sm:$0xff]   ;;  %v1193_v51 = vld [vmem:[#allocation2 + $0x30] sm:$0xff]  ;;  %v1469_v60 = vld [vmem:[#allocation3 + $0x40] sm:$0xff] }
  0x93   : > { %3985 = vmatprep.subr.bf16.mxu1 %v4236_v23  ;;  %v1195_v48 = vld [vmem:[#allocation2 + $0x58] sm:$0xff]  ;;  %v1194_v63 = vld [vmem:[#allocation2] sm:$0xff]  ;;  %v1467_v2 = vld [vmem:[#allocation3 + $0x68] sm:$0xff] }
  0x94   : > { %v1196_v57 = vld [vmem:[#allocation2 + $0x18] sm:$0xff]  ;;  %v1199_v5 = vld [vmem:[#allocation2 + $0x8] sm:$0xff]  ;;  %v1472_v8 = vld [vmem:[#allocation3 + $0x70] sm:$0xff] }
  0x95   : > { %3954 = vmatpush3.bf16.msra.mxu0 %v4235_v22  ;;  %v1197_v11 = vld [vmem:[#allocation2 + $0x50] sm:$0xff]  ;;  %v1470_v14 = vld [vmem:[#allocation3 + $0x48] sm:$0xff]  ;;  %v1473_v20 = vld [vmem:[#allocation3 + $0x38] sm:$0xff] }
  0x96   : > { %3986 = vmatpush3.bf16.msra.mxu1 %v4236_v23  ;;  %3955 = vmatprep.subr.bf16.mxu0 %v4237_v24  ;;  %v1200_v17 = vld [vmem:[#allocation2 + $0x48] sm:$0xff]  ;;  %v1203_v29 = vld [vmem:[#allocation2 + $0x10] sm:$0xff] }
  0x97   : > { %3987 = vmatprep.subr.bf16.mxu1 %v4238_v25  ;;  %v1198_v23 = vld [vmem:[#allocation2 + $0x68] sm:$0xff] }
  0x99   : > { %3956 = vmatpush3.bf16.msra.mxu0 %v4237_v24 }
  0x9a   : > { %3988 = vmatpush3.bf16.msra.mxu1 %v4238_v25  ;;  %3957 = vmatprep.subr.bf16.mxu0 %v4239_v26 }
  0x9b   : > { %3989 = vmatprep.subr.bf16.mxu1 %v4240_v27 }
  0x9d   : > { %3958 = vmatpush3.bf16.msra.mxu0 %v4239_v26  ;;  %v1471_v26 = vld [vmem:[#allocation3 + $0x30] sm:$0xff] }
  0x9e   : > { %3990 = vmatpush3.bf16.msra.mxu1 %v4240_v27  ;;  %3959 = vmatprep.subr.bf16.mxu0 %v4241_v30 }
  0x9f   : > { %3991 = vmatprep.subr.bf16.mxu1 %v4242_v31 }
  0xa1   : > { %3960 = vmatpush3.bf16.msra.mxu0 %v4241_v30 }
  0xa2   : > { %3992 = vmatpush3.bf16.msra.mxu1 %v4242_v31  ;;  %3961 = vmatprep.subr.bf16.mxu0 %v4243_v32 }
  0xa3   : > { %3993 = vmatprep.subr.bf16.mxu1 %v4244_v33 }
  0xa5   : > { %3962 = vmatpush3.bf16.msra.mxu0 %v4243_v32  ;;  %v1476_v32 = vld [vmem:[#allocation3 + $0x18] sm:$0xff] }
  0xa6   : > { %3994 = vmatpush3.bf16.msra.mxu1 %v4244_v33 }
  0xa8   : > { %3964 = vmatmul.mubr.bf16.vlgmr.msra.gmra.mxu0 %v4247_v34 }
  0xa9   : > { %3996 = vmatmul.mubr.bf16.vlgmr.msra.gmra.mxu1 %v4248_v35  ;;  %3967 = vmatprep.mubr.bf16.mxu0 %v4249_v36  ;;  %v1201_v35 = vld [vmem:[#allocation2 + $0x40] sm:$0xff] }
  0xaa   : > { %3999 = vmatprep.mubr.bf16.mxu1 %v4250_v37 }
  0xb0   : > { %3968 = vmatmul.mubr.bf16.gmra.mxu0 %v4251_v38  ;;  %v1474_v38 = vld [vmem:[#allocation3 + $0x20] sm:$0xff] }
  0xb1   : > { %4000 = vmatmul.mubr.bf16.gmra.mxu1 %v4252_v39  ;;  %3971 = vmatprep.mubr.bf16.mxu0 %v4253_v40 }
  0xb2   : > { %4003 = vmatprep.mubr.bf16.mxu1 %v4254_v41  ;;  %v1204_v41 = vld [vmem:[#allocation2 + $0x38] sm:$0xff] }
  0xb8   : > { %3972 = vmatmul.mubr.bf16.gmra.mxu0 %v4255_v42 }
  0xb9   : > { %4004 = vmatmul.mubr.bf16.gmra.mxu1 %v4256_v43  ;;  %3975 = vmatprep.mubr.bf16.mxu0 %v4257_v44  ;;  %v1477_v44 = vld [vmem:[#allocation3 + $0x58] sm:$0xff] }
  0xba   : > { %4007 = vmatprep.mubr.bf16.mxu1 %v4258_v45 }
  0xc0   : > { %3976 = vmatmul.mubr.bf16.gmra.mxu0 %v4259_v46 }
  0xc1   : > { %4008 = vmatmul.mubr.bf16.gmra.mxu1 %v4260_v47  ;;  %v1202_v47 = vld [vmem:[#allocation2 + $0x20] sm:$0xff] }
 0x168   : > { %v3965_v50 = vpop.f32.mrf.mxu0 }
 0x169   : > { %v1436_v52 = vadd.f32 %v3965_v50, %v1195_v48  ;;  %v3997_v53 = vpop.f32.mrf.mxu1  ;;  %v1475_v50 = vld [vmem:[#allocation3 + $0x78] sm:$0xff] }
 0x16a   : > { %v1709_v55 = vadd.f32 %v3997_v53, %v1468_v49  ;;  %v1371_v56 = vpop.f32.mrf.mxu0  ;;  %v1207_v53 = vld [vmem:[#allocation2 + $0x78] sm:$0xff] }
 0x16b   : > { %1452 = vst [vmem:[#allocation2 + $0x58] sm:$0xff] %v1436_v52  ;;  %v1434_v58 = vadd.f32 %v1371_v56, %v1193_v51  ;;  %v1644_v59 = vpop.f32.mrf.mxu1  ;;  %v1480_v56 = vld [vmem:[#allocation3 + $0x60] sm:$0xff] }
 0x16c   : > { %1725 = vst [vmem:[#allocation3 + $0x10] sm:$0xff] %v1709_v55  ;;  %v1707_v61 = vadd.f32 %v1644_v59, %v1466_v54  ;;  %v3966_v62 = vpop.f32.mrf.mxu0  ;;  %v1205_v59 = vld [vmem:[#allocation2 + $0x60] sm:$0xff] }
 0x16d   : > { %1450 = vst [vmem:[#allocation2 + $0x30] sm:$0xff] %v1434_v58  ;;  %v1437_v0 = vadd.f32 %v3966_v62, %v1196_v57  ;;  %v3998_v1 = vpop.f32.mrf.mxu1  ;;  %v1478_v62 = vld [vmem:[#allocation3] sm:$0xff] }
 0x16e   : > { %1723 = vst [vmem:[#allocation3 + $0x28] sm:$0xff] %v1707_v61  ;;  %v1710_v3 = vadd.f32 %v3998_v1, %v1469_v60  ;;  %v1374_v4 = vpop.f32.mrf.mxu0  ;;  %v1208_v1 = vld [vmem:[#allocation2 + $0x28] sm:$0xff] }
 0x16f   : > { %1453 = vst [vmem:[#allocation2 + $0x18] sm:$0xff] %v1437_v0  ;;  %v1435_v6 = vadd.f32 %v1374_v4, %v1194_v63  ;;  %v1647_v7 = vpop.f32.mrf.mxu1  ;;  %v1481_v4 = vld [vmem:[#allocation3 + $0x50] sm:$0xff] }
 0x170   : > { %1726 = vst [vmem:[#allocation3 + $0x40] sm:$0xff] %v1710_v3  ;;  %v1708_v9 = vadd.f32 %v1647_v7, %v1467_v2  ;;  %v3969_v10 = vpop.f32.mrf.mxu0  ;;  %v1206_v7 = vld [vmem:[#allocation2 + $0x70] sm:$0xff] }
 0x171   : > { %1451 = vst [vmem:[#allocation2] sm:$0xff] %v1435_v6  ;;  %v1440_v12 = vadd.f32 %v3969_v10, %v1199_v5  ;;  %v4001_v13 = vpop.f32.mrf.mxu1  ;;  %v1479_v10 = vld [vmem:[#allocation3 + $0x8] sm:$0xff] }
 0x172   : > { %1724 = vst [vmem:[#allocation3 + $0x68] sm:$0xff] %v1708_v9  ;;  %v1713_v15 = vadd.f32 %v4001_v13, %v1472_v8  ;;  %v1387_v16 = vpop.f32.mrf.mxu0 }
 0x173   : > { %1456 = vst [vmem:[#allocation2 + $0x8] sm:$0xff] %v1440_v12  ;;  %v1438_v18 = vadd.f32 %v1387_v16, %v1197_v11  ;;  %v1660_v19 = vpop.f32.mrf.mxu1 }
 0x174   : > { %1729 = vst [vmem:[#allocation3 + $0x70] sm:$0xff] %v1713_v15  ;;  %v1711_v21 = vadd.f32 %v1660_v19, %v1470_v14  ;;  %v3970_v22 = vpop.f32.mrf.mxu0 }
 0x175   : > { %1454 = vst [vmem:[#allocation2 + $0x50] sm:$0xff] %v1438_v18  ;;  %v1441_v24 = vadd.f32 %v3970_v22, %v1200_v17  ;;  %v4002_v25 = vpop.f32.mrf.mxu1 }
 0x176   : > { %1727 = vst [vmem:[#allocation3 + $0x48] sm:$0xff] %v1711_v21  ;;  %v1714_v27 = vadd.f32 %v4002_v25, %v1473_v20  ;;  %v1390_v28 = vpop.f32.mrf.mxu0 }
 0x177   : > { %1457 = vst [vmem:[#allocation2 + $0x48] sm:$0xff] %v1441_v24  ;;  %v1439_v30 = vadd.f32 %v1390_v28, %v1198_v23  ;;  %v1663_v31 = vpop.f32.mrf.mxu1 }
 0x178   : > { %1730 = vst [vmem:[#allocation3 + $0x38] sm:$0xff] %v1714_v27  ;;  %v1712_v33 = vadd.f32 %v1663_v31, %v1471_v26  ;;  %v3973_v34 = vpop.f32.mrf.mxu0 }
 0x179   : > { %1455 = vst [vmem:[#allocation2 + $0x68] sm:$0xff] %v1439_v30  ;;  %v1444_v36 = vadd.f32 %v3973_v34, %v1203_v29  ;;  %v4005_v37 = vpop.f32.mrf.mxu1 }
 0x17a   : > { %1728 = vst [vmem:[#allocation3 + $0x30] sm:$0xff] %v1712_v33  ;;  %v1717_v39 = vadd.f32 %v4005_v37, %v1476_v32  ;;  %v1403_v40 = vpop.f32.mrf.mxu0 }
 0x17b   : > { %1460 = vst [vmem:[#allocation2 + $0x10] sm:$0xff] %v1444_v36  ;;  %v1442_v42 = vadd.f32 %v1403_v40, %v1201_v35  ;;  %v1676_v43 = vpop.f32.mrf.mxu1 }
 0x17c   : > { %1733 = vst [vmem:[#allocation3 + $0x18] sm:$0xff] %v1717_v39  ;;  %v1715_v45 = vadd.f32 %v1676_v43, %v1474_v38  ;;  %v3974_v46 = vpop.f32.mrf.mxu0 }
 0x17d   : > { %1458 = vst [vmem:[#allocation2 + $0x40] sm:$0xff] %v1442_v42  ;;  %v1445_v48 = vadd.f32 %v3974_v46, %v1204_v41  ;;  %v4006_v49 = vpop.f32.mrf.mxu1 }
 0x17e   : > { %1731 = vst [vmem:[#allocation3 + $0x20] sm:$0xff] %v1715_v45  ;;  %v1718_v51 = vadd.f32 %v4006_v49, %v1477_v44  ;;  %v1406_v52 = vpop.f32.mrf.mxu0 }
 0x17f   : > { %1461 = vst [vmem:[#allocation2 + $0x38] sm:$0xff] %v1445_v48  ;;  %v1443_v54 = vadd.f32 %v1406_v52, %v1202_v47  ;;  %v1679_v55 = vpop.f32.mrf.mxu1 }
 0x180   : > { %1734 = vst [vmem:[#allocation3 + $0x58] sm:$0xff] %v1718_v51  ;;  %v1716_v57 = vadd.f32 %v1679_v55, %v1475_v50  ;;  %v3977_v58 = vpop.f32.mrf.mxu0 }
 0x181   : > { %1459 = vst [vmem:[#allocation2 + $0x20] sm:$0xff] %v1443_v54  ;;  %v1448_v60 = vadd.f32 %v3977_v58, %v1207_v53  ;;  %v4009_v61 = vpop.f32.mrf.mxu1 }
 0x182   : > { %1732 = vst [vmem:[#allocation3 + $0x78] sm:$0xff] %v1716_v57  ;;  %v1721_v63 = vadd.f32 %v4009_v61, %v1480_v56  ;;  %v1419_v0 = vpop.f32.mrf.mxu0 }
 0x183   : > { %1464 = vst [vmem:[#allocation2 + $0x78] sm:$0xff] %v1448_v60  ;;  %v1446_v2 = vadd.f32 %v1419_v0, %v1205_v59  ;;  %v1692_v3 = vpop.f32.mrf.mxu1 }
 0x184   : > { %1737 = vst [vmem:[#allocation3 + $0x60] sm:$0xff] %v1721_v63  ;;  %v1719_v5 = vadd.f32 %v1692_v3, %v1478_v62  ;;  %v3978_v6 = vpop.f32.mrf.mxu0 }
 0x185   : > { %1462 = vst [vmem:[#allocation2 + $0x60] sm:$0xff] %v1446_v2  ;;  %v1449_v8 = vadd.f32 %v3978_v6, %v1208_v1  ;;  %v4010_v9 = vpop.f32.mrf.mxu1 }
 0x186   : > { %1735 = vst [vmem:[#allocation3] sm:$0xff] %v1719_v5  ;;  %v1722_v11 = vadd.f32 %v4010_v9, %v1481_v4  ;;  %v1422_v12 = vpop.f32.mrf.mxu0  ;;  %1742 = sbr.rel (%p3721_p6) target bundleno = 1624 (0x658), region = 202 }
 0x187   : > { %1465 = vst [vmem:[#allocation2 + $0x28] sm:$0xff] %v1449_v8  ;;  %v1447_v13 = vadd.f32 %v1422_v12, %v1206_v7  ;;  %v1695_v14 = vpop.f32.mrf.mxu1 }
 0x188   : > { %1738 = vst [vmem:[#allocation3 + $0x50] sm:$0xff] %v1722_v11  ;;  %v1720_v15 = vadd.f32 %v1695_v14, %v1479_v10 }
 0x189   : > { %1463 = vst [vmem:[#allocation2 + $0x70] sm:$0xff] %v1447_v13 }
 0x18a   : > { %1736 = vst [vmem:[#allocation3 + $0x8] sm:$0xff] %v1720_v15 }
 0x18b   : > { %v2349_v16 = vld [vmem:[%s4802_s23] sm:$0xff]  ;;  %v4501_v18 = vmov 0   ;;  %v2350_v19 = vld [vmem:[%s4802_s23 + $0x8] sm:$0xff]  ;;  %v1762_v21 = vld [vmem:[%s4797_s29 + $0x18] sm:$0xff] }
 0x18c   : > { %v1759_v17 = vld [vmem:[%s4797_s29] sm:$0xff]  ;;  %4262 = vset.pattern.permute.xlu1 %v4501_v18  ;;  %4261 = vset.pattern.permute.xlu0 %v4501_v18  ;;  %v1760_v20 = vld [vmem:[%s4797_s29 + $0x8] sm:$0xff]  ;;  %v1761_v22 = vld [vmem:[%s4797_s29 + $0x10] sm:$0xff] }
 0x18d   : > { %2367 = vperm.xlu1 %4262, %v2349_v16   ;;  %1777 = vperm.xlu0 %4261, %v1759_v17   ;;  %v2352_v23 = vld [vmem:[%s4802_s23 + $0x18] sm:$0xff]  ;;  %v2351_v24 = vld [vmem:[%s4802_s23 + $0x10] sm:$0xff]  ;;  %v1764_v27 = vld [vmem:[%s4797_s29 + $0x28] sm:$0xff] }
 0x18e   : > { %v4263_v25 = vld [vmem:[%s5737_s10 + $0x38] sm:$0xff]   ;;  %v4264_v26 = vld [vmem:[%s5737_s10 + $0x30] sm:$0xff]   ;;  %v1763_v29 = vld [vmem:[%s4797_s29 + $0x20] sm:$0xff] }
 0x18f   : > { %4011 = vmatprep.subr.bf16.mxu0 %v4263_v25  ;;  %v4265_v28 = vld [vmem:[%s5741_s14 + $0x38] sm:$0xff]   ;;  %v4267_v30 = vld [vmem:[%s5741_s14 + $0x30] sm:$0xff]   ;;  %v4266_v31 = vld [vmem:[%s5737_s10 + $0x28] sm:$0xff]  }
 0x190   : > { %4012 = vmatpush3.bf16.msra.mxu0 %v4263_v25  ;;  %4043 = vmatprep.subr.bf16.mxu1 %v4265_v28  ;;  %v4269_v32 = vld [vmem:[%s5741_s14 + $0x28] sm:$0xff]   ;;  %v2353_v34 = vld [vmem:[%s4802_s23 + $0x20] sm:$0xff]  ;;  %v1766_v37 = vld [vmem:[%s4797_s29 + $0x38] sm:$0xff] }
 0x191   : > { %2372 = vperm.xlu1 %4262, %v2350_v19   ;;  %1782 = vperm.xlu0 %4261, %v1760_v20   ;;  %v2354_v33 = vld [vmem:[%s4802_s23 + $0x28] sm:$0xff]  ;;  %v4268_v35 = vld [vmem:[%s5737_s10 + $0x20] sm:$0xff]   ;;  %v1765_v38 = vld [vmem:[%s4797_s29 + $0x30] sm:$0xff] }
 0x192   : > { %4013 = vmatprep.subr.bf16.mxu0 %v4264_v26  ;;  %4044 = vmatpush3.bf16.msra.mxu1 %v4265_v28  ;;  %v4271_v36 = vld [vmem:[%s5741_s14 + $0x20] sm:$0xff]   ;;  %v4270_v39 = vld [vmem:[%s5737_s10 + $0x18] sm:$0xff]   ;;  %v2355_v42 = vld [vmem:[%s4802_s23 + $0x30] sm:$0xff] }
 0x193   : > { %4045 = vmatprep.subr.bf16.mxu1 %v4267_v30  ;;  %v4273_v40 = vld [vmem:[%s5741_s14 + $0x18] sm:$0xff]   ;;  %v4272_v43 = vld [vmem:[%s5737_s10 + $0x10] sm:$0xff]   ;;  %v1768_v45 = vld [vmem:[%s4797_s29 + $0x48] sm:$0xff] }
 0x194   : > { %4014 = vmatpush3.bf16.msra.mxu0 %v4264_v26  ;;  %v2356_v41 = vld [vmem:[%s4802_s23 + $0x38] sm:$0xff]  ;;  %v4275_v44 = vld [vmem:[%s5741_s14 + $0x10] sm:$0xff]   ;;  %v1767_v46 = vld [vmem:[%s4797_s29 + $0x40] sm:$0xff] }
 0x195   : > { %1792 = vperm.xlu1 %4262, %v1762_v21   ;;  %1787 = vperm.xlu0 %4261, %v1761_v22   ;;  %v4274_v47 = vld [vmem:[%s5737_s10 + $0x8] sm:$0xff]   ;;  %v2357_v49 = vld [vmem:[%s4802_s23 + $0x40] sm:$0xff]  ;;  %v1770_v52 = vld [vmem:[%s4797_s29 + $0x58] sm:$0xff] }
 0x196   : > { %4015 = vmatprep.subr.bf16.mxu0 %v4266_v31  ;;  %4046 = vmatpush3.bf16.msra.mxu1 %v4267_v30  ;;  %v2358_v48 = vld [vmem:[%s4802_s23 + $0x48] sm:$0xff]  ;;  %v4276_v51 = vld [vmem:[%s5737_s10] sm:$0xff]   ;;  %v1769_v53 = vld [vmem:[%s4797_s29 + $0x50] sm:$0xff] }
 0x197   : > { %4047 = vmatprep.subr.bf16.mxu1 %v4269_v32  ;;  %v4277_v50 = vld [vmem:[%s5741_s14 + $0x8] sm:$0xff]   ;;  %v4278_v54 = vld [vmem:[%s5741_s14] sm:$0xff]   ;;  %v2360_v55 = vld [vmem:[%s4802_s23 + $0x58] sm:$0xff] }
 0x198   : > { %4016 = vmatpush3.bf16.msra.mxu0 %v4266_v31  ;;  %v2359_v56 = vld [vmem:[%s4802_s23 + $0x50] sm:$0xff]  ;;  %v1772_v57 = vld [vmem:[%s4797_s29 + $0x68] sm:$0xff]  ;;  %v1771_v58 = vld [vmem:[%s4797_s29 + $0x60] sm:$0xff] }
 0x199   : > { %2382 = vperm.xlu1 %4262, %v2352_v23   ;;  %2377 = vperm.xlu0 %4261, %v2351_v24   ;;  %v2362_v59 = vld [vmem:[%s4802_s23 + $0x68] sm:$0xff]  ;;  %v2361_v60 = vld [vmem:[%s4802_s23 + $0x60] sm:$0xff]  ;;  %v1774_v61 = vld [vmem:[%s4797_s29 + $0x78] sm:$0xff] }
 0x19a   : > { %4017 = vmatprep.subr.bf16.mxu0 %v4268_v35  ;;  %4048 = vmatpush3.bf16.msra.mxu1 %v4269_v32  ;;  %v1773_v62 = vld [vmem:[%s4797_s29 + $0x70] sm:$0xff]  ;;  %v2364_v63 = vld [vmem:[%s4802_s23 + $0x78] sm:$0xff]  ;;  %v2333_v1 = vld [vmem:[#allocation3 + $0x28] sm:$0xff] }
 0x19b   : > { %4049 = vmatprep.subr.bf16.mxu1 %v4271_v36  ;;  %v2363_v0 = vld [vmem:[%s4802_s23 + $0x70] sm:$0xff]  ;;  %v4935_v7 = vld [vmem:[%s5735_s8] ss:$0 sm:$0xff]  ;;  %v2334_v9 = vld [vmem:[#allocation3 + $0x68] sm:$0xff]  ;;  %s5817_s23 = sld [smem:[#allocation33_spill]] }
 0x19c   : > { %4018 = vmatpush3.bf16.msra.mxu0 %v4268_v35  ;;  %v1743_v2 = vld [vmem:[#allocation2 + $0x30] sm:$0xff]  ;;  %v4940_v8 = vld [vmem:[%s5736_s9] ss:$0 sm:$0xff]  ;;  %v1746_v17 = vld [vmem:[#allocation2 + $0x18] sm:$0xff] }
 0x19d   : > { %1802 = vperm.xlu1 %4262, %v1764_v27   ;;  %1797 = vperm.xlu0 %4261, %v1763_v29   ;;  %v1744_v10 = vld [vmem:[#allocation2] sm:$0xff]  ;;  %v1745_v18 = vld [vmem:[#allocation2 + $0x58] sm:$0xff]  ;;  %v2335_v30 = vld [vmem:[#allocation3 + $0x10] sm:$0xff] }
 0x19e   : > { %4019 = vmatprep.subr.bf16.mxu0 %v4270_v39  ;;  %4050 = vmatpush3.bf16.msra.mxu1 %v4271_v36  ;;  %v2336_v29 = vld [vmem:[#allocation3 + $0x40] sm:$0xff] }
 0x19f   : > { %4051 = vmatprep.subr.bf16.mxu1 %v4273_v40 }
 0x1a0   : > { %4020 = vmatpush3.bf16.msra.mxu0 %v4270_v39 }
 0x1a1   : > { %2392 = vperm.xlu1 %4262, %v2354_v33   ;;  %2387 = vperm.xlu0 %4261, %v2353_v34  }
 0x1a2   : > { %4021 = vmatprep.subr.bf16.mxu0 %v4272_v43  ;;  %4052 = vmatpush3.bf16.msra.mxu1 %v4273_v40 }
 0x1a3   : > { %4053 = vmatprep.subr.bf16.mxu1 %v4275_v44 }
 0x1a4   : > { %4022 = vmatpush3.bf16.msra.mxu0 %v4272_v43 }
 0x1a5   : > { %1812 = vperm.xlu1 %4262, %v1766_v37   ;;  %1807 = vperm.xlu0 %4261, %v1765_v38  }
 0x1a6   : > { %4023 = vmatprep.subr.bf16.mxu0 %v4274_v47  ;;  %4054 = vmatpush3.bf16.msra.mxu1 %v4275_v44 }
 0x1a7   : > { %4055 = vmatprep.subr.bf16.mxu1 %v4277_v50 }
 0x1a8   : > { %4024 = vmatpush3.bf16.msra.mxu0 %v4274_v47 }
 0x1a9   : > { %2402 = vperm.xlu1 %4262, %v2356_v41   ;;  %2397 = vperm.xlu0 %4261, %v2355_v42   ;;  %v1748_v41 = vld [vmem:[#allocation2 + $0x68] sm:$0xff]  ;;  %v1747_v42 = vld [vmem:[#allocation2 + $0x50] sm:$0xff] }
 0x1aa   : > { %4025 = vmatprep.subr.bf16.mxu0 %v4276_v51  ;;  %4056 = vmatpush3.bf16.msra.mxu1 %v4277_v50 }
 0x1ab   : > { %4057 = vmatprep.subr.bf16.mxu1 %v4278_v54 }
 0x1ac   : > { %4026 = vmatpush3.bf16.msra.mxu0 %v4276_v51 }
 0x1ad   : > { %1822 = vperm.xlu1 %4262, %v1768_v45   ;;  %1817 = vperm.xlu0 %4261, %v1767_v46  }
 0x1ae   : > { %4058 = vmatpush3.bf16.msra.mxu1 %v4278_v54 }
 0x1b1   : > { %2412 = vperm.xlu1 %4262, %v2358_v48   ;;  %2407 = vperm.xlu0 %4261, %v2357_v49  }
 0x1b5   : > { %1832 = vperm.xlu1 %4262, %v1770_v52   ;;  %1827 = vperm.xlu0 %4261, %v1769_v53   ;;  %v2338_v52 = vld [vmem:[#allocation3 + $0x30] sm:$0xff]  ;;  %v2337_v53 = vld [vmem:[#allocation3 + $0x48] sm:$0xff] }
 0x1b9   : > { %2422 = vperm.xlu1 %4262, %v2360_v55   ;;  %2417 = vperm.xlu0 %4261, %v2359_v56  }
 0x1bd   : > { %1842 = vperm.xlu1 %4262, %v1772_v57   ;;  %1837 = vperm.xlu0 %4261, %v1771_v58  }
 0x1c1   : > { %2432 = vperm.xlu1 %4262, %v2362_v59   ;;  %2427 = vperm.xlu0 %4261, %v2361_v60  }
 0x1c5   : > { %1852 = vperm.xlu1 %4262, %v1774_v61   ;;  %1847 = vperm.xlu0 %4261, %v1773_v62  }
 0x1c9   : > { %2442 = vperm.xlu1 %4262, %v2364_v63   ;;  %2437 = vperm.xlu0 %4261, %v2363_v0   ;;  %v1750_v63 = vld [vmem:[#allocation2 + $0x48] sm:$0xff] }
 0x1ca   : > { %v1749_v0 = vld [vmem:[#allocation2 + $0x8] sm:$0xff] }
 0x208   : > { %v2368_v3 = vpop.permute.xlu1 %2367  ;;  %v1778_v4 = vpop.permute.xlu0 %1777 }
 0x209   : > { %v2445_v5 = vmul.f32 %v2368_v3, %v2333_v1  ;;  %v1855_v6 = vmul.f32 %v1778_v4, %v1743_v2 }
 0x20b   : > { %v1878_v13 = vadd.f32 %v4935_v7, %v1855_v6  ;;  %v2468_v14 = vadd.f32 %v4940_v8, %v2445_v5 }
 0x20c   : > { %v2373_v11 = vpop.permute.xlu1 %2372  ;;  %v1783_v12 = vpop.permute.xlu0 %1782 }
 0x20d   : > { %v2446_v15 = vmul.f32 %v2373_v11, %v2334_v9  ;;  %v1856_v16 = vmul.f32 %v1783_v12, %v1744_v10  ;;  %v1894_v23 = vmax.f32 %v1878_v13, 0.0  ;;  %v2484_v24 = vmax.f32 %v2468_v14, 0.0  ;;  %v2340_v12 = vld [vmem:[#allocation3 + $0x38] sm:$0xff]  ;;  %v2339_v13 = vld [vmem:[#allocation3 + $0x70] sm:$0xff] }
 0x20f   : > { %v1879_v19 = vadd.f32 %v4935_v7, %v1856_v16  ;;  %v2469_v20 = vadd.f32 %v4940_v8, %v2446_v15 }
 0x210   : > { %v1793_v21 = vpop.permute.xlu1 %1792  ;;  %v1788_v22 = vpop.permute.xlu0 %1787 }
 0x211   : > { %v1858_v25 = vmul.f32 %v1793_v21, %v1746_v17  ;;  %v1857_v26 = vmul.f32 %v1788_v22, %v1745_v18  ;;  %v1895_v27 = vmax.f32 %v1879_v19, 0.0  ;;  %v2485_v28 = vmax.f32 %v2469_v20, 0.0 }
 0x213   : > { %v1881_v31 = vadd.f32 %v4935_v7, %v1858_v25  ;;  %v1880_v32 = vadd.f32 %v4935_v7, %v1857_v26  ;;  %v1910_v33 = vpack.c.bf16 %v1895_v27, %v1894_v23  ;;  %v2500_v34 = vpack.c.bf16 %v2485_v28, %v2484_v24  ;;  %v1752_v23 = vld [vmem:[#allocation2 + $0x20] sm:$0xff] }
 0x214   : > { %v2383_v35 = vpop.permute.xlu1 %2382  ;;  %v2378_v36 = vpop.permute.xlu0 %2377  ;;  %v1751_v24 = vld [vmem:[#allocation2 + $0x40] sm:$0xff] }
 0x215   : > { %v1897_v37 = vmax.f32 %v1881_v31, 0.0  ;;  %v1896_v38 = vmax.f32 %v1880_v32, 0.0  ;;  %v2448_v39 = vmul.f32 %v2383_v35, %v2336_v29  ;;  %v2447_v40 = vmul.f32 %v2378_v36, %v2335_v30  ;;  %4027 = vmatprep.mubr.bf16.mxu0 %v1910_v33  ;;  %4059 = vmatprep.mubr.bf16.mxu1 %v2500_v34  ;;  %v2342_v34 = vld [vmem:[#allocation3 + $0x78] sm:$0xff]  ;;  %v2341_v35 = vld [vmem:[#allocation3 + $0x20] sm:$0xff] }
 0x217   : > { %v2471_v43 = vadd.f32 %v4940_v8, %v2448_v39  ;;  %v2470_v44 = vadd.f32 %v4940_v8, %v2447_v40  ;;  %v1911_v45 = vpack.c.bf16 %v1897_v37, %v1896_v38 }
 0x218   : > { %v1803_v46 = vpop.permute.xlu1 %1802  ;;  %v1798_v47 = vpop.permute.xlu0 %1797 }
 0x219   : > { %v2487_v48 = vmax.f32 %v2471_v43, 0.0  ;;  %v2486_v49 = vmax.f32 %v2470_v44, 0.0  ;;  %v1860_v50 = vmul.f32 %v1803_v46, %v1748_v41  ;;  %v1859_v51 = vmul.f32 %v1798_v47, %v1747_v42  ;;  %4028 = vmatmul.mubr.bf16.vlgmr.msra.gmra.mxu0 %v1911_v45  ;;  %v1754_v45 = vld [vmem:[#allocation2 + $0x38] sm:$0xff]  ;;  %v1753_v46 = vld [vmem:[#allocation2 + $0x10] sm:$0xff] }
 0x21b   : > { %v1883_v54 = vadd.f32 %v4935_v7, %v1860_v50  ;;  %v1882_v55 = vadd.f32 %v4935_v7, %v1859_v51  ;;  %v2501_v56 = vpack.c.bf16 %v2487_v48, %v2486_v49 }
 0x21c   : > { %v2393_v57 = vpop.permute.xlu1 %2392  ;;  %v2388_v58 = vpop.permute.xlu0 %2387 }
 0x21d   : > { %v1899_v59 = vmax.f32 %v1883_v54, 0.0  ;;  %v1898_v60 = vmax.f32 %v1882_v55, 0.0  ;;  %v2450_v61 = vmul.f32 %v2393_v57, %v2338_v52  ;;  %v2449_v62 = vmul.f32 %v2388_v58, %v2337_v53  ;;  %4060 = vmatmul.mubr.bf16.vlgmr.msra.gmra.mxu1 %v2501_v56  ;;  %v2344_v56 = vld [vmem:[#allocation3 + $0x58] sm:$0xff] }
 0x21e   : > { %v2343_v57 = vld [vmem:[#allocation3 + $0x18] sm:$0xff] }
 0x21f   : > { %v2473_v1 = vadd.f32 %v4940_v8, %v2450_v61  ;;  %v2472_v2 = vadd.f32 %v4940_v8, %v2449_v62  ;;  %v1912_v3 = vpack.c.bf16 %v1899_v59, %v1898_v60 }
 0x220   : > { %v1813_v4 = vpop.permute.xlu1 %1812  ;;  %v1808_v5 = vpop.permute.xlu0 %1807 }
 0x221   : > { %v2489_v6 = vmax.f32 %v2473_v1, 0.0  ;;  %v2488_v9 = vmax.f32 %v2472_v2, 0.0  ;;  %v1862_v10 = vmul.f32 %v1813_v4, %v1750_v63  ;;  %v1861_v11 = vmul.f32 %v1808_v5, %v1749_v0  ;;  %4031 = vmatprep.mubr.bf16.mxu0 %v1912_v3  ;;  %v1756_v3 = vld [vmem:[#allocation2 + $0x70] sm:$0xff]  ;;  %v1755_v4 = vld [vmem:[#allocation2 + $0x60] sm:$0xff] }
 0x223   : > { %v1885_v14 = vadd.f32 %v4935_v7, %v1862_v10  ;;  %v1884_v15 = vadd.f32 %v4935_v7, %v1861_v11  ;;  %v2502_v16 = vpack.c.bf16 %v2489_v6, %v2488_v9 }
 0x224   : > { %v2403_v17 = vpop.permute.xlu1 %2402  ;;  %v2398_v18 = vpop.permute.xlu0 %2397 }
 0x225   : > { %v1901_v19 = vmax.f32 %v1885_v14, 0.0  ;;  %v1900_v20 = vmax.f32 %v1884_v15, 0.0  ;;  %v2452_v21 = vmul.f32 %v2403_v17, %v2340_v12  ;;  %v2451_v22 = vmul.f32 %v2398_v18, %v2339_v13  ;;  %4063 = vmatprep.mubr.bf16.mxu1 %v2502_v16  ;;  %v2346_v16 = vld [vmem:[#allocation3 + $0x8] sm:$0xff]  ;;  %v2345_v17 = vld [vmem:[#allocation3] sm:$0xff] }
 0x227   : > { %v2475_v25 = vadd.f32 %v4940_v8, %v2452_v21  ;;  %v2474_v26 = vadd.f32 %v4940_v8, %v2451_v22  ;;  %v1913_v27 = vpack.c.bf16 %v1901_v19, %v1900_v20 }
 0x228   : > { %v1823_v28 = vpop.permute.xlu1 %1822  ;;  %v1818_v29 = vpop.permute.xlu0 %1817 }
 0x229   : > { %v2491_v30 = vmax.f32 %v2475_v25, 0.0  ;;  %v2490_v31 = vmax.f32 %v2474_v26, 0.0  ;;  %v1864_v32 = vmul.f32 %v1823_v28, %v1752_v23  ;;  %v1863_v33 = vmul.f32 %v1818_v29, %v1751_v24  ;;  %4032 = vmatmul.mubr.bf16.gmra.mxu0 %v1913_v27  ;;  %v1758_v27 = vld [vmem:[#allocation2 + $0x28] sm:$0xff]  ;;  %v1757_v28 = vld [vmem:[#allocation2 + $0x78] sm:$0xff] }
 0x22b   : > { %v1887_v36 = vadd.f32 %v4935_v7, %v1864_v32  ;;  %v1886_v37 = vadd.f32 %v4935_v7, %v1863_v33  ;;  %v2503_v38 = vpack.c.bf16 %v2491_v30, %v2490_v31 }
 0x22c   : > { %v2413_v39 = vpop.permute.xlu1 %2412  ;;  %v2408_v40 = vpop.permute.xlu0 %2407 }
 0x22d   : > { %v1903_v41 = vmax.f32 %v1887_v36, 0.0  ;;  %v1902_v42 = vmax.f32 %v1886_v37, 0.0  ;;  %v2454_v43 = vmul.f32 %v2413_v39, %v2342_v34  ;;  %v2453_v44 = vmul.f32 %v2408_v40, %v2341_v35  ;;  %4064 = vmatmul.mubr.bf16.gmra.mxu1 %v2503_v38  ;;  %v2348_v38 = vld [vmem:[#allocation3 + $0x50] sm:$0xff]  ;;  %v2347_v39 = vld [vmem:[#allocation3 + $0x60] sm:$0xff] }
 0x22f   : > { %v2477_v47 = vadd.f32 %v4940_v8, %v2454_v43  ;;  %v2476_v48 = vadd.f32 %v4940_v8, %v2453_v44  ;;  %v1914_v49 = vpack.c.bf16 %v1903_v41, %v1902_v42 }
 0x230   : > { %v1833_v50 = vpop.permute.xlu1 %1832  ;;  %v1828_v51 = vpop.permute.xlu0 %1827 }
 0x231   : > { %v2493_v52 = vmax.f32 %v2477_v47, 0.0  ;;  %v2492_v53 = vmax.f32 %v2476_v48, 0.0  ;;  %v1866_v54 = vmul.f32 %v1833_v50, %v1754_v45  ;;  %v1865_v55 = vmul.f32 %v1828_v51, %v1753_v46  ;;  %4035 = vmatprep.mubr.bf16.mxu0 %v1914_v49 }
 0x233   : > { %v1889_v58 = vadd.f32 %v4935_v7, %v1866_v54  ;;  %v1888_v59 = vadd.f32 %v4935_v7, %v1865_v55  ;;  %v2504_v60 = vpack.c.bf16 %v2493_v52, %v2492_v53 }
 0x234   : > { %v2423_v61 = vpop.permute.xlu1 %2422  ;;  %v2418_v62 = vpop.permute.xlu0 %2417 }
 0x235   : > { %v1905_v63 = vmax.f32 %v1889_v58, 0.0  ;;  %v1904_v0 = vmax.f32 %v1888_v59, 0.0  ;;  %v2456_v1 = vmul.f32 %v2423_v61, %v2344_v56  ;;  %v2455_v2 = vmul.f32 %v2418_v62, %v2343_v57  ;;  %4067 = vmatprep.mubr.bf16.mxu1 %v2504_v60 }
 0x237   : > { %v2479_v5 = vadd.f32 %v4940_v8, %v2456_v1  ;;  %v2478_v6 = vadd.f32 %v4940_v8, %v2455_v2  ;;  %v1915_v9 = vpack.c.bf16 %v1905_v63, %v1904_v0 }
 0x238   : > { %v1843_v10 = vpop.permute.xlu1 %1842  ;;  %v1838_v11 = vpop.permute.xlu0 %1837 }
 0x239   : > { %v2495_v12 = vmax.f32 %v2479_v5, 0.0  ;;  %v2494_v13 = vmax.f32 %v2478_v6, 0.0  ;;  %v1868_v14 = vmul.f32 %v1843_v10, %v1756_v3  ;;  %v1867_v15 = vmul.f32 %v1838_v11, %v1755_v4  ;;  %4036 = vmatmul.mubr.bf16.gmra.mxu0 %v1915_v9 }
 0x23b   : > { %v1891_v18 = vadd.f32 %v4935_v7, %v1868_v14  ;;  %v1890_v19 = vadd.f32 %v4935_v7, %v1867_v15  ;;  %v2505_v20 = vpack.c.bf16 %v2495_v12, %v2494_v13 }
 0x23c   : > { %v2433_v21 = vpop.permute.xlu1 %2432  ;;  %v2428_v22 = vpop.permute.xlu0 %2427 }
 0x23d   : > { %v1907_v23 = vmax.f32 %v1891_v18, 0.0  ;;  %v1906_v24 = vmax.f32 %v1890_v19, 0.0  ;;  %v2458_v25 = vmul.f32 %v2433_v21, %v2346_v16  ;;  %v2457_v26 = vmul.f32 %v2428_v22, %v2345_v17  ;;  %4068 = vmatmul.mubr.bf16.gmra.mxu1 %v2505_v20 }
 0x23f   : > { %v2481_v29 = vadd.f32 %v4940_v8, %v2458_v25  ;;  %v2480_v30 = vadd.f32 %v4940_v8, %v2457_v26  ;;  %v1916_v31 = vpack.c.bf16 %v1907_v23, %v1906_v24 }
 0x240   : > { %v1853_v32 = vpop.permute.xlu1 %1852  ;;  %v1848_v33 = vpop.permute.xlu0 %1847 }
 0x241   : > { %v2497_v34 = vmax.f32 %v2481_v29, 0.0  ;;  %v2496_v35 = vmax.f32 %v2480_v30, 0.0  ;;  %v1870_v36 = vmul.f32 %v1853_v32, %v1758_v27  ;;  %v1869_v37 = vmul.f32 %v1848_v33, %v1757_v28  ;;  %4039 = vmatprep.mubr.bf16.mxu0 %v1916_v31 }
 0x243   : > { %v1893_v40 = vadd.f32 %v4935_v7, %v1870_v36  ;;  %v1892_v41 = vadd.f32 %v4935_v7, %v1869_v37  ;;  %v2506_v42 = vpack.c.bf16 %v2497_v34, %v2496_v35  ;;  %v4977_v7 = vld [vmem:[%s5738_s11] ss:$0 sm:$0xff] }
 0x244   : > { %v2443_v43 = vpop.permute.xlu1 %2442  ;;  %v2438_v44 = vpop.permute.xlu0 %2437 }
 0x245   : > { %v1909_v45 = vmax.f32 %v1893_v40, 0.0  ;;  %v1908_v46 = vmax.f32 %v1892_v41, 0.0  ;;  %v2460_v47 = vmul.f32 %v2443_v43, %v2348_v38  ;;  %v2459_v48 = vmul.f32 %v2438_v44, %v2347_v39  ;;  %4071 = vmatprep.mubr.bf16.mxu1 %v2506_v42 }
 0x247   : > { %v2483_v49 = vadd.f32 %v4940_v8, %v2460_v47  ;;  %v2482_v50 = vadd.f32 %v4940_v8, %v2459_v48  ;;  %v1917_v51 = vpack.c.bf16 %v1909_v45, %v1908_v46  ;;  %v4985_v8 = vld [vmem:[%s5742_s15] ss:$0 sm:$0xff] }
 0x249   : > { %v2499_v52 = vmax.f32 %v2483_v49, 0.0  ;;  %v2498_v53 = vmax.f32 %v2482_v50, 0.0  ;;  %4040 = vmatmul.mubr.bf16.gmra.mxu0 %v1917_v51 }
 0x24b   : > { %v2507_v54 = vpack.c.bf16 %v2499_v52, %v2498_v53 }
 0x24d   : > { %4072 = vmatmul.mubr.bf16.gmra.mxu1 %v2507_v54 }
 0x2d9   : > { %v4029_v55 = vpop.f32.mrf.mxu0 }
 0x2da   : > { %v4980_v56 = vadd.f32 %v4029_v55, %v4977_v7 }
 0x2db   : > { %v2023_v57 = vpop.f32.mrf.mxu0 }
 0x2dc   : > { %v4988_v58 = vadd.f32 %v4977_v7, %v2023_v57  ;;  %2092 = vadd.xlane.f32.xlu1 %v4980_v56 }
 0x2dd   : > { %v4030_v59 = vpop.f32.mrf.mxu0  ;;  %v4061_v60 = vpop.f32.mrf.mxu1 }
 0x2de   : > { %v4992_v61 = vadd.f32 %v4061_v60, %v4985_v8  ;;  %2088 = vadd.xlane.f32.xlu0 %v4988_v58  ;;  %v5004_v2 = vadd.f32 %v4030_v59, %v4977_v7 }
 0x2df   : > { %v2026_v62 = vpop.f32.mrf.mxu0  ;;  %v2613_v63 = vpop.f32.mrf.mxu1 }
 0x2e0   : > { %v4996_v0 = vadd.f32 %v4985_v8, %v2613_v63  ;;  %2682 = vadd.xlane.f32.xlu1 %v4992_v61  ;;  %v5000_v1 = vadd.f32 %v4977_v7, %v2026_v62 }
 0x2e1   : > { %v4062_v3 = vpop.f32.mrf.mxu1 }
 0x2e2   : > { %2678 = vadd.xlane.f32.xlu0 %v4996_v0  ;;  %v5009_v4 = vadd.f32 %v4062_v3, %v4985_v8 }
 0x2e3   : > { %v2616_v5 = vpop.f32.mrf.mxu1 }
 0x2e4   : > { %2090 = vadd.xlane.f32.xlu1 %v5000_v1  ;;  %v5016_v11 = vadd.f32 %v4985_v8, %v2616_v5 }
 0x2e6   : > { %2094 = vadd.xlane.f32.xlu0 %v5004_v2 }
 0x2e9   : > { %v4033_v6 = vpop.f32.mrf.mxu0 }
 0x2ea   : > { %v5012_v9 = vadd.f32 %v4033_v6, %v4977_v7  ;;  %2684 = vadd.xlane.f32.xlu0 %v5009_v4 }
 0x2eb   : > { %v2039_v10 = vpop.f32.mrf.mxu0 }
 0x2ec   : > { %2100 = vadd.xlane.f32.xlu1 %v5012_v9  ;;  %v5028_v18 = vadd.f32 %v4977_v7, %v2039_v10 }
 0x2ed   : > { %v4034_v12 = vpop.f32.mrf.mxu0  ;;  %v4065_v13 = vpop.f32.mrf.mxu1 }
 0x2ee   : > { %v5020_v14 = vadd.f32 %v4065_v13, %v4985_v8  ;;  %2680 = vadd.xlane.f32.xlu0 %v5016_v11  ;;  %v5024_v16 = vadd.f32 %v4034_v12, %v4977_v7 }
 0x2ef   : > { %v2629_v15 = vpop.f32.mrf.mxu1  ;;  %v2042_v20 = vpop.f32.mrf.mxu0 }
 0x2f0   : > { %2690 = vadd.xlane.f32.xlu1 %v5020_v14  ;;  %v5036_v21 = vadd.f32 %v4985_v8, %v2629_v15  ;;  %v5040_v22 = vadd.f32 %v4977_v7, %v2042_v20 }
 0x2f1   : > { %v4066_v17 = vpop.f32.mrf.mxu1 }
 0x2f2   : > { %2102 = vadd.xlane.f32.xlu0 %v5024_v16  ;;  %v5032_v19 = vadd.f32 %v4066_v17, %v4985_v8 }
 0x2f3   : > { %v2632_v23 = vpop.f32.mrf.mxu1 }
 0x2f4   : > { %2096 = vadd.xlane.f32.xlu1 %v5028_v18  ;;  %v5048_v27 = vadd.f32 %v4985_v8, %v2632_v23 }
 0x2f6   : > { %2692 = vadd.xlane.f32.xlu0 %v5032_v19 }
 0x2f8   : > { %2686 = vadd.xlane.f32.xlu1 %v5036_v21 }
 0x2f9   : > { %v4037_v24 = vpop.f32.mrf.mxu0 }
 0x2fa   : > { %v5044_v25 = vadd.f32 %v4037_v24, %v4977_v7  ;;  %2098 = vadd.xlane.f32.xlu0 %v5040_v22 }
 0x2fb   : > { %v2055_v26 = vpop.f32.mrf.mxu0 }
 0x2fc   : > { %2108 = vadd.xlane.f32.xlu1 %v5044_v25  ;;  %v5060_v34 = vadd.f32 %v4977_v7, %v2055_v26 }
 0x2fd   : > { %v4038_v28 = vpop.f32.mrf.mxu0  ;;  %v4069_v29 = vpop.f32.mrf.mxu1 }
 0x2fe   : > { %v5052_v30 = vadd.f32 %v4069_v29, %v4985_v8  ;;  %2688 = vadd.xlane.f32.xlu0 %v5048_v27  ;;  %v5056_v32 = vadd.f32 %v4038_v28, %v4977_v7 }
 0x2ff   : > { %v2645_v31 = vpop.f32.mrf.mxu1  ;;  %v2058_v36 = vpop.f32.mrf.mxu0 }
 0x300   : > { %2698 = vadd.xlane.f32.xlu1 %v5052_v30  ;;  %v5068_v37 = vadd.f32 %v4985_v8, %v2645_v31  ;;  %v5072_v38 = vadd.f32 %v4977_v7, %v2058_v36 }
 0x301   : > { %v4070_v33 = vpop.f32.mrf.mxu1 }
 0x302   : > { %2110 = vadd.xlane.f32.xlu0 %v5056_v32  ;;  %v5064_v35 = vadd.f32 %v4070_v33, %v4985_v8 }
 0x303   : > { %v2648_v39 = vpop.f32.mrf.mxu1 }
 0x304   : > { %2104 = vadd.xlane.f32.xlu1 %v5060_v34  ;;  %v5080_v43 = vadd.f32 %v4985_v8, %v2648_v39 }
 0x306   : > { %2700 = vadd.xlane.f32.xlu0 %v5064_v35 }
 0x308   : > { %2694 = vadd.xlane.f32.xlu1 %v5068_v37 }
 0x309   : > { %v4041_v40 = vpop.f32.mrf.mxu0 }
 0x30a   : > { %v5076_v41 = vadd.f32 %v4041_v40, %v4977_v7  ;;  %2106 = vadd.xlane.f32.xlu0 %v5072_v38 }
 0x30b   : > { %v2071_v42 = vpop.f32.mrf.mxu0 }
 0x30c   : > { %2116 = vadd.xlane.f32.xlu1 %v5076_v41  ;;  %v5084_v46 = vadd.f32 %v4977_v7, %v2071_v42 }
 0x30d   : > { %v4042_v44 = vpop.f32.mrf.mxu0  ;;  %v4073_v45 = vpop.f32.mrf.mxu1 }
 0x30e   : > { %2696 = vadd.xlane.f32.xlu0 %v5080_v43  ;;  %v5088_v48 = vadd.f32 %v4042_v44, %v4977_v7  ;;  %v5100_v54 = vadd.f32 %v4073_v45, %v4985_v8 }
 0x30f   : > { %v2661_v47 = vpop.f32.mrf.mxu1  ;;  %v2074_v49 = vpop.f32.mrf.mxu0 }
 0x310   : > { %2112 = vadd.xlane.f32.xlu1 %v5084_v46  ;;  %v5092_v51 = vadd.f32 %v4985_v8, %v2661_v47  ;;  %v5096_v52 = vadd.f32 %v4977_v7, %v2074_v49 }
 0x311   : > { %v4074_v50 = vpop.f32.mrf.mxu1 }
 0x312   : > { %2118 = vadd.xlane.f32.xlu0 %v5088_v48  ;;  %v5109_v57 = vadd.f32 %v4074_v50, %v4985_v8 }
 0x313   : > { %v2664_v53 = vpop.f32.mrf.mxu1 }
 0x314   : > { %2702 = vadd.xlane.f32.xlu1 %v5092_v51  ;;  %v5104_v55 = vadd.f32 %v4985_v8, %v2664_v53 }
 0x316   : > { %2114 = vadd.xlane.f32.xlu0 %v5096_v52 }
 0x318   : > { %2706 = vadd.xlane.f32.xlu1 %v5100_v54 }
 0x31a   : > { %2704 = vadd.xlane.f32.xlu0 %v5104_v55 }
 0x31e   : > { %2708 = vadd.xlane.f32.xlu0 %v5109_v57 }
 0x365   : > { %v2093_v7 = vpop.xlane.xlu1 %2092 }
 0x366   : > { %v2123_v59 = vmul.f32 0.0078125, %v2093_v7 }
 0x367   : > { %v2089_v60 = vpop.xlane.xlu0 %2088 }
 0x368   : > { %v5113_v62 = vsub.f32 %v4980_v56, %v2123_v59  ;;  %v2121_v3 = vmul.f32 0.0078125, %v2089_v60 }
 0x369   : > { %v2683_v63 = vpop.xlane.xlu1 %2682 }
 0x36a   : > { %v2712_v5 = vmul.f32 0.0078125, %v2683_v63  ;;  %v2155_v6 = vmul.f32 %v5113_v62, %v5113_v62  ;;  %v5121_v8 = vsub.f32 %v4988_v58, %v2121_v3 }
 0x36b   : > { %v2679_v10 = vpop.xlane.xlu0 %2678 }
 0x36c   : > { %v5118_v12 = vsub.f32 %v4992_v61, %v2712_v5  ;;  %2173 = vadd.xlane.f32.xlu1 %v2155_v6  ;;  %v2710_v13 = vmul.f32 0.0078125, %v2679_v10  ;;  %v2153_v61 = vmul.f32 %v5121_v8, %v5121_v8  ;;  %v4279_v10 = vld [vmem:[%s5812_s6 + $0x38] sm:$0xff]  }
 0x36d   : > { %v2091_v20 = vpop.xlane.xlu1 %2090  ;;  %4107 = vmatprep.subr.bf16.mxu1 %v4279_v10 }
 0x36e   : > { %v2744_v15 = vmul.f32 %v5118_v12, %v5118_v12  ;;  %v5126_v23 = vsub.f32 %v4996_v0, %v2710_v13  ;;  %v2122_v58 = vmul.f32 0.0078125, %v2091_v20  ;;  %4108 = vmatpush3.bf16.msra.mxu1 %v4279_v10 }
 0x36f   : > { %v2095_v56 = vpop.xlane.xlu0 %2094 }
 0x370   : > { %v2124_v17 = vmul.f32 0.0078125, %v2095_v56  ;;  %2762 = vadd.xlane.f32.xlu1 %v2744_v15  ;;  %v2742_v0 = vmul.f32 %v5126_v23, %v5126_v23  ;;  %v5141_v39 = vsub.f32 %v5000_v1, %v2122_v58  ;;  %v4281_v58 = vld [vmem:[%s5813_s3 + $0x30] sm:$0xff]  }
 0x371   : > { %4109 = vmatprep.subr.bf16.mxu1 %v4281_v58 }
 0x372   : > { %v5129_v24 = vsub.f32 %v5004_v2, %v2124_v17  ;;  %v2154_v53 = vmul.f32 %v5141_v39, %v5141_v39  ;;  %4110 = vmatpush3.bf16.msra.mxu1 %v4281_v58 }
 0x373   : > { %v2685_v26 = vpop.xlane.xlu0 %2684 }
 0x374   : > { %v2713_v28 = vmul.f32 0.0078125, %v2685_v26  ;;  %2169 = vadd.xlane.f32.xlu1 %v2153_v61  ;;  %v2156_v29 = vmul.f32 %v5129_v24, %v5129_v24  ;;  %v4280_v26 = vld [vmem:[%s5814_s12 + $0x38] sm:$0xff]  }
 0x375   : > { %v2101_v31 = vpop.xlane.xlu1 %2100  ;;  %4075 = vmatprep.subr.bf16.mxu0 %v4280_v26 }
 0x376   : > { %v5136_v33 = vsub.f32 %v5009_v4, %v2713_v28  ;;  %v2127_v36 = vmul.f32 0.0078125, %v2101_v31  ;;  %2175 = vadd.xlane.f32.xlu0 %v2156_v29  ;;  %4076 = vmatpush3.bf16.msra.mxu0 %v4280_v26 }
 0x377   : > { %v2681_v2 = vpop.xlane.xlu0 %2680 }
 0x378   : > { %v5144_v40 = vsub.f32 %v5012_v9, %v2127_v36  ;;  %v2711_v42 = vmul.f32 0.0078125, %v2681_v2  ;;  %2758 = vadd.xlane.f32.xlu1 %v2742_v0  ;;  %v2745_v44 = vmul.f32 %v5136_v33, %v5136_v33 }
 0x379   : > { %v2691_v45 = vpop.xlane.xlu1 %2690 }
 0x37a   : > { %v2716_v4 = vmul.f32 0.0078125, %v2691_v45  ;;  %2764 = vadd.xlane.f32.xlu0 %v2745_v44  ;;  %v2159_v47 = vmul.f32 %v5144_v40, %v5144_v40  ;;  %v5151_v50 = vsub.f32 %v5016_v11, %v2711_v42  ;;  %v4282_v42 = vld [vmem:[%s5814_s12 + $0x30] sm:$0xff]  }
 0x37b   : > { %v2103_v49 = vpop.xlane.xlu0 %2102  ;;  %4077 = vmatprep.subr.bf16.mxu0 %v4282_v42 }
 0x37c   : > { %v5154_v1 = vsub.f32 %v5020_v14, %v2716_v4  ;;  %v2128_v9 = vmul.f32 0.0078125, %v2103_v49  ;;  %2181 = vadd.xlane.f32.xlu1 %v2159_v47  ;;  %v2743_v5 = vmul.f32 %v5151_v50, %v5151_v50  ;;  %4078 = vmatpush3.bf16.msra.mxu0 %v4282_v42 }
 0x37d   : > { %v2097_v7 = vpop.xlane.xlu1 %2096 }
 0x37e   : > { %v2125_v59 = vmul.f32 0.0078125, %v2097_v7  ;;  %2171 = vadd.xlane.f32.xlu0 %v2154_v53  ;;  %v2748_v60 = vmul.f32 %v5154_v1, %v5154_v1  ;;  %v5161_v3 = vsub.f32 %v5024_v16, %v2128_v9  ;;  %v4284_v7 = vld [vmem:[%s5814_s12 + $0x28] sm:$0xff]  }
 0x37f   : > { %v2693_v63 = vpop.xlane.xlu0 %2692  ;;  %4079 = vmatprep.subr.bf16.mxu0 %v4284_v7 }
 0x380   : > { %v5164_v11 = vsub.f32 %v5028_v18, %v2125_v59  ;;  %v2717_v14 = vmul.f32 0.0078125, %v2693_v63  ;;  %2770 = vadd.xlane.f32.xlu1 %v2748_v60  ;;  %v2160_v20 = vmul.f32 %v5161_v3, %v5161_v3  ;;  %4080 = vmatpush3.bf16.msra.mxu0 %v4284_v7 }
 0x381   : > { %v2687_v6 = vpop.xlane.xlu1 %2686 }
 0x382   : > { %v2714_v13 = vmul.f32 0.0078125, %v2687_v6  ;;  %2760 = vadd.xlane.f32.xlu0 %v2743_v5  ;;  %v2157_v15 = vmul.f32 %v5164_v11, %v5164_v11  ;;  %v5174_v18 = vsub.f32 %v5032_v19, %v2717_v14 }
 0x383   : > { %v2099_v16 = vpop.xlane.xlu0 %2098 }
 0x384   : > { %v5177_v56 = vsub.f32 %v5036_v21, %v2714_v13  ;;  %v2126_v17 = vmul.f32 0.0078125, %v2099_v16  ;;  %2177 = vadd.xlane.f32.xlu1 %v2157_v15  ;;  %v2749_v0 = vmul.f32 %v5174_v18, %v5174_v18  ;;  %v4286_v13 = vld [vmem:[%s5814_s12 + $0x20] sm:$0xff]  }
 0x385   : > { %v2109_v61 = vpop.xlane.xlu1 %2108  ;;  %4081 = vmatprep.subr.bf16.mxu0 %v4286_v13 }
 0x386   : > { %v2131_v19 = vmul.f32 0.0078125, %v2109_v61  ;;  %2183 = vadd.xlane.f32.xlu0 %v2160_v20  ;;  %v2746_v21 = vmul.f32 %v5177_v56, %v5177_v56  ;;  %v5190_v29 = vsub.f32 %v5040_v22, %v2126_v17  ;;  %v4283_v22 = vld [vmem:[%s5813_s3 + $0x28] sm:$0xff]   ;;  %4082 = vmatpush3.bf16.msra.mxu0 %v4286_v13 }
 0x387   : > { %v2689_v28 = vpop.xlane.xlu0 %2688  ;;  %4111 = vmatprep.subr.bf16.mxu1 %v4283_v22 }
 0x388   : > { %v5193_v31 = vsub.f32 %v5044_v25, %v2131_v19  ;;  %v2715_v36 = vmul.f32 0.0078125, %v2689_v28  ;;  %2766 = vadd.xlane.f32.xlu1 %v2746_v21  ;;  %v2158_v9 = vmul.f32 %v5190_v29, %v5190_v29  ;;  %4112 = vmatpush3.bf16.msra.mxu1 %v4283_v22  ;;  %v4288_v19 = vld [vmem:[%s5814_s12 + $0x18] sm:$0xff]  }
 0x389   : > { %v2699_v2 = vpop.xlane.xlu1 %2698  ;;  %4083 = vmatprep.subr.bf16.mxu0 %v4288_v19 }
 0x38a   : > { %v2720_v44 = vmul.f32 0.0078125, %v2699_v2  ;;  %2772 = vadd.xlane.f32.xlu0 %v2749_v0  ;;  %v2163_v25 = vmul.f32 %v5193_v31, %v5193_v31  ;;  %v5206_v4 = vsub.f32 %v5048_v27, %v2715_v36  ;;  %v4285_v27 = vld [vmem:[%s5813_s3 + $0x20] sm:$0xff]   ;;  %4084 = vmatpush3.bf16.msra.mxu0 %v4288_v19 }
 0x38b   : > { %v2111_v45 = vpop.xlane.xlu0 %2110  ;;  %4113 = vmatprep.subr.bf16.mxu1 %v4285_v27 }
 0x38c   : > { %v5209_v47 = vsub.f32 %v5052_v30, %v2720_v44  ;;  %v2132_v49 = vmul.f32 0.0078125, %v2111_v45  ;;  %2189 = vadd.xlane.f32.xlu1 %v2163_v25  ;;  %v2747_v6 = vmul.f32 %v5206_v4, %v5206_v4  ;;  %4114 = vmatpush3.bf16.msra.mxu1 %v4285_v27  ;;  %v4290_v44 = vld [vmem:[%s5814_s12 + $0x10] sm:$0xff]  }
 0x38d   : > { %v2105_v53 = vpop.xlane.xlu1 %2104  ;;  %4085 = vmatprep.subr.bf16.mxu0 %v4290_v44 }
 0x38e   : > { %v2129_v59 = vmul.f32 0.0078125, %v2105_v53  ;;  %2179 = vadd.xlane.f32.xlu0 %v2158_v9  ;;  %v2752_v30 = vmul.f32 %v5209_v47, %v5209_v47  ;;  %v5222_v63 = vsub.f32 %v5056_v32, %v2132_v49  ;;  %v4287_v32 = vld [vmem:[%s5813_s3 + $0x18] sm:$0xff]   ;;  %4086 = vmatpush3.bf16.msra.mxu0 %v4290_v44 }
 0x38f   : > { %v2701_v60 = vpop.xlane.xlu0 %2700  ;;  %4115 = vmatprep.subr.bf16.mxu1 %v4287_v32 }
 0x390   : > { %v5225_v14 = vsub.f32 %v5060_v34, %v2129_v59  ;;  %v2721_v5 = vmul.f32 0.0078125, %v2701_v60  ;;  %2778 = vadd.xlane.f32.xlu1 %v2752_v30  ;;  %v2164_v26 = vmul.f32 %v5222_v63, %v5222_v63  ;;  %4116 = vmatpush3.bf16.msra.mxu1 %v4287_v32  ;;  %v4292_v59 = vld [vmem:[%s5814_s12 + $0x8] sm:$0xff]  }
 0x391   : > { %v2695_v10 = vpop.xlane.xlu1 %2694  ;;  %4087 = vmatprep.subr.bf16.mxu0 %v4292_v59 }
 0x392   : > { %v2718_v15 = vmul.f32 0.0078125, %v2695_v10  ;;  %2768 = vadd.xlane.f32.xlu0 %v2747_v6  ;;  %v2161_v34 = vmul.f32 %v5225_v14, %v5225_v14  ;;  %v5238_v17 = vsub.f32 %v5064_v35, %v2721_v5  ;;  %v4289_v35 = vld [vmem:[%s5813_s3 + $0x10] sm:$0xff]   ;;  %4088 = vmatpush3.bf16.msra.mxu0 %v4292_v59 }
 0x393   : > { %v2107_v16 = vpop.xlane.xlu0 %2106  ;;  %4117 = vmatprep.subr.bf16.mxu1 %v4289_v35 }
 0x394   : > { %v5241_v20 = vsub.f32 %v5068_v37, %v2718_v15  ;;  %v2130_v61 = vmul.f32 0.0078125, %v2107_v16  ;;  %2185 = vadd.xlane.f32.xlu1 %v2161_v34  ;;  %v2753_v42 = vmul.f32 %v5238_v17, %v5238_v17  ;;  %4118 = vmatpush3.bf16.msra.mxu1 %v4289_v35 }
 0x395   : > { %v2117_v58 = vpop.xlane.xlu1 %2116 }
 0x396   : > { %v2135_v21 = vmul.f32 0.0078125, %v2117_v58  ;;  %2191 = vadd.xlane.f32.xlu0 %v2164_v26  ;;  %v2750_v37 = vmul.f32 %v5241_v20, %v5241_v20  ;;  %v5254_v36 = vsub.f32 %v5072_v38, %v2130_v61  ;;  %v4291_v38 = vld [vmem:[%s5813_s3 + $0x8] sm:$0xff]  }
 0x397   : > { %v2697_v28 = vpop.xlane.xlu0 %2696  ;;  %4119 = vmatprep.subr.bf16.mxu1 %v4291_v38 }
 0x398   : > { %v5257_v0 = vsub.f32 %v5076_v41, %v2135_v21  ;;  %v2719_v2 = vmul.f32 0.0078125, %v2697_v28  ;;  %2774 = vadd.xlane.f32.xlu1 %v2750_v37  ;;  %v2162_v7 = vmul.f32 %v5254_v36, %v5254_v36  ;;  %4120 = vmatpush3.bf16.msra.mxu1 %v4291_v38 }
 0x399   : > { %v2113_v22 = vpop.xlane.xlu1 %2112 }
 0x39a   : > { %v2133_v25 = vmul.f32 0.0078125, %v2113_v22  ;;  %2780 = vadd.xlane.f32.xlu0 %v2753_v42  ;;  %v2167_v41 = vmul.f32 %v5257_v0, %v5257_v0  ;;  %v5270_v49 = vsub.f32 %v5080_v43, %v2719_v2  ;;  %v4293_v43 = vld [vmem:[%s5813_s3] sm:$0xff]  }
 0x39b   : > { %v2119_v45 = vpop.xlane.xlu0 %2118  ;;  %4121 = vmatprep.subr.bf16.mxu1 %v4293_v43 }
 0x39c   : > { %v5273_v9 = vsub.f32 %v5084_v46, %v2133_v25  ;;  %v2136_v53 = vmul.f32 0.0078125, %v2119_v45  ;;  %2197 = vadd.xlane.f32.xlu1 %v2167_v41  ;;  %v2751_v13 = vmul.f32 %v5270_v49, %v5270_v49  ;;  %4122 = vmatpush3.bf16.msra.mxu1 %v4293_v43 }
 0x39d   : > { %v2703_v27 = vpop.xlane.xlu1 %2702 }
 0x39e   : > { %v2722_v30 = vmul.f32 0.0078125, %v2703_v27  ;;  %2187 = vadd.xlane.f32.xlu0 %v2162_v7  ;;  %v2165_v46 = vmul.f32 %v5273_v9, %v5273_v9  ;;  %v5286_v5 = vsub.f32 %v5088_v48, %v2136_v53  ;;  %v4294_v48 = vld [vmem:[%s5814_s12] sm:$0xff]  }
 0x39f   : > { %v2115_v60 = vpop.xlane.xlu0 %2114  ;;  %4089 = vmatprep.subr.bf16.mxu0 %v4294_v48 }
 0x3a0   : > { %v5289_v6 = vsub.f32 %v5092_v51, %v2722_v30  ;;  %v2134_v10 = vmul.f32 0.0078125, %v2115_v60  ;;  %2193 = vadd.xlane.f32.xlu1 %v2165_v46  ;;  %v2168_v58 = vmul.f32 %v5286_v5, %v5286_v5  ;;  %4090 = vmatpush3.bf16.msra.mxu0 %v4294_v48 }
 0x3a1   : > { %v2707_v32 = vpop.xlane.xlu1 %2706 }
 0x3a2   : > { %v2724_v15 = vmul.f32 0.0078125, %v2707_v32  ;;  %2776 = vadd.xlane.f32.xlu0 %v2751_v13  ;;  %v2754_v34 = vmul.f32 %v5289_v6, %v5289_v6  ;;  %v5299_v51 = vsub.f32 %v5096_v52, %v2134_v10 }
 0x3a3   : > { %v2705_v16 = vpop.xlane.xlu0 %2704 }
 0x3a4   : > { %v5302_v61 = vsub.f32 %v5100_v54, %v2724_v15  ;;  %v2723_v26 = vmul.f32 0.0078125, %v2705_v16  ;;  %2782 = vadd.xlane.f32.xlu1 %v2754_v34  ;;  %v2166_v54 = vmul.f32 %v5299_v51, %v5299_v51 }
 0x3a6   : > { %2199 = vadd.xlane.f32.xlu0 %v2168_v58  ;;  %v2756_v19 = vmul.f32 %v5302_v61, %v5302_v61  ;;  %v5309_v21 = vsub.f32 %v5104_v55, %v2723_v26 }
 0x3a7   : > { %v2709_v35 = vpop.xlane.xlu0 %2708 }
 0x3a8   : > { %v2725_v52 = vmul.f32 0.0078125, %v2709_v35  ;;  %2786 = vadd.xlane.f32.xlu1 %v2756_v19  ;;  %v2755_v28 = vmul.f32 %v5309_v21, %v5309_v21 }
 0x3aa   : > { %2195 = vadd.xlane.f32.xlu0 %v2166_v54  ;;  %v5314_v37 = vsub.f32 %v5109_v57, %v2725_v52 }
 0x3ac   : > { %v2757_v2 = vmul.f32 %v5314_v37, %v5314_v37 }
 0x3ae   : > { %2784 = vadd.xlane.f32.xlu0 %v2755_v28 }
 0x3b2   : > { %2788 = vadd.xlane.f32.xlu0 %v2757_v2 }
 0x3f5   : > { %v2174_v42 = vpop.xlane.xlu1 %2173 }
 0x3f6   : > { %v2203_v22 = vmul.f32 0.0078125, %v2174_v42 }
 0x3f8   : > { %v2219_v25 = vadd.f32 1e-05, %v2203_v22 }
 0x3f9   : > { %v2763_v55 = vpop.xlane.xlu1 %2762 }
 0x3fa   : > { %v2792_v7 = vmul.f32 0.0078125, %v2763_v55  ;;  %4295 = vrsqrt.f32 %v2219_v25 }
 0x3fc   : > { %v2808_v46 = vadd.f32 1e-05, %v2792_v7 }
 0x3fd   : > { %v2170_v44 = vpop.xlane.xlu1 %2169 }
 0x3fe   : > { %v2201_v38 = vmul.f32 0.0078125, %v2170_v44 }
 0x3ff   : > { %v2176_v41 = vpop.xlane.xlu0 %2175 }
 0x400   : > { %v2217_v45 = vadd.f32 1e-05, %v2201_v38  ;;  %v2204_v53 = vmul.f32 0.0078125, %v2176_v41 }
 0x401   : > { %v2759_v57 = vpop.xlane.xlu1 %2758 }
 0x402   : > { %v2220_v27 = vadd.f32 1e-05, %v2204_v53  ;;  %v2790_v59 = vmul.f32 0.0078125, %v2759_v57  ;;  %4297 = vrsqrt.f32 %v2217_v45 }
 0x403   : > { %v2765_v43 = vpop.xlane.xlu0 %2764 }
 0x404   : > { %v2793_v30 = vmul.f32 0.0078125, %v2765_v43  ;;  %4299 = vrsqrt.f32 %v2220_v27  ;;  %v2806_v13 = vadd.f32 1e-05, %v2790_v59 }
 0x405   : > { %v2182_v60 = vpop.xlane.xlu1 %2181  ;;  %4301 = vrsqrt.f32 %v2808_v46 }
 0x406   : > { %v2809_v10 = vadd.f32 1e-05, %v2793_v30  ;;  %v2207_v52 = vmul.f32 0.0078125, %v2182_v60 }
 0x407   : > { %v2172_v32 = vpop.xlane.xlu0 %2171  ;;  %v4296_v28 = vpop.eup %4295 }
 0x408   : > { %v2202_v15 = vmul.f32 0.0078125, %v2172_v32  ;;  %4303 = vrsqrt.f32 %v2809_v10  ;;  %v2223_v41 = vadd.f32 1e-05, %v2207_v52  ;;  %v2251_v7 = vmul.f32 %v4296_v28, %v5113_v62  ;;  %v5326_v10 = vld [vmem:[%s5815_s0] ss:$0 sm:$0xff] }
 0x409   : > { %v2771_v34 = vpop.xlane.xlu1 %2770  ;;  %4305 = vrsqrt.f32 %v2806_v13 }
 0x40a   : > { %v2218_v48 = vadd.f32 1e-05, %v2202_v15  ;;  %v2796_v22 = vmul.f32 0.0078125, %v2771_v34 }
 0x40b   : > { %v2761_v16 = vpop.xlane.xlu0 %2760 }
 0x40c   : > { %4307 = vrsqrt.f32 %v2218_v48  ;;  %v2791_v26 = vmul.f32 0.0078125, %v2761_v16  ;;  %v2812_v59 = vadd.f32 1e-05, %v2796_v22 }
 0x40d   : > { %v2178_v58 = vpop.xlane.xlu1 %2177 }
 0x40e   : > { %v2807_v19 = vadd.f32 1e-05, %v2791_v26  ;;  %v2205_v35 = vmul.f32 0.0078125, %v2178_v58 }
 0x40f   : > { %v2184_v54 = vpop.xlane.xlu0 %2183  ;;  %v4298_v55 = vpop.eup %4297 }
 0x410   : > { %4309 = vrsqrt.f32 %v2807_v19  ;;  %v2221_v2 = vadd.f32 1e-05, %v2205_v35  ;;  %v2208_v42 = vmul.f32 0.0078125, %v2184_v54  ;;  %v2249_v30 = vmul.f32 %v4298_v55, %v5121_v8  ;;  %v5335_v35 = vld [vmem:[%s5816_s21] ss:$0 sm:$0xff] }
 0x411   : > { %v2767_v44 = vpop.xlane.xlu1 %2766  ;;  %v4300_v38 = vpop.eup %4299  ;;  %v2273_v8 = vmul.f32 %v5326_v10, %v2251_v7 }
 0x412   : > { %v2224_v25 = vadd.f32 1e-05, %v2208_v42  ;;  %v2794_v45 = vmul.f32 0.0078125, %v2767_v44  ;;  %4311 = vrsqrt.f32 %v2221_v2  ;;  %v2252_v27 = vmul.f32 %v4300_v38, %v5129_v24  ;;  %v4302_v46 = vpop.eup %4301 }
 0x413   : > { %v2773_v53 = vpop.xlane.xlu0 %2772  ;;  %v2271_v16 = vmul.f32 %v5326_v10, %v2249_v30  ;;  %v2840_v54 = vmul.f32 %v4302_v46, %v5118_v12 }
 0x414   : > { %v2797_v57 = vmul.f32 0.0078125, %v2773_v53  ;;  %4313 = vrsqrt.f32 %v2224_v25  ;;  %v2810_v32 = vadd.f32 1e-05, %v2794_v45  ;;  %v2274_v26 = vmul.f32 %v5326_v10, %v2252_v27 }
 0x415   : > { %v2190_v43 = vpop.xlane.xlu1 %2189  ;;  %v4304_v13 = vpop.eup %4303  ;;  %4315 = vrsqrt.f32 %v2223_v41  ;;  %v2293_v38 = vadd.f32 %v5335_v35, %v2271_v16 }
 0x416   : > { %v2813_v60 = vadd.f32 1e-05, %v2797_v57  ;;  %v4306_v15 = vpop.eup %4305  ;;  %4317 = vrsqrt.f32 %v2812_v59  ;;  %v2841_v58 = vmul.f32 %v4304_v13, %v5136_v33  ;;  %v5344_v33 = vld [vmem:[%s5817_s23] ss:$0 sm:$0xff]  ;;  %v2296_v12 = vadd.f32 %v5335_v35, %v2274_v26 }
 0x417   : > { %v2180_v62 = vpop.xlane.xlu0 %2179  ;;  %v2838_v2 = vmul.f32 %v4306_v15, %v5126_v23  ;;  %v2211_v53 = vmul.f32 0.0078125, %v2190_v43  ;;  %v2862_v59 = vmul.f32 %v5344_v33, %v2840_v54  ;;  %v5357_v15 = vld [vmem:[%s5818_s17] ss:$0 sm:$0xff] }
 0x418   : > { %v2206_v34 = vmul.f32 0.0078125, %v2180_v62  ;;  %4319 = vrsqrt.f32 %v2813_v60  ;;  %v2863_v45 = vmul.f32 %v5344_v33, %v2841_v58 }
 0x419   : > { %v4308_v48 = vpop.eup %4307  ;;  %v2779_v24 = vpop.xlane.xlu1 %2778  ;;  %4321 = vrsqrt.f32 %v2810_v32  ;;  %v2860_v27 = vmul.f32 %v5344_v33, %v2838_v2 }
 0x41a   : > { %v2222_v19 = vadd.f32 1e-05, %v2206_v34  ;;  %v2250_v52 = vmul.f32 %v4308_v48, %v5141_v39  ;;  %v2295_v39 = vadd.f32 %v5335_v35, %v2273_v8  ;;  %v2885_v16 = vadd.f32 %v5357_v15, %v2863_v45 }
 0x41b   : > { %v2769_v28 = vpop.xlane.xlu0 %2768  ;;  %v2227_v8 = vadd.f32 1e-05, %v2211_v53  ;;  %v2800_v26 = vmul.f32 0.0078125, %v2779_v24 }
 0x41c   : > { %4323 = vrsqrt.f32 %v2222_v19  ;;  %v2795_v42 = vmul.f32 0.0078125, %v2769_v28  ;;  %v2272_v55 = vmul.f32 %v5326_v10, %v2250_v52  ;;  %v2310_v62 = vpack.c.bf16 %v2296_v12, %v2295_v39 }
 0x41d   : > { %v4310_v22 = vpop.eup %4309  ;;  %v2186_v44 = vpop.xlane.xlu1 %2185  ;;  %v2882_v19 = vadd.f32 %v5357_v15, %v2860_v27 }
 0x41e   : > { %v2811_v25 = vadd.f32 1e-05, %v2795_v42  ;;  %v2209_v41 = vmul.f32 0.0078125, %v2186_v44  ;;  %v2294_v23 = vadd.f32 %v5335_v35, %v2272_v55  ;;  %v2839_v57 = vmul.f32 %v4310_v22, %v5151_v50 }
 0x41f   : > { %v2192_v7 = vpop.xlane.xlu0 %2191  ;;  %v4312_v13 = vpop.eup %4311  ;;  %v2884_v42 = vadd.f32 %v5357_v15, %v2862_v59 }
 0x420   : > { %4325 = vrsqrt.f32 %v2811_v25  ;;  %v2225_v30 = vadd.f32 1e-05, %v2209_v41  ;;  %v2212_v46 = vmul.f32 0.0078125, %v2192_v7  ;;  %v2309_v60 = vpack.c.bf16 %v2294_v23, %v2293_v38 }
 0x421   : > { %v2775_v32 = vpop.xlane.xlu1 %2774  ;;  %v2861_v43 = vmul.f32 %v5344_v33, %v2839_v57  ;;  %v4314_v34 = vpop.eup %4313  ;;  %v2253_v44 = vmul.f32 %v4312_v13, %v5164_v11  ;;  %v2899_v12 = vpack.c.bf16 %v2885_v16, %v2884_v42  ;;  %v2816_v41 = vadd.f32 1e-05, %v2800_v26 }
 0x422   : > { %v2228_v50 = vadd.f32 1e-05, %v2212_v46  ;;  %v2798_v48 = vmul.f32 0.0078125, %v2775_v32  ;;  %4123 = vmatprep.mubr.bf16.mxu1 %v2309_v60  ;;  %v4316_v54 = vpop.eup %4315  ;;  %4327 = vrsqrt.f32 %v2225_v30  ;;  %v2256_v38 = vmul.f32 %v4314_v34, %v5161_v3 }
 0x423   : > { %4124 = vmatmul.mubr.bf16.vlgmr.msra.gmra.mxu1 %v2310_v62  ;;  %v2781_v58 = vpop.xlane.xlu0 %2780  ;;  %v2883_v52 = vadd.f32 %v5357_v15, %v2861_v43  ;;  %v4318_v24 = vpop.eup %4317  ;;  %v2255_v45 = vmul.f32 %v4316_v54, %v5144_v40  ;;  %v2275_v11 = vmul.f32 %v5326_v10, %v2253_v44 }
 0x424   : > { %v2814_v28 = vadd.f32 1e-05, %v2798_v48  ;;  %v2801_v2 = vmul.f32 0.0078125, %v2781_v58  ;;  %4329 = vrsqrt.f32 %v2228_v50  ;;  %v2278_v3 = vmul.f32 %v5326_v10, %v2256_v38 }
 0x425   : > { %v2198_v55 = vpop.xlane.xlu1 %2197  ;;  %v2898_v22 = vpack.c.bf16 %v2883_v52, %v2882_v19  ;;  %v4320_v25 = vpop.eup %4319  ;;  %4331 = vrsqrt.f32 %v2227_v8  ;;  %v2277_v32 = vmul.f32 %v5326_v10, %v2255_v45  ;;  %v2844_v50 = vmul.f32 %v4318_v24, %v5154_v1 }
 0x426   : > { %v2817_v39 = vadd.f32 1e-05, %v2801_v2  ;;  %v4322_v53 = vpop.eup %4321  ;;  %4333 = vrsqrt.f32 %v2814_v28  ;;  %v2845_v60 = vmul.f32 %v4320_v25, %v5174_v18  ;;  %v2215_v13 = vmul.f32 0.0078125, %v2198_v55 }
 0x427   : > { %4091 = vmatprep.mubr.bf16.mxu0 %v2898_v22  ;;  %v2188_v23 = vpop.xlane.xlu0 %2187  ;;  %v2842_v62 = vmul.f32 %v4322_v53, %v5177_v56  ;;  %v2300_v18 = vadd.f32 %v5335_v35, %v2278_v3  ;;  %v2299_v28 = vadd.f32 %v5335_v35, %v2277_v32  ;;  %v2866_v22 = vmul.f32 %v5344_v33, %v2844_v50 }
 0x428   : > { %4092 = vmatmul.mubr.bf16.vlgmr.msra.gmra.mxu0 %v2899_v12  ;;  %v2210_v7 = vmul.f32 0.0078125, %v2188_v23  ;;  %4335 = vrsqrt.f32 %v2817_v39  ;;  %v2867_v52 = vmul.f32 %v5344_v33, %v2845_v60  ;;  %v2231_v56 = vadd.f32 1e-05, %v2215_v13 }
 0x429   : > { %v4324_v57 = vpop.eup %4323  ;;  %v2194_v27 = vpop.xlane.xlu1 %2193  ;;  %4337 = vrsqrt.f32 %v2816_v41  ;;  %v2864_v1 = vmul.f32 %v5344_v33, %v2842_v62  ;;  %v2312_v24 = vpack.c.bf16 %v2300_v18, %v2299_v28 }
 0x42a   : > { %v2226_v59 = vadd.f32 1e-05, %v2210_v7  ;;  %v2213_v30 = vmul.f32 0.0078125, %v2194_v27  ;;  %v2254_v46 = vmul.f32 %v4324_v57, %v5190_v29  ;;  %v2297_v29 = vadd.f32 %v5335_v35, %v2275_v11 }
 0x42b   : > { %v2777_v40 = vpop.xlane.xlu0 %2776  ;;  %v2886_v53 = vadd.f32 %v5357_v15, %v2864_v1  ;;  %v2888_v11 = vadd.f32 %v5357_v15, %v2866_v22 }
 0x42c   : > { %4339 = vrsqrt.f32 %v2226_v59  ;;  %v2799_v43 = vmul.f32 0.0078125, %v2777_v40  ;;  %v2276_v34 = vmul.f32 %v5326_v10, %v2254_v46  ;;  %v2229_v16 = vadd.f32 1e-05, %v2213_v30 }
 0x42d   : > { %v4326_v48 = vpop.eup %4325  ;;  %v2783_v8 = vpop.xlane.xlu1 %2782 }
 0x42e   : > { %v2815_v26 = vadd.f32 1e-05, %v2799_v43  ;;  %v2802_v58 = vmul.f32 0.0078125, %v2783_v8  ;;  %v2298_v19 = vadd.f32 %v5335_v35, %v2276_v34  ;;  %v2843_v2 = vmul.f32 %v4326_v48, %v5206_v4 }
 0x42f   : > { %v2200_v54 = vpop.xlane.xlu0 %2199  ;;  %v4328_v44 = vpop.eup %4327  ;;  %v2889_v4 = vadd.f32 %v5357_v15, %v2867_v52 }
 0x430   : > { %4341 = vrsqrt.f32 %v2815_v26  ;;  %v2216_v42 = vmul.f32 0.0078125, %v2200_v54  ;;  %v2311_v55 = vpack.c.bf16 %v2298_v19, %v2297_v29  ;;  %v2865_v39 = vmul.f32 %v5344_v33, %v2843_v2 }
 0x431   : > { %4343 = vrsqrt.f32 %v2229_v16  ;;  %v2787_v38 = vpop.xlane.xlu1 %2786  ;;  %v4330_v12 = vpop.eup %4329  ;;  %v2818_v25 = vadd.f32 1e-05, %v2802_v58  ;;  %v2257_v30 = vmul.f32 %v4328_v44, %v5225_v14  ;;  %v2901_v32 = vpack.c.bf16 %v2889_v4, %v2888_v11 }
 0x432   : > { %v2232_v41 = vadd.f32 1e-05, %v2216_v42  ;;  %v2804_v23 = vmul.f32 0.0078125, %v2787_v38  ;;  %4127 = vmatprep.mubr.bf16.mxu1 %v2311_v55  ;;  %4345 = vrsqrt.f32 %v2231_v56  ;;  %v2887_v7 = vadd.f32 %v5357_v15, %v2865_v39  ;;  %v4332_v57 = vpop.eup %4331 }
 0x433   : > { %4128 = vmatmul.mubr.bf16.gmra.mxu1 %v2312_v24  ;;  %v2196_v45 = vpop.xlane.xlu0 %2195  ;;  %v4334_v3 = vpop.eup %4333  ;;  %v2260_v46 = vmul.f32 %v4330_v12, %v5222_v63  ;;  %v2259_v43 = vmul.f32 %v4332_v57, %v5193_v31  ;;  %v2279_v16 = vmul.f32 %v5326_v10, %v2257_v30 }
 0x434   : > { %4347 = vrsqrt.f32 %v2232_v41  ;;  %v2214_v27 = vmul.f32 0.0078125, %v2196_v45  ;;  %v2900_v59 = vpack.c.bf16 %v2887_v7, %v2886_v53  ;;  %v2820_v13 = vadd.f32 1e-05, %v2804_v23 }
 0x435   : > { %v4336_v60 = vpop.eup %4335  ;;  %4349 = vrsqrt.f32 %v2818_v25  ;;  %v2282_v14 = vmul.f32 %v5326_v10, %v2260_v46  ;;  %v2846_v18 = vmul.f32 %v4334_v3, %v5241_v20  ;;  %v2281_v31 = vmul.f32 %v5326_v10, %v2259_v43 }
 0x436   : > { %v2230_v40 = vadd.f32 1e-05, %v2214_v27  ;;  %4095 = vmatprep.mubr.bf16.mxu0 %v2900_v59  ;;  %v4338_v34 = vpop.eup %4337  ;;  %v2849_v63 = vmul.f32 %v4336_v60, %v5238_v17  ;;  %v2301_v54 = vadd.f32 %v5335_v35, %v2279_v16 }
 0x437   : > { %v2785_v62 = vpop.xlane.xlu0 %2784  ;;  %4096 = vmatmul.mubr.bf16.gmra.mxu0 %v2901_v32  ;;  %v2848_v58 = vmul.f32 %v4338_v34, %v5209_v47  ;;  %v2304_v17 = vadd.f32 %v5335_v35, %v2282_v14  ;;  %v2868_v42 = vmul.f32 %v5344_v33, %v2846_v18  ;;  %v2303_v47 = vadd.f32 %v5335_v35, %v2281_v31 }
 0x438   : > { %4351 = vrsqrt.f32 %v2230_v40  ;;  %v2803_v50 = vmul.f32 0.0078125, %v2785_v62  ;;  %v2871_v28 = vmul.f32 %v5344_v33, %v2849_v63 }
 0x439   : > { %v4340_v48 = vpop.eup %4339  ;;  %4353 = vrsqrt.f32 %v2820_v13  ;;  %v2870_v55 = vmul.f32 %v5344_v33, %v2848_v58  ;;  %v2314_v39 = vpack.c.bf16 %v2304_v17, %v2303_v47 }
 0x43a   : > { %v2819_v8 = vadd.f32 1e-05, %v2803_v50  ;;  %v2258_v29 = vmul.f32 %v4340_v48, %v5254_v36  ;;  %v2893_v12 = vadd.f32 %v5357_v15, %v2871_v28 }
 0x43b   : > { %v2789_v26 = vpop.xlane.xlu0 %2788  ;;  %v2892_v45 = vadd.f32 %v5357_v15, %v2870_v55 }
 0x43c   : > { %4355 = vrsqrt.f32 %v2819_v8  ;;  %v2805_v19 = vmul.f32 0.0078125, %v2789_v26  ;;  %v2280_v52 = vmul.f32 %v5326_v10, %v2258_v29 }
 0x43d   : > { %v4342_v56 = vpop.eup %4341  ;;  %v2903_v27 = vpack.c.bf16 %v2893_v12, %v2892_v45 }
 0x43e   : > { %v4344_v2 = vpop.eup %4343  ;;  %v2821_v36 = vadd.f32 1e-05, %v2805_v19  ;;  %v2302_v20 = vadd.f32 %v5335_v35, %v2280_v52  ;;  %v2847_v1 = vmul.f32 %v4342_v56, %v5270_v49  ;;  %v2890_v49 = vadd.f32 %v5357_v15, %v2868_v42 }
 0x43f   : > { %v4346_v22 = vpop.eup %4345  ;;  %v2261_v25 = vmul.f32 %v4344_v2, %v5273_v9 }
 0x440   : > { %4357 = vrsqrt.f32 %v2821_v36  ;;  %v2313_v44 = vpack.c.bf16 %v2302_v20, %v2301_v54  ;;  %v2869_v38 = vmul.f32 %v5344_v33, %v2847_v1  ;;  %v2263_v53 = vmul.f32 %v4346_v22, %v5257_v0 }
 0x441   : > { %v4348_v24 = vpop.eup %4347  ;;  %v2283_v11 = vmul.f32 %v5326_v10, %v2261_v25 }
 0x442   : > { %4131 = vmatprep.mubr.bf16.mxu1 %v2313_v44  ;;  %v2891_v41 = vadd.f32 %v5357_v15, %v2869_v38  ;;  %v2264_v23 = vmul.f32 %v4348_v24, %v5286_v5  ;;  %v4350_v4 = vpop.eup %4349  ;;  %v2285_v5 = vmul.f32 %v5326_v10, %v2263_v53 }
 0x443   : > { %4132 = vmatmul.mubr.bf16.gmra.mxu1 %v2314_v39  ;;  %v2850_v59 = vmul.f32 %v4350_v4, %v5289_v6  ;;  %v2305_v0 = vadd.f32 %v5335_v35, %v2283_v11 }
 0x444   : > { %v2902_v7 = vpack.c.bf16 %v2891_v41, %v2890_v49  ;;  %v2286_v9 = vmul.f32 %v5326_v10, %v2264_v23  ;;  %v2307_v6 = vadd.f32 %v5335_v35, %v2285_v5 }
 0x445   : > { %v4352_v57 = vpop.eup %4351  ;;  %v2872_v62 = vmul.f32 %v5344_v33, %v2850_v59 }
 0x446   : > { %4099 = vmatprep.mubr.bf16.mxu0 %v2902_v7  ;;  %v2262_v3 = vmul.f32 %v4352_v57, %v5299_v51  ;;  %v4354_v30 = vpop.eup %4353  ;;  %v2308_v13 = vadd.f32 %v5335_v35, %v2286_v9 }
 0x447   : > { %4100 = vmatmul.mubr.bf16.gmra.mxu0 %v2903_v27  ;;  %v2852_v51 = vmul.f32 %v4354_v30, %v5302_v61  ;;  %v2894_v48 = vadd.f32 %v5357_v15, %v2872_v62 }
 0x448   : > { %v2284_v46 = vmul.f32 %v5326_v10, %v2262_v3  ;;  %v2316_v10 = vpack.c.bf16 %v2308_v13, %v2307_v6 }
 0x449   : > { %v4356_v60 = vpop.eup %4355 }
 0x44a   : > { %v2306_v40 = vadd.f32 %v5335_v35, %v2284_v46  ;;  %v2851_v32 = vmul.f32 %v4356_v60, %v5309_v21  ;;  %v2874_v21 = vmul.f32 %v5344_v33, %v2852_v51 }
 0x44c   : > { %v2315_v43 = vpack.c.bf16 %v2306_v40, %v2305_v0  ;;  %v2873_v34 = vmul.f32 %v5344_v33, %v2851_v32  ;;  %v2896_v35 = vadd.f32 %v5357_v15, %v2874_v21 }
 0x44d   : > { %v4358_v50 = vpop.eup %4357 }
 0x44e   : > { %4135 = vmatprep.mubr.bf16.mxu1 %v2315_v43  ;;  %v2895_v16 = vadd.f32 %v5357_v15, %v2873_v34  ;;  %v2853_v14 = vmul.f32 %v4358_v50, %v5314_v37  ;;  %v5439_v37 = vld [vmem:[%s5819_s2] ss:$0 sm:$0xff] }
 0x44f   : > { %4136 = vmatmul.mubr.bf16.gmra.mxu1 %v2316_v10 }
 0x450   : > { %v2904_v63 = vpack.c.bf16 %v2895_v16, %v2894_v48  ;;  %v2875_v61 = vmul.f32 %v5344_v33, %v2853_v14 }
 0x452   : > { %4103 = vmatprep.mubr.bf16.mxu0 %v2904_v63  ;;  %v2897_v8 = vadd.f32 %v5357_v15, %v2875_v61 }
 0x454   : > { %v2905_v29 = vpack.c.bf16 %v2897_v8, %v2896_v35 }
 0x456   : > { %4104 = vmatmul.mubr.bf16.gmra.mxu0 %v2905_v29 }
 0x4e3   : > { %v4125_v18 = vpop.f32.mrf.mxu1 }
 0x4e5   : > { %v3149_v26 = vpop.f32.mrf.mxu1 }
 0x4e7   : > { %v4126_v19 = vpop.f32.mrf.mxu1 }
 0x4e8   : > { %v4093_v31 = vpop.f32.mrf.mxu0 }
 0x4e9   : > { %v3158_v58 = vadd.f32 %v4125_v18, %v4093_v31  ;;  %v3152_v15 = vpop.f32.mrf.mxu1 }
 0x4ea   : > { %v3004_v52 = vpop.f32.mrf.mxu0 }
 0x4eb   : > { %v3150_v56 = vadd.f32 %v3149_v26, %v3004_v52  ;;  %v5442_v33 = vadd.f32 %v5439_v37, %v3158_v58 }
 0x4ec   : > { %v4094_v54 = vpop.f32.mrf.mxu0 }
 0x4ed   : > { %v3161_v17 = vadd.f32 %v4126_v19, %v4094_v54  ;;  %3241 = vadd.xlane.f32.xlu1 %v5442_v33  ;;  %v5449_v20 = vadd.f32 %v5439_v37, %v3150_v56 }
 0x4ee   : > { %v3007_v28 = vpop.f32.mrf.mxu0 }
 0x4ef   : > { %v5446_v2 = vadd.f32 %v5439_v37, %v3161_v17  ;;  %v3153_v36 = vadd.f32 %v3152_v15, %v3007_v28 }
 0x4f1   : > { %3237 = vadd.xlane.f32.xlu1 %v5449_v20  ;;  %3243 = vadd.xlane.f32.xlu0 %v5446_v2  ;;  %v5454_v1 = vadd.f32 %v5439_v37, %v3153_v36 }
 0x4f3   : > { %v4129_v42 = vpop.f32.mrf.mxu1 }
 0x4f5   : > { %3239 = vadd.xlane.f32.xlu0 %v5454_v1  ;;  %v3165_v47 = vpop.f32.mrf.mxu1 }
 0x4f7   : > { %v4097_v55 = vpop.f32.mrf.mxu0  ;;  %v4130_v44 = vpop.f32.mrf.mxu1 }
 0x4f8   : > { %v3174_v22 = vadd.f32 %v4129_v42, %v4097_v55 }
 0x4f9   : > { %v3020_v38 = vpop.f32.mrf.mxu0  ;;  %v3168_v49 = vpop.f32.mrf.mxu1 }
 0x4fa   : > { %v5458_v24 = vadd.f32 %v5439_v37, %v3174_v22  ;;  %v3166_v39 = vadd.f32 %v3165_v47, %v3020_v38 }
 0x4fb   : > { %v4098_v12 = vpop.f32.mrf.mxu0 }
 0x4fc   : > { %v3177_v25 = vadd.f32 %v4130_v44, %v4098_v12  ;;  %3249 = vadd.xlane.f32.xlu1 %v5458_v24  ;;  %v5462_v23 = vadd.f32 %v5439_v37, %v3166_v39 }
 0x4fd   : > { %v3023_v41 = vpop.f32.mrf.mxu0 }
 0x4fe   : > { %v5465_v4 = vadd.f32 %v5439_v37, %v3177_v25  ;;  %v3169_v45 = vadd.f32 %v3168_v49, %v3023_v41 }
 0x500   : > { %3245 = vadd.xlane.f32.xlu1 %v5462_v23  ;;  %3251 = vadd.xlane.f32.xlu0 %v5465_v4  ;;  %v5470_v53 = vadd.f32 %v5439_v37, %v3169_v45 }
 0x503   : > { %v4133_v7 = vpop.f32.mrf.mxu1 }
 0x504   : > { %3247 = vadd.xlane.f32.xlu0 %v5470_v53 }
 0x505   : > { %v3181_v57 = vpop.f32.mrf.mxu1 }
 0x507   : > { %v4101_v27 = vpop.f32.mrf.mxu0  ;;  %v4134_v9 = vpop.f32.mrf.mxu1 }
 0x508   : > { %v3190_v11 = vadd.f32 %v4133_v7, %v4101_v27 }
 0x509   : > { %v3036_v3 = vpop.f32.mrf.mxu0  ;;  %v3184_v60 = vpop.f32.mrf.mxu1 }
 0x50a   : > { %v5474_v59 = vadd.f32 %v5439_v37, %v3190_v11  ;;  %v3182_v30 = vadd.f32 %v3181_v57, %v3036_v3 }
 0x50b   : > { %v4102_v5 = vpop.f32.mrf.mxu0 }
 0x50c   : > { %v3193_v46 = vadd.f32 %v4134_v9, %v4102_v5  ;;  %3257 = vadd.xlane.f32.xlu1 %v5474_v59  ;;  %v5478_v13 = vadd.f32 %v5439_v37, %v3182_v30 }
 0x50d   : > { %v3039_v0 = vpop.f32.mrf.mxu0 }
 0x50e   : > { %v5481_v40 = vadd.f32 %v5439_v37, %v3193_v46  ;;  %v3185_v32 = vadd.f32 %v3184_v60, %v3039_v0 }
 0x50f   : > { %v4137_v62 = vpop.f32.mrf.mxu1 }
 0x510   : > { %3253 = vadd.xlane.f32.xlu1 %v5478_v13  ;;  %3259 = vadd.xlane.f32.xlu0 %v5481_v40  ;;  %v5486_v51 = vadd.f32 %v5439_v37, %v3185_v32 }
 0x511   : > { %v3197_v6 = vpop.f32.mrf.mxu1 }
 0x513   : > { %v4138_v34 = vpop.f32.mrf.mxu1 }
 0x514   : > { %3255 = vadd.xlane.f32.xlu0 %v5486_v51 }
 0x515   : > { %v3200_v21 = vpop.f32.mrf.mxu1 }
 0x516   : > { %v4105_v43 = vpop.f32.mrf.mxu0 }
 0x517   : > { %v3206_v16 = vadd.f32 %v4137_v62, %v4105_v43 }
 0x518   : > { %v3052_v50 = vpop.f32.mrf.mxu0 }
 0x519   : > { %v3198_v10 = vadd.f32 %v3197_v6, %v3052_v50  ;;  %v5494_v35 = vadd.f32 %v5439_v37, %v3206_v16 }
 0x51a   : > { %v4106_v48 = vpop.f32.mrf.mxu0 }
 0x51b   : > { %v5490_v14 = vadd.f32 %v5439_v37, %v3198_v10  ;;  %v3209_v8 = vadd.f32 %v4138_v34, %v4106_v48 }
 0x51c   : > { %v3055_v63 = vpop.f32.mrf.mxu0 }
 0x51d   : > { %v3201_v61 = vadd.f32 %v3200_v21, %v3055_v63  ;;  %3261 = vadd.xlane.f32.xlu1 %v5490_v14  ;;  %v5502_v18 = vadd.f32 %v5439_v37, %v3209_v8 }
 0x51f   : > { %v5497_v29 = vadd.f32 %v5439_v37, %v3201_v61 }
 0x521   : > { %3265 = vadd.xlane.f32.xlu1 %v5494_v35  ;;  %3263 = vadd.xlane.f32.xlu0 %v5497_v29 }
 0x525   : > { %3267 = vadd.xlane.f32.xlu0 %v5502_v18 }
 0x576   : > { %v3242_v26 = vpop.xlane.xlu1 %3241 }
 0x577   : > { %v3271_v31 = vmul.f32 0.0078125, %v3242_v26 }
 0x579   : > { %v5506_v58 = vsub.f32 %v5442_v33, %v3271_v31 }
 0x57a   : > { %v3238_v19 = vpop.xlane.xlu1 %3237  ;;  %v3244_v52 = vpop.xlane.xlu0 %3243 }
 0x57b   : > { %v3269_v56 = vmul.f32 0.0078125, %v3238_v19  ;;  %v3272_v54 = vmul.f32 0.0078125, %v3244_v52  ;;  %v3303_v17 = vmul.f32 %v5506_v58, %v5506_v58 }
 0x57d   : > { %v5511_v15 = vsub.f32 %v5449_v20, %v3269_v56  ;;  %v5514_v37 = vsub.f32 %v5446_v2, %v3272_v54  ;;  %3321 = vadd.xlane.f32.xlu1 %v3303_v17 }
 0x57e   : > { %v3240_v28 = vpop.xlane.xlu0 %3239 }
 0x57f   : > { %v3270_v36 = vmul.f32 0.0078125, %v3240_v28  ;;  %v3301_v33 = vmul.f32 %v5511_v15, %v5511_v15  ;;  %v3304_v42 = vmul.f32 %v5514_v37, %v5514_v37 }
 0x581   : > { %v5521_v47 = vsub.f32 %v5454_v1, %v3270_v36  ;;  %3317 = vadd.xlane.f32.xlu1 %v3301_v33  ;;  %3323 = vadd.xlane.f32.xlu0 %v3304_v42 }
 0x583   : > { %v3302_v20 = vmul.f32 %v5521_v47, %v5521_v47 }
 0x585   : > { %3319 = vadd.xlane.f32.xlu0 %v3302_v20  ;;  %v3250_v2 = vpop.xlane.xlu1 %3249 }
 0x586   : > { %v3275_v55 = vmul.f32 0.0078125, %v3250_v2 }
 0x588   : > { %v5526_v22 = vsub.f32 %v5458_v24, %v3275_v55 }
 0x589   : > { %v3246_v44 = vpop.xlane.xlu1 %3245  ;;  %v3252_v38 = vpop.xlane.xlu0 %3251 }
 0x58a   : > { %v3273_v39 = vmul.f32 0.0078125, %v3246_v44  ;;  %v3276_v12 = vmul.f32 0.0078125, %v3252_v38  ;;  %v3307_v25 = vmul.f32 %v5526_v22, %v5526_v22  ;;  %v5588_v38 = vld [vmem:[%s5820_s19] ss:$0 sm:$0xff] }
 0x58c   : > { %v5531_v1 = vsub.f32 %v5462_v23, %v3273_v39  ;;  %v5534_v49 = vsub.f32 %v5465_v4, %v3276_v12  ;;  %3329 = vadd.xlane.f32.xlu1 %v3307_v25  ;;  %v5594_v25 = vld [vmem:[%s5821_s5] ss:$0 sm:$0xff] }
 0x58d   : > { %v3248_v41 = vpop.xlane.xlu0 %3247 }
 0x58e   : > { %v3274_v45 = vmul.f32 0.0078125, %v3248_v41  ;;  %v3305_v24 = vmul.f32 %v5531_v1, %v5531_v1  ;;  %v3308_v7 = vmul.f32 %v5534_v49, %v5534_v49 }
 0x590   : > { %v5541_v57 = vsub.f32 %v5470_v53, %v3274_v45  ;;  %3325 = vadd.xlane.f32.xlu1 %v3305_v24  ;;  %3331 = vadd.xlane.f32.xlu0 %v3308_v7 }
 0x592   : > { %v3306_v23 = vmul.f32 %v5541_v57, %v5541_v57 }
 0x594   : > { %3327 = vadd.xlane.f32.xlu0 %v3306_v23 }
 0x595   : > { %v3258_v4 = vpop.xlane.xlu1 %3257 }
 0x596   : > { %v3279_v27 = vmul.f32 0.0078125, %v3258_v4 }
 0x598   : > { %v5546_v11 = vsub.f32 %v5474_v59, %v3279_v27 }
 0x599   : > { %v3254_v9 = vpop.xlane.xlu1 %3253  ;;  %v3260_v3 = vpop.xlane.xlu0 %3259 }
 0x59a   : > { %v3277_v30 = vmul.f32 0.0078125, %v3254_v9  ;;  %v3280_v5 = vmul.f32 0.0078125, %v3260_v3  ;;  %v3311_v46 = vmul.f32 %v5546_v11, %v5546_v11 }
 0x59c   : > { %v5551_v53 = vsub.f32 %v5478_v13, %v3277_v30  ;;  %v5554_v60 = vsub.f32 %v5481_v40, %v3280_v5  ;;  %3337 = vadd.xlane.f32.xlu1 %v3311_v46 }
 0x59d   : > { %v3256_v0 = vpop.xlane.xlu0 %3255 }
 0x59e   : > { %v3278_v32 = vmul.f32 0.0078125, %v3256_v0  ;;  %v3309_v59 = vmul.f32 %v5551_v53, %v5551_v53  ;;  %v3312_v62 = vmul.f32 %v5554_v60, %v5554_v60 }
 0x5a0   : > { %v5561_v6 = vsub.f32 %v5486_v51, %v3278_v32  ;;  %3333 = vadd.xlane.f32.xlu1 %v3309_v59  ;;  %3339 = vadd.xlane.f32.xlu0 %v3312_v62 }
 0x5a2   : > { %v3310_v13 = vmul.f32 %v5561_v6, %v5561_v6 }
 0x5a4   : > { %3335 = vadd.xlane.f32.xlu0 %v3310_v13 }
 0x5a6   : > { %v3262_v40 = vpop.xlane.xlu1 %3261 }
 0x5a7   : > { %v3281_v43 = vmul.f32 0.0078125, %v3262_v40 }
 0x5a9   : > { %v5566_v34 = vsub.f32 %v5490_v14, %v3281_v43 }
 0x5aa   : > { %v3266_v50 = vpop.xlane.xlu1 %3265  ;;  %v3264_v10 = vpop.xlane.xlu0 %3263 }
 0x5ab   : > { %v3283_v48 = vmul.f32 0.0078125, %v3266_v50  ;;  %v3282_v16 = vmul.f32 0.0078125, %v3264_v10  ;;  %v3313_v21 = vmul.f32 %v5566_v34, %v5566_v34 }
 0x5ad   : > { %v5571_v51 = vsub.f32 %v5494_v35, %v3283_v48  ;;  %v5574_v63 = vsub.f32 %v5497_v29, %v3282_v16  ;;  %3341 = vadd.xlane.f32.xlu1 %v3313_v21 }
 0x5ae   : > { %v3268_v61 = vpop.xlane.xlu0 %3267 }
 0x5af   : > { %v3284_v8 = vmul.f32 0.0078125, %v3268_v61  ;;  %v3315_v14 = vmul.f32 %v5571_v51, %v5571_v51  ;;  %v3314_v26 = vmul.f32 %v5574_v63, %v5574_v63 }
 0x5b1   : > { %v5581_v31 = vsub.f32 %v5502_v18, %v3284_v8  ;;  %3345 = vadd.xlane.f32.xlu1 %v3315_v14  ;;  %3343 = vadd.xlane.f32.xlu0 %v3314_v26 }
 0x5b3   : > { %v3316_v35 = vmul.f32 %v5581_v31, %v5581_v31 }
 0x5b5   : > { %3347 = vadd.xlane.f32.xlu0 %v3316_v35 }
 0x606   : > { %v3322_v29 = vpop.xlane.xlu1 %3321 }
 0x607   : > { %v3351_v19 = vmul.f32 0.0078125, %v3322_v29 }
 0x609   : > { %v3367_v52 = vadd.f32 1e-05, %v3351_v19 }
 0x60a   : > { %v3318_v56 = vpop.xlane.xlu1 %3317  ;;  %v3324_v54 = vpop.xlane.xlu0 %3323 }
 0x60b   : > { %4359 = vrsqrt.f32 %v3367_v52  ;;  %v3349_v17 = vmul.f32 0.0078125, %v3318_v56  ;;  %v3352_v28 = vmul.f32 0.0078125, %v3324_v54 }
 0x60d   : > { %v3365_v36 = vadd.f32 1e-05, %v3349_v17  ;;  %v3368_v33 = vadd.f32 1e-05, %v3352_v28 }
 0x60e   : > { %v3320_v42 = vpop.xlane.xlu0 %3319 }
 0x60f   : > { %4361 = vrsqrt.f32 %v3365_v36  ;;  %v3350_v18 = vmul.f32 0.0078125, %v3320_v42 }
 0x610   : > { %4363 = vrsqrt.f32 %v3368_v33 }
 0x611   : > { %v3366_v20 = vadd.f32 1e-05, %v3350_v18 }
 0x613   : > { %4365 = vrsqrt.f32 %v3366_v20 }
 0x615   : > { %v3330_v2 = vpop.xlane.xlu1 %3329 }
 0x616   : > { %v3355_v55 = vmul.f32 0.0078125, %v3330_v2 }
 0x618   : > { %v4360_v44 = vpop.eup %4359  ;;  %v3371_v12 = vadd.f32 1e-05, %v3355_v55 }
 0x619   : > { %v3399_v39 = vmul.f32 %v4360_v44, %v5506_v58  ;;  %v3326_v41 = vpop.xlane.xlu1 %3325  ;;  %v3332_v45 = vpop.xlane.xlu0 %3331 }
 0x61a   : > { %4367 = vrsqrt.f32 %v3371_v12  ;;  %v3353_v7 = vmul.f32 0.0078125, %v3326_v41  ;;  %v3356_v23 = vmul.f32 0.0078125, %v3332_v45 }
 0x61b   : > { %v3421_v24 = vmul.f32 %v5588_v38, %v3399_v39 }
 0x61c   : > { %v4362_v4 = vpop.eup %4361  ;;  %v3369_v3 = vadd.f32 1e-05, %v3353_v7  ;;  %v3372_v30 = vadd.f32 1e-05, %v3356_v23 }
 0x61d   : > { %v4364_v27 = vpop.eup %4363  ;;  %v3443_v9 = vadd.f32 %v5594_v25, %v3421_v24  ;;  %v3397_v58 = vmul.f32 %v4362_v4, %v5511_v15  ;;  %v3328_v46 = vpop.xlane.xlu0 %3327 }
 0x61e   : > { %v3400_v5 = vmul.f32 %v4364_v27, %v5514_v37  ;;  %4369 = vrsqrt.f32 %v3369_v3  ;;  %v3354_v32 = vmul.f32 0.0078125, %v3328_v46 }
 0x61f   : > { %3459 = vst [vmem:[%s4808_s24 + $0x10] sm:$0xff] %v3443_v9  ;;  %v3419_v0 = vmul.f32 %v5588_v38, %v3397_v58  ;;  %4371 = vrsqrt.f32 %v3372_v30 }
 0x620   : > { %v4366_v59 = vpop.eup %4365  ;;  %v3422_v62 = vmul.f32 %v5588_v38, %v3400_v5  ;;  %v3370_v40 = vadd.f32 1e-05, %v3354_v32 }
 0x621   : > { %v3441_v13 = vadd.f32 %v5594_v25, %v3419_v0  ;;  %v3398_v15 = vmul.f32 %v4366_v59, %v5521_v47 }
 0x622   : > { %v3444_v43 = vadd.f32 %v5594_v25, %v3422_v62  ;;  %4373 = vrsqrt.f32 %v3370_v40 }
 0x623   : > { %3457 = vst [vmem:[%s4808_s24] sm:$0xff] %v3441_v13  ;;  %v3420_v37 = vmul.f32 %v5588_v38, %v3398_v15 }
 0x624   : > { %3460 = vst [vmem:[%s4808_s24 + $0x18] sm:$0xff] %v3444_v43 }
 0x625   : > { %v3442_v50 = vadd.f32 %v5594_v25, %v3420_v37  ;;  %v3338_v10 = vpop.xlane.xlu1 %3337 }
 0x626   : > { %v3359_v48 = vmul.f32 0.0078125, %v3338_v10 }
 0x627   : > { %3458 = vst [vmem:[%s4808_s24 + $0x8] sm:$0xff] %v3442_v50  ;;  %v4368_v16 = vpop.eup %4367 }
 0x628   : > { %v3375_v21 = vadd.f32 1e-05, %v3359_v48  ;;  %v3403_v61 = vmul.f32 %v4368_v16, %v5526_v22 }
 0x629   : > { %v3334_v8 = vpop.xlane.xlu1 %3333  ;;  %v3340_v47 = vpop.xlane.xlu0 %3339 }
 0x62a   : > { %4375 = vrsqrt.f32 %v3375_v21  ;;  %v3357_v14 = vmul.f32 0.0078125, %v3334_v8  ;;  %v3360_v26 = vmul.f32 0.0078125, %v3340_v47  ;;  %v3425_v35 = vmul.f32 %v5588_v38, %v3403_v61 }
 0x62b   : > { %v4370_v29 = vpop.eup %4369 }
 0x62c   : > { %v3373_v19 = vadd.f32 1e-05, %v3357_v14  ;;  %v3376_v52 = vadd.f32 1e-05, %v3360_v26  ;;  %v4372_v56 = vpop.eup %4371  ;;  %v3447_v54 = vadd.f32 %v5594_v25, %v3425_v35  ;;  %v3401_v17 = vmul.f32 %v4370_v29, %v5531_v1 }
 0x62d   : > { %v3336_v28 = vpop.xlane.xlu0 %3335  ;;  %v3404_v22 = vmul.f32 %v4372_v56, %v5534_v49 }
 0x62e   : > { %4377 = vrsqrt.f32 %v3373_v19  ;;  %v3358_v36 = vmul.f32 0.0078125, %v3336_v28  ;;  %3463 = vst [vmem:[%s4808_s24 + $0x30] sm:$0xff] %v3447_v54  ;;  %v3423_v33 = vmul.f32 %v5588_v38, %v3401_v17 }
 0x62f   : > { %4379 = vrsqrt.f32 %v3376_v52  ;;  %v4374_v42 = vpop.eup %4373  ;;  %v3426_v18 = vmul.f32 %v5588_v38, %v3404_v22 }
 0x630   : > { %v3374_v20 = vadd.f32 1e-05, %v3358_v36  ;;  %v3445_v2 = vadd.f32 %v5594_v25, %v3423_v33  ;;  %v3402_v55 = vmul.f32 %v4374_v42, %v5541_v57 }
 0x631   : > { %v3448_v1 = vadd.f32 %v5594_v25, %v3426_v18 }
 0x632   : > { %4381 = vrsqrt.f32 %v3374_v20  ;;  %3461 = vst [vmem:[%s4808_s24 + $0x20] sm:$0xff] %v3445_v2  ;;  %v3424_v49 = vmul.f32 %v5588_v38, %v3402_v55 }
 0x633   : > { %3464 = vst [vmem:[%s4808_s24 + $0x38] sm:$0xff] %v3448_v1 }
 0x634   : > { %v3446_v44 = vadd.f32 %v5594_v25, %v3424_v49 }
 0x636   : > { %v3342_v39 = vpop.xlane.xlu1 %3341  ;;  %3462 = vst [vmem:[%s4808_s24 + $0x28] sm:$0xff] %v3446_v44 }
 0x637   : > { %v4376_v12 = vpop.eup %4375  ;;  %v3361_v41 = vmul.f32 0.0078125, %v3342_v39 }
 0x638   : > { %v3407_v45 = vmul.f32 %v4376_v12, %v5546_v11 }
 0x639   : > { %v3377_v24 = vadd.f32 1e-05, %v3361_v41 }
 0x63a   : > { %v3429_v7 = vmul.f32 %v5588_v38, %v3407_v45  ;;  %v3346_v57 = vpop.xlane.xlu1 %3345  ;;  %v3344_v23 = vpop.xlane.xlu0 %3343 }
 0x63b   : > { %v4378_v4 = vpop.eup %4377  ;;  %4383 = vrsqrt.f32 %v3377_v24  ;;  %v3363_v27 = vmul.f32 0.0078125, %v3346_v57  ;;  %v3362_v9 = vmul.f32 0.0078125, %v3344_v23 }
 0x63c   : > { %v4380_v58 = vpop.eup %4379  ;;  %v3451_v3 = vadd.f32 %v5594_v25, %v3429_v7  ;;  %v3405_v30 = vmul.f32 %v4378_v4, %v5551_v53 }
 0x63d   : > { %v3408_v5 = vmul.f32 %v4380_v58, %v5554_v60  ;;  %v3379_v46 = vadd.f32 1e-05, %v3363_v27  ;;  %v3378_v11 = vadd.f32 1e-05, %v3362_v9 }
 0x63e   : > { %3467 = vst [vmem:[%s4808_s24 + $0x50] sm:$0xff] %v3451_v3  ;;  %v3427_v0 = vmul.f32 %v5588_v38, %v3405_v30  ;;  %v3348_v32 = vpop.xlane.xlu0 %3347 }
 0x63f   : > { %v4382_v59 = vpop.eup %4381  ;;  %v3430_v62 = vmul.f32 %v5588_v38, %v3408_v5  ;;  %4385 = vrsqrt.f32 %v3379_v46  ;;  %v3364_v13 = vmul.f32 0.0078125, %v3348_v32 }
 0x640   : > { %v3449_v15 = vadd.f32 %v5594_v25, %v3427_v0  ;;  %v3406_v53 = vmul.f32 %v4382_v59, %v5561_v6  ;;  %4387 = vrsqrt.f32 %v3378_v11 }
 0x641   : > { %v3452_v60 = vadd.f32 %v5594_v25, %v3430_v62  ;;  %v3380_v40 = vadd.f32 1e-05, %v3364_v13 }
 0x642   : > { %3465 = vst [vmem:[%s4808_s24 + $0x40] sm:$0xff] %v3449_v15  ;;  %v3428_v43 = vmul.f32 %v5588_v38, %v3406_v53 }
 0x643   : > { %3468 = vst [vmem:[%s4808_s24 + $0x58] sm:$0xff] %v3452_v60  ;;  %4389 = vrsqrt.f32 %v3380_v40 }
 0x644   : > { %v3450_v37 = vadd.f32 %v5594_v25, %v3428_v43 }
 0x646   : > { %3466 = vst [vmem:[%s4808_s24 + $0x48] sm:$0xff] %v3450_v37 }
 0x648   : > { %v4384_v50 = vpop.eup %4383 }
 0x649   : > { %v3409_v10 = vmul.f32 %v4384_v50, %v5566_v34 }
 0x64b   : > { %v3431_v6 = vmul.f32 %v5588_v38, %v3409_v10 }
 0x64c   : > { %v4386_v48 = vpop.eup %4385 }
 0x64d   : > { %v4388_v16 = vpop.eup %4387  ;;  %v3453_v21 = vadd.f32 %v5594_v25, %v3431_v6  ;;  %v3411_v61 = vmul.f32 %v4386_v48, %v5571_v51 }
 0x64e   : > { %v3410_v8 = vmul.f32 %v4388_v16, %v5574_v63 }
 0x64f   : > { %3469 = vst [vmem:[%s4808_s24 + $0x60] sm:$0xff] %v3453_v21  ;;  %v3433_v47 = vmul.f32 %v5588_v38, %v3411_v61 }
 0x650   : > { %v4390_v14 = vpop.eup %4389  ;;  %v3432_v26 = vmul.f32 %v5588_v38, %v3410_v8 }
 0x651   : > { %v3455_v34 = vadd.f32 %v5594_v25, %v3433_v47  ;;  %v3412_v35 = vmul.f32 %v4390_v14, %v5581_v31 }
 0x652   : > { %v3454_v29 = vadd.f32 %v5594_v25, %v3432_v26 }
 0x653   : > { %3471 = vst [vmem:[%s4808_s24 + $0x70] sm:$0xff] %v3455_v34  ;;  %v3434_v19 = vmul.f32 %v5588_v38, %v3412_v35 }
 0x654   : > { %3470 = vst [vmem:[%s4808_s24 + $0x68] sm:$0xff] %v3454_v29 }
 0x655   : > { %v3456_v51 = vadd.f32 %v5594_v25, %v3434_v19 }
 0x657   : > { %3472 = vst [vmem:[%s4808_s24 + $0x78] sm:$0xff] %v3456_v51 }
 0x658 PF: > { %s5822_s1 = sld [smem:[#allocation13_spill]]  ;;  %s3487_s29 = sshll.u32 %s4808_s24, 4  ;;  %s5666_s29 = int_to_ptr.vmem [resolvable:$true] %s3487_s29 }
 0x659   : > { %s5823_s26 = sld [smem:[#allocation10_spill]]  ;;  %s4391_s7 = scalar_lea.vmem %s5666_s29, 2048 }
 0x65a   : > { %s5825_s21 = sld [smem:[#allocation40_spill]]  ;;  %p4392_p8 = scmp.ne.s32.totalorder %s5666_s29, %s4391_s7 }
 0x65b   : > { %s4502_s17 = smov [#allocation6]  }
 0x65c   : > { %p4393_p9 = pnand %p4392_p8, %p4697_p7  ;;  %s4395_s28 = sshll.u32 %s4502_s17, 4  ;;  %s4396_s28 = int_to_ptr.vmem [resolvable:$false] %s4395_s28 }
 0x65d   : > { %s4397_s6 = scalar_lea.vmem %s4396_s28, 4096  ;;  %p4398_p11 = scmp.lt.s32.totalorder %s5666_s29, %s4396_s28 }
 0x65e   : > { %s3772_s0 = sshll.u32 %s5822_s1, 11  ;;  %p4394_p10 = pneg %p4393_p9 }
 0x65f   : > { %s5826_s23 = sand.u32 1, %s5823_s26   ;;  %p4399_p13 = scmp.lt.s32.totalorder %s4397_s6, %s4391_s7 }
 0x660   : > { %s5663_s25 = scalar_lea.hbm %s5825_s21, %s3772_s0  ;;  %s5670_s22 = scalar_lea.sflag [#allocation7], %s5826_s23 }
 0x661   : > { %p4400_p0 = por %p4399_p13, %p4398_p11 }
 0x663   : > { %p4401_p1 = pnand %p4400_p0, %p4394_p10 }
 0x665   : > { %4404 = shalt.err (!%p4401_p1)
}
 0x666   : > { %s4405_s24 = scalar_lea.hbm %s5663_s25, 2048  ;;  %s4409_s18 = scalar_lea.hbm %s5825_s21, 4096 }
 0x667   : > { %p4406_p2 = scmp.ne.s32.totalorder %s5663_s25, %s4405_s24  ;;  %p4410_p5 = scmp.lt.s32.totalorder %s5663_s25, %s5825_s21 }
 0x668   : > { %p4411_p6 = scmp.lt.s32.totalorder %s4409_s18, %s4405_s24 }
 0x669   : > { %p4407_p3 = pnand %p4406_p2, %p4697_p7 }
 0x66a   : > { %p4412_p8 = por %p4411_p6, %p4410_p5 }
 0x66b   : > { %p4408_p4 = pneg %p4407_p3 }
 0x66d   : > { %p4413_p9 = pnand %p4412_p8, %p4408_p4 }
 0x66f   : > { %4416 = shalt.err (!%p4413_p9)
}
 0x670   : > { %s4503_s30 = smov 128   ;;  %s4504_s5 = smov 8  }
 0x671   : > { %4139 = dma.vmem_to_hbm [thread:$0]  (%p4697_p7), %s5666_s29, 2048, %s5663_s25, %s5670_s22, %s4503_s30, %s4503_s30, %s4504_s5  }
 0x672 PF: > { %s5827_s1 = sld [smem:[#allocation16_spill]] }
 0x673   : > { %s5828_s26 = sld [smem:[#allocation9_spill]] }
 0x678   : > { %p4145_p10 = scmp.ge.s32.totalorder %s5827_s1, 2 }
 0x679   : > { %s3502_s16 = sand.u32 1, %s5828_s26  }
 0x67a   : > { %p4142_p11 = pnand %p4145_p10, %p4705_p12  ;;  %s3503_s4 = scalar_lea.sflag [#allocation7], %s3502_s16 }
 0x67c   : > { %p4143_p13 = pneg %p4142_p11 }
 0x67e   : > { %4458 = dma.done.wait (%p4143_p13), %s3503_s4, 2048  }
 0x67f   : > { %4460 = vsyncadd (%p4143_p13), %s3503_s4, 4294965248  ;;  %s36_s27 = sadd.s32 1, %s5827_s1   ;;  %s5830_s4 = sld [smem:[#allocation10_spill]] }
 0x680   : > { %p33_p0 = scmp.ge.s32.totalorder %s36_s27, 6   ;;  %s5831_s30 = sld [smem:[#allocation11_spill]] }
 0x681   : > { %s5832_s24 = sld [smem:[#allocation21_spill]] }
 0x682   : > { %s5833_s25 = sld [smem:[#allocation12_spill]] }
 0x683   : > { %s5834_s5 = sld [smem:[#allocation22_spill]]  ;;  %35 = sbr.rel (!%p33_p0) target bundleno = 25 (0x19), region = 268 }
 0x684   : > { %s5835_s1 = sld [smem:[#allocation14_spill]] }
 0x685   : > { %s5836_s26 = sld [smem:[#allocation15_spill]] }
 0x686   : > { %s5837_s2 = sld [smem:[#allocation17_spill]] }
 0x687   : > { %s5838_s6 = sld [smem:[#allocation18_spill]] }
 0x688   :  { %3508 = vsyncpa [#allocation7], 1 }
 0x689   :  { %3510 = vsyncpa [#allocation7 + $0x1], 1 }

</bundles_post_ra>
